<compile_context>
chip_gen: v7x
topology: tpu7x:2x2x1
jax: 0.10.0
libtpu: 0.0.40
codegen_flags: <defaults>
</compile_context>

<pallas_src>
import functools
import math

import numpy as np
import jax
import jax.numpy as jnp
from jax import lax
from jax.experimental import pallas as pl
from jax.experimental.pallas import tpu as pltpu


# --------------------------------------------------------------------------
# In-kernel helpers (traced inside Pallas kernel bodies)
# --------------------------------------------------------------------------
def _ln(x, g, b, eps):
    """LayerNorm over the last (lane) dim.  x:(bb,T,C) f32, g/b:(1,C) f32."""
    mu = jnp.mean(x, axis=-1, keepdims=True)
    var = jnp.mean(jnp.square(x - mu), axis=-1, keepdims=True)
    return (x - mu) * lax.rsqrt(var + eps) * g + b


def _conv_taps(h, pad_ref, w_ref, bias, ksize, pad):
    """'same' Conv1d along time as K accumulating MXU matmuls.

    h: (bb, T, Cin) f32 value; pad_ref: (bb, T+2*pad, Cin) f32 VMEM scratch;
    w_ref: (K*Cin, Cout) bf16 ref, rows ordered tap-major; bias: (1, Cout) f32.
    Returns (bb*T, Cout) f32.
    """
    bb, t, cin = h.shape
    if ksize == 1:
        acc = jnp.dot(h.reshape(bb * t, cin).astype(jnp.bfloat16), w_ref[...],
                      preferred_element_type=jnp.float32)
    else:
        # Only the halo rows ever need to be zero; the interior rows are fully
        # overwritten every call, so never zero the whole buffer.
        pad_ref[:, :pad, :] = jnp.zeros((bb, pad, cin), jnp.float32)
        pad_ref[:, pad + t:, :] = jnp.zeros((bb, pad, cin), jnp.float32)
        pad_ref[:, pad:pad + t, :] = h
        acc = None
        for k in range(ksize):                      # static, small (K = 3 / 7)
            tap = pad_ref[:, k:k + t, :].reshape(bb * t, cin).astype(jnp.bfloat16)
            d = jnp.dot(tap, w_ref[k * cin:(k + 1) * cin, :],
                        preferred_element_type=jnp.float32)
            acc = d if acc is None else acc + d
    return acc + bias


# --------------------------------------------------------------------------
# Fused FFT-stack kernel: all layers of one FFTBlocks in a single pallas_call.
# grid = (batch blocks ["parallel"], layers ["arbitrary"]).
# --------------------------------------------------------------------------
def _fft_stack_kernel(len_ref, *refs, n_head, d_k, d_v, ksize, pad, eps, add_pitch):
    if add_pitch:
        (x_ref, pe_ref, pitch_ref,
         qkv_w, qkv_b, o_w, o_b, ln1_g, ln1_b, w1, b1, w2, b2, ln2_g, ln2_b,
         o_ref, carry_ref, a_ref, pad1_ref, pad2_ref) = refs
    else:
        pitch_ref = None
        (x_ref, pe_ref,
         qkv_w, qkv_b, o_w, o_b, ln1_g, ln1_b, w1, b1, w2, b2, ln2_g, ln2_b,
         o_ref, carry_ref, a_ref, pad1_ref, pad2_ref) = refs

    bb, T, C = x_ref.shape
    d_inner = w1.shape[1]
    H, dk, dv = n_head, d_k, d_v
    l = pl.program_id(1)
    n_layers = pl.num_programs(1)
    b_base = pl.program_id(0) * bb

    # per-row frame counts (scalars from SMEM via scalar prefetch)
    lens = [len_ref[b_base + b] for b in range(bb)]

    # non-pad mask (bb, T, 1), built in-kernel: 1.0 real frame, 0.0 padding
    b_idx = lax.broadcasted_iota(jnp.int32, (bb, T, 1), 0)
    t_idx = lax.broadcasted_iota(jnp.int32, (bb, T, 1), 1)
    thr = jnp.zeros((bb, T, 1), jnp.int32)
    for b in range(bb):
        thr = jnp.where(b_idx == b, lens[b], thr)
    npad = (t_idx < thr).astype(jnp.float32)

    # ---- layer 0: load input + masked positional encoding; the activation
    # then stays resident in the VMEM carry for every layer of the stack ----
    @pl.when(l == 0)
    def _():
        carry_ref[...] = (x_ref[...].astype(jnp.float32)
                          + pe_ref[...].astype(jnp.float32)[None, :, :] * npad)

    x = carry_ref[...]                                   # (bb, T, C) f32
    xf = x.reshape(bb * T, C)

    # ---- fused QKV projection: one wide bf16 matmul over all rows ----
    qkv = (jnp.dot(xf.astype(jnp.bfloat16), qkv_w[...],
                   preferred_element_type=jnp.float32) + qkv_b[...])
    qkv = qkv.reshape(bb, T, qkv.shape[-1])

    scale = 1.0 / math.sqrt(dk)
    q_off, k_off, v_off = 0, H * dk, 2 * H * dk
    lane_t = lax.broadcasted_iota(jnp.int32, (1, T), 1)

    # per-(row, head) attention; results go straight into a VMEM accumulator
    for b in range(bb):                                  # small static loops
        kbias = jnp.where(lane_t < lens[b], 0.0, -1e9).astype(jnp.float32)  # (1,T)
        for h in range(H):
            q = qkv[b, :, q_off + h * dk: q_off + (h + 1) * dk]
            k = qkv[b, :, k_off + h * dk: k_off + (h + 1) * dk]
            v = qkv[b, :, v_off + h * dv: v_off + (h + 1) * dv]
            s = lax.dot_general(q.astype(jnp.bfloat16), k.astype(jnp.bfloat16),
                                (((1,), (1,)), ((), ())),
                                preferred_element_type=jnp.float32) * scale + kbias
            s = s - jnp.max(s, axis=-1, keepdims=True)
            p = jnp.exp(s)
            p = p * pl.reciprocal(jnp.sum(p, axis=-1, keepdims=True), approx=True)
            a_ref[b, :, h * dv:(h + 1) * dv] = jnp.dot(
                p.astype(jnp.bfloat16), v.astype(jnp.bfloat16),
                preferred_element_type=jnp.float32)

    a = a_ref[...].reshape(bb * T, H * dv)
    attn = (jnp.dot(a.astype(jnp.bfloat16), o_w[...],
                    preferred_element_type=jnp.float32) + o_b[...]).reshape(bb, T, C)

    # ---- residual + LayerNorm + pad mask (sub-layer 1) ----
    y = _ln(attn + x, ln1_g[...], ln1_b[...], eps) * npad

    # ---- position-wise FFN: two 'same' convs as per-tap accumulating matmuls ----
    h1 = jnp.maximum(_conv_taps(y, pad1_ref, w1, b1[...], ksize, pad), 0.0)
    h1 = h1.reshape(bb, T, d_inner)
    h2 = _conv_taps(h1, pad2_ref, w2, b2[...], ksize, pad).reshape(bb, T, C)
    z = _ln(h2 + y, ln2_g[...], ln2_b[...], eps) * npad

    carry_ref[...] = z

    # ---- last layer: optional fused pitch add, single HBM writeback ----
    @pl.when(l == n_layers - 1)
    def _():
        out = z
        if add_pitch:
            out = out + pitch_ref[...].astype(jnp.float32)
        o_ref[...] = out.astype(o_ref.dtype)


def _pick_bb(batch, cap=8):
    """Largest divisor of `batch` that is <= cap (rows per grid step)."""
    bb = 1
    for d in range(1, min(batch, cap) + 1):
        if batch % d == 0:
            bb = d
    return bb


def fft_stack(sp, pos_table, x, feat_length, ecfg, pitch_encoding=None):
    """All n_layers of one FFTBlocks stack in a single pallas_call.

    x: (B, T, C); feat_length: (B,) int32; pitch_encoding: optional (B, T, C)
    added to the output of the last layer (fused).
    """
    B, T, C = x.shape
    H, dk, dv = ecfg["n_head"], ecfg["d_k"], ecfg["d_v"]
    K, pad = ecfg["fft_conv1d_kernel"], ecfg["fft_conv1d_padding"]
    d_inner = ecfg["d_inner"]
    n_layers = ecfg["n_layers"]
    assert K == 2 * pad + 1, "FFN conv must preserve the time length"
    assert T <= ecfg["max_seq_len"], "sequence longer than the positional table"

    bb = _pick_bb(B)
    nb = B // bb
    pe = pos_table[1:T + 1]                        # positions 1..T (0 = pad emb)
    add_pitch = pitch_encoding is not None

    def stacked(name):                             # per-layer stacked parameter
        a = sp[name]
        return pl.BlockSpec((None,) + tuple(a.shape[1:]),
                            lambda b, l, lens: (l, 0, 0))

    in_specs = [
        pl.BlockSpec((bb, T, C), lambda b, l, lens: (b, 0, 0)),   # x (read @ l==0)
        pl.BlockSpec((T, C), lambda b, l, lens: (0, 0)),          # pos enc slice
    ]
    inputs = [x, pe]
    if add_pitch:
        in_specs.append(pl.BlockSpec((bb, T, C), lambda b, l, lens: (b, 0, 0)))
        inputs.append(pitch_encoding)
    names = ("qkv_w", "qkv_b", "o_w", "o_b", "ln1_g", "ln1_b",
             "w1", "b1", "w2", "b2", "ln2_g", "ln2_b")
    in_specs += [stacked(n) for n in names]
    inputs += [sp[n] for n in names]

    kern = functools.partial(_fft_stack_kernel, n_head=H, d_k=dk, d_v=dv,
                             ksize=K, pad=pad, eps=1e-5, add_pitch=add_pitch)
    return pl.pallas_call(
        kern,
        grid_spec=pltpu.PrefetchScalarGridSpec(
            num_scalar_prefetch=1,
            grid=(nb, n_layers),
            in_specs=in_specs,
            out_specs=pl.BlockSpec((bb, T, C), lambda b, l, lens: (b, 0, 0)),
            scratch_shapes=[
                pltpu.VMEM((bb, T, C), jnp.float32),              # activation carry
                pltpu.VMEM((bb, T, H * dv), jnp.float32),         # head accumulator
                pltpu.VMEM((bb, T + 2 * pad, C), jnp.float32),    # FFN conv-1 pad halo
                pltpu.VMEM((bb, T + 2 * pad, d_inner), jnp.float32),  # FFN conv-2 pad halo
            ]),
        out_shape=jax.ShapeDtypeStruct((B, T, C), x.dtype),
        compiler_params=pltpu.CompilerParams(
            dimension_semantics=("parallel", "arbitrary")),
    )(feat_length, *inputs)


# --------------------------------------------------------------------------
# Fused pitch/energy encoder (Conv7-tanh, Conv3-tanh, Conv3-tanh, Conv1),
# bb batch rows per grid step.
# --------------------------------------------------------------------------
def _pitch_encoder_kernel(xp_ref, w0, b0, w1, b1, w2, b2, w3, b3,
                          o_ref, pad_ref, *, t_out):
    bb = xp_ref.shape[0]
    cin = xp_ref.shape[2]
    C = o_ref.shape[2]
    xp = xp_ref[...].astype(jnp.float32)            # (bb, T+6, cin), pre-padded

    acc = None                                      # K=7 conv: per-tap matmuls
    for k in range(7):
        tap = xp[:, k:k + t_out, :].reshape(bb * t_out, cin).astype(jnp.bfloat16)
        d = jnp.dot(tap, w0[k * cin:(k + 1) * cin, :],
                    preferred_element_type=jnp.float32)
        acc = d if acc is None else acc + d
    h = jnp.tanh(acc + b0[...]).reshape(bb, t_out, C)

    h = jnp.tanh(_conv_taps(h, pad_ref, w1, b1[...], 3, 1)).reshape(bb, t_out, C)
    h = jnp.tanh(_conv_taps(h, pad_ref, w2, b2[...], 3, 1)).reshape(bb, t_out, C)
    h = _conv_taps(h, pad_ref, w3, b3[...], 1, 0)
    o_ref[...] = h.reshape(bb, t_out, C).astype(o_ref.dtype)


def pitch_encoder(pp, x):
    """x: (B, T, pitch_dim+energy_dim) -> (B, T, C)."""
    B, T, cin = x.shape
    C = pp["w0"].shape[1]
    bb = _pick_bb(B)
    xp = jnp.pad(x, ((0, 0), (3, 3), (0, 0)))        # pad of the k=7 conv, in JAX
    names = ("w0", "b0", "w1", "b1", "w2", "b2", "w3", "b3")
    kern = functools.partial(_pitch_encoder_kernel, t_out=T)
    return pl.pallas_call(
        kern,
        grid=(B // bb,),
        in_specs=[pl.BlockSpec((bb, T + 6, cin), lambda i: (i, 0, 0))]
                 + [pl.BlockSpec(pp[n].shape, lambda i: (0, 0)) for n in names],
        out_specs=pl.BlockSpec((bb, T, C), lambda i: (i, 0, 0)),
        out_shape=jax.ShapeDtypeStruct((B, T, C), x.dtype),
        scratch_shapes=[pltpu.VMEM((bb, T + 2, C), jnp.float32)],
        compiler_params=pltpu.CompilerParams(dimension_semantics=("parallel",)),
    )(xp, *[pp[n] for n in names])


# --------------------------------------------------------------------------
# Glue (plain JAX)
# --------------------------------------------------------------------------
def avg_pool1d_ceil(x, scale):
    """F.avg_pool1d(x.transpose(1,2), k=scale, stride=scale, ceil_mode=True).transpose(1,2)."""
    B, T, C = x.shape
    t_out = -(-T // scale)
    pad = t_out * scale - T
    xp = jnp.pad(x, ((0, 0), (0, pad), (0, 0)))
    sums = xp.reshape(B, t_out, scale, C).sum(axis=2)
    starts = jnp.arange(t_out) * scale
    counts = (jnp.minimum(starts + scale, T) - starts).astype(x.dtype)
    return sums / counts[None, :, None]


def sinusoid_table(n_position, d_model):
    pos = np.arange(n_position)[:, None].astype(np.float64)
    i = np.arange(d_model)[None, :].astype(np.float64)
    angle = pos / np.power(10000.0, 2.0 * (i // 2) / d_model)
    table = np.zeros((n_position, d_model), dtype=np.float64)
    table[:, 0::2] = np.sin(angle[:, 0::2])
    table[:, 1::2] = np.cos(angle[:, 1::2])
    table[0] = 0.0  # padding_idx
    return jnp.asarray(table, dtype=jnp.float32)


def mams_encoder(p, emb, input_length, pitch, energy, ecfg):
    pe_in = jnp.concatenate([pitch, energy], axis=-1)            # (B,T,2)
    pitch_encoding = pitch_encoder(p["pitch_encoder"], pe_in)    # (B,T,C)

    outputs, content = [], None
    feat, feat_length = emb, input_length.astype(jnp.int32)
    for idx, (sp, scale) in enumerate(zip(p["encoders"], ecfg["downsample_scales"])):
        if scale > 1:
            feat = avg_pool1d_ceil(feat, scale)
            pitch_encoding = avg_pool1d_ceil(pitch_encoding, scale)
            feat_length = jnp.ceil(feat_length / scale).astype(jnp.int32)
        # assumes batch padded so feat.shape[1] == max(feat_length), as in torch
        if idx == 0:
            # content is the pre-pitch output of the first stack -> keep the
            # pitch add in XLA here (both tensors are needed anyway).
            content = fft_stack(sp, p["pos_table"], feat, feat_length, ecfg)
            feat = content + pitch_encoding
        else:
            # pitch-encoding add fused into the stack's last layer
            feat = fft_stack(sp, p["pos_table"], feat, feat_length, ecfg,
                             pitch_encoding=pitch_encoding)
        outputs.append((feat, feat_length))
    return outputs, content


# --------------------------------------------------------------------------
# Parameter construction (deterministic, synthetic; torch->here mapping:
# Linear (Dout,Din) -> (Din,Dout); Conv1d (Cout,Cin,K) -> (K*Cin,Cout) tap-major;
# per-layer params of each FFT stack stacked along a leading L axis.
# Matmul weights stored bf16; biases / LayerNorm params f32.)
# --------------------------------------------------------------------------
def make_params(key, cfg):
    ecfg = cfg["encoder"]
    C = cfg["in_channels"]
    H, dk, dv = ecfg["n_head"], ecfg["d_k"], ecfg["d_v"]
    K = ecfg["fft_conv1d_kernel"]
    d_inner = ecfg["d_inner"]
    L = ecfg["n_layers"]
    cin_p = cfg["pitch_dim"] + cfg["energy_dim"]
    dqkv = 2 * H * dk + H * dv
    kit = iter(jax.random.split(key, 256))

    def mat(shape, s=0.1, dtype=jnp.bfloat16):
        return (s * jax.random.normal(next(kit), shape, jnp.float32)).astype(dtype)

    def stack_params():
        return dict(
            qkv_w=mat((L, C, dqkv)), qkv_b=mat((L, 1, dqkv), 0.01, jnp.float32),
            o_w=mat((L, H * dv, C)), o_b=mat((L, 1, C), 0.01, jnp.float32),
            ln1_g=jnp.ones((L, 1, C), jnp.float32),
            ln1_b=jnp.zeros((L, 1, C), jnp.float32),
            w1=mat((L, K * C, d_inner)), b1=mat((L, 1, d_inner), 0.01, jnp.float32),
            w2=mat((L, K * d_inner, C)), b2=mat((L, 1, C), 0.01, jnp.float32),
            ln2_g=jnp.ones((L, 1, C), jnp.float32),
            ln2_b=jnp.zeros((L, 1, C), jnp.float32))

    return dict(
        pos_table=sinusoid_table(ecfg["max_seq_len"] + 1, C),
        pitch_encoder=dict(
            w0=mat((7 * cin_p, C)), b0=mat((1, C), 0.01, jnp.float32),
            w1=mat((3 * C, C)), b1=mat((1, C), 0.01, jnp.float32),
            w2=mat((3 * C, C)), b2=mat((1, C), 0.01, jnp.float32),
            w3=mat((1 * C, C)), b3=mat((1, C), 0.01, jnp.float32)),
        encoders=[stack_params() for _ in ecfg["downsample_scales"]],
    )


# --------------------------------------------------------------------------
# Demo
# --------------------------------------------------------------------------
if __name__ == "__main__":
    CFG = dict(
        in_channels=32, pitch_dim=1, energy_dim=1,
        encoder=dict(downsample_scales=[1, 2], max_seq_len=64, n_layers=2,
                     n_head=2, d_k=16, d_v=16, d_inner=64,
                     fft_conv1d_kernel=3, fft_conv1d_padding=1),
    )

    root = jax.random.PRNGKey(0)
    k_param, k_emb, k_pitch, k_energy = jax.random.split(root, 4)

    B, T = 2, 16
    emb = jax.random.normal(k_emb, (B, T, CFG["in_channels"]), jnp.float32)
    emb_length = jnp.array([16, 12], dtype=jnp.int32)
    pitch = jax.random.normal(k_pitch, (B, T, CFG["pitch_dim"]), jnp.float32)
    energy = jax.random.normal(k_energy, (B, T, CFG["energy_dim"]), jnp.float32)

    params = make_params(k_param, CFG)

    @jax.jit
    def forward(params, emb, emb_length, pitch, energy):
        return mams_encoder(params, emb, emb_length, pitch, energy, CFG["encoder"])

    outputs, content = forward(params, emb, emb_length, pitch, energy)

    for leaf in jax.tree_util.tree_leaves((outputs, content)):
        jax.block_until_ready(leaf)

    # sanity checks on shapes / values
    assert outputs[0][0].shape == (B, T, CFG["in_channels"])
    assert outputs[1][0].shape == (B, T // 2, CFG["in_channels"])
    assert content.shape == (B, T, CFG["in_channels"])
    assert int(outputs[1][1][1]) == 6          # ceil(12 / 2)
    assert bool(jnp.all(jnp.isfinite(outputs[0][0])))
    assert bool(jnp.all(jnp.isfinite(outputs[1][0])))
    assert bool(jnp.all(jnp.isfinite(content)))

    print("KERNEL_OK")
</pallas_src>

<mosaic_0001>
module attributes {stable_mosaic.version = 11 : i64} {
  func.func @_pitch_encoder_kernel(%arg0: i32, %arg1: memref<2x22x2xf32, #tpu.memory_space<vmem>>, %arg2: memref<14x32xbf16, #tpu.memory_space<vmem>>, %arg3: memref<1x32xf32, #tpu.memory_space<vmem>>, %arg4: memref<96x32xbf16, #tpu.memory_space<vmem>>, %arg5: memref<1x32xf32, #tpu.memory_space<vmem>>, %arg6: memref<96x32xbf16, #tpu.memory_space<vmem>>, %arg7: memref<1x32xf32, #tpu.memory_space<vmem>>, %arg8: memref<32x32xbf16, #tpu.memory_space<vmem>>, %arg9: memref<1x32xf32, #tpu.memory_space<vmem>>, %arg10: memref<2x16x32xf32, #tpu.memory_space<vmem>>, %arg11: memref<2x18x32xf32, #tpu.memory_space<vmem>>) attributes {dimension_semantics = [#tpu.dimension_semantics<parallel>], iteration_bounds = array<i64: 1>, scalar_prefetch = 0 : i64, scratch_operands = 1 : i64, tpu.core_type = #tpu.core_type<tc>, window_params = [{transform_indices = @transform_0, window_bounds = array<i64: 2, 22, 2>}, {pipeline_mode = #tpu.pipeline_mode<synchronous>, transform_indices = @transform_1, window_bounds = array<i64: 14, 32>}, {pipeline_mode = #tpu.pipeline_mode<synchronous>, transform_indices = @transform_2, window_bounds = array<i64: 1, 32>}, {pipeline_mode = #tpu.pipeline_mode<synchronous>, transform_indices = @transform_3, window_bounds = array<i64: 96, 32>}, {pipeline_mode = #tpu.pipeline_mode<synchronous>, transform_indices = @transform_4, window_bounds = array<i64: 1, 32>}, {pipeline_mode = #tpu.pipeline_mode<synchronous>, transform_indices = @transform_5, window_bounds = array<i64: 96, 32>}, {pipeline_mode = #tpu.pipeline_mode<synchronous>, transform_indices = @transform_6, window_bounds = array<i64: 1, 32>}, {pipeline_mode = #tpu.pipeline_mode<synchronous>, transform_indices = @transform_7, window_bounds = array<i64: 32, 32>}, {pipeline_mode = #tpu.pipeline_mode<synchronous>, transform_indices = @transform_8, window_bounds = array<i64: 1, 32>}, {transform_indices = @transform_9, window_bounds = array<i64: 2, 16, 32>}]} {
    %c0 = arith.constant 0 : index
    %c0_0 = arith.constant 0 : index
    %c0_1 = arith.constant 0 : index
    %0 = vector.load %arg1[%c0, %c0_0, %c0_1] : memref<2x22x2xf32, #tpu.memory_space<vmem>>, vector<2x22x2xf32>
    %1 = vector.extract_strided_slice %0 {offsets = [0, 0, 0], sizes = [2, 16, 2], strides = [1, 1, 1]} : vector<2x22x2xf32> to vector<2x16x2xf32>
    %2 = vector.shape_cast %1 : vector<2x16x2xf32> to vector<32x2xf32>
    %3 = arith.truncf %2 : vector<32x2xf32> to vector<32x2xbf16>
    %c0_2 = arith.constant 0 : index
    %c0_3 = arith.constant 0 : index
    %4 = vector.load %arg2[%c0_2, %c0_3] : memref<14x32xbf16, #tpu.memory_space<vmem>>, vector<2x32xbf16>
    %cst = arith.constant dense<0.000000e+00> : vector<32x32xf32>
    %5 = tpu.matmul %3, %4, %cst {dimension_numbers = #tpu.dot_dimension_numbers<[1], [0], [0], [1], [0, 0, 1, 1], [], []>} : vector<32x2xbf16>, vector<2x32xbf16>, vector<32x32xf32> -> vector<32x32xf32>
    %6 = vector.extract_strided_slice %0 {offsets = [0, 1, 0], sizes = [2, 16, 2], strides = [1, 1, 1]} : vector<2x22x2xf32> to vector<2x16x2xf32>
    %7 = vector.shape_cast %6 : vector<2x16x2xf32> to vector<32x2xf32>
    %8 = arith.truncf %7 : vector<32x2xf32> to vector<32x2xbf16>
    %c2 = arith.constant 2 : index
    %c0_4 = arith.constant 0 : index
    %9 = vector.load %arg2[%c2, %c0_4] : memref<14x32xbf16, #tpu.memory_space<vmem>>, vector<2x32xbf16>
    %cst_5 = arith.constant dense<0.000000e+00> : vector<32x32xf32>
    %10 = tpu.matmul %8, %9, %cst_5 {dimension_numbers = #tpu.dot_dimension_numbers<[1], [0], [0], [1], [0, 0, 1, 1], [], []>} : vector<32x2xbf16>, vector<2x32xbf16>, vector<32x32xf32> -> vector<32x32xf32>
    %11 = arith.addf %5, %10 : vector<32x32xf32>
    %12 = vector.extract_strided_slice %0 {offsets = [0, 2, 0], sizes = [2, 16, 2], strides = [1, 1, 1]} : vector<2x22x2xf32> to vector<2x16x2xf32>
    %13 = vector.shape_cast %12 : vector<2x16x2xf32> to vector<32x2xf32>
    %14 = arith.truncf %13 : vector<32x2xf32> to vector<32x2xbf16>
    %c4 = arith.constant 4 : index
    %c0_6 = arith.constant 0 : index
    %15 = vector.load %arg2[%c4, %c0_6] : memref<14x32xbf16, #tpu.memory_space<vmem>>, vector<2x32xbf16>
    %cst_7 = arith.constant dense<0.000000e+00> : vector<32x32xf32>
    %16 = tpu.matmul %14, %15, %cst_7 {dimension_numbers = #tpu.dot_dimension_numbers<[1], [0], [0], [1], [0, 0, 1, 1], [], []>} : vector<32x2xbf16>, vector<2x32xbf16>, vector<32x32xf32> -> vector<32x32xf32>
    %17 = arith.addf %11, %16 : vector<32x32xf32>
    %18 = vector.extract_strided_slice %0 {offsets = [0, 3, 0], sizes = [2, 16, 2], strides = [1, 1, 1]} : vector<2x22x2xf32> to vector<2x16x2xf32>
    %19 = vector.shape_cast %18 : vector<2x16x2xf32> to vector<32x2xf32>
    %20 = arith.truncf %19 : vector<32x2xf32> to vector<32x2xbf16>
    %c6 = arith.constant 6 : index
    %c0_8 = arith.constant 0 : index
    %21 = vector.load %arg2[%c6, %c0_8] : memref<14x32xbf16, #tpu.memory_space<vmem>>, vector<2x32xbf16>
    %cst_9 = arith.constant dense<0.000000e+00> : vector<32x32xf32>
    %22 = tpu.matmul %20, %21, %cst_9 {dimension_numbers = #tpu.dot_dimension_numbers<[1], [0], [0], [1], [0, 0, 1, 1], [], []>} : vector<32x2xbf16>, vector<2x32xbf16>, vector<32x32xf32> -> vector<32x32xf32>
    %23 = arith.addf %17, %22 : vector<32x32xf32>
    %24 = vector.extract_strided_slice %0 {offsets = [0, 4, 0], sizes = [2, 16, 2], strides = [1, 1, 1]} : vector<2x22x2xf32> to vector<2x16x2xf32>
    %25 = vector.shape_cast %24 : vector<2x16x2xf32> to vector<32x2xf32>
    %26 = arith.truncf %25 : vector<32x2xf32> to vector<32x2xbf16>
    %c8 = arith.constant 8 : index
    %c0_10 = arith.constant 0 : index
    %27 = vector.load %arg2[%c8, %c0_10] : memref<14x32xbf16, #tpu.memory_space<vmem>>, vector<2x32xbf16>
    %cst_11 = arith.constant dense<0.000000e+00> : vector<32x32xf32>
    %28 = tpu.matmul %26, %27, %cst_11 {dimension_numbers = #tpu.dot_dimension_numbers<[1], [0], [0], [1], [0, 0, 1, 1], [], []>} : vector<32x2xbf16>, vector<2x32xbf16>, vector<32x32xf32> -> vector<32x32xf32>
    %29 = arith.addf %23, %28 : vector<32x32xf32>
    %30 = vector.extract_strided_slice %0 {offsets = [0, 5, 0], sizes = [2, 16, 2], strides = [1, 1, 1]} : vector<2x22x2xf32> to vector<2x16x2xf32>
    %31 = vector.shape_cast %30 : vector<2x16x2xf32> to vector<32x2xf32>
    %32 = arith.truncf %31 : vector<32x2xf32> to vector<32x2xbf16>
    %c10 = arith.constant 10 : index
    %c0_12 = arith.constant 0 : index
    %33 = vector.load %arg2[%c10, %c0_12] : memref<14x32xbf16, #tpu.memory_space<vmem>>, vector<2x32xbf16>
    %cst_13 = arith.constant dense<0.000000e+00> : vector<32x32xf32>
    %34 = tpu.matmul %32, %33, %cst_13 {dimension_numbers = #tpu.dot_dimension_numbers<[1], [0], [0], [1], [0, 0, 1, 1], [], []>} : vector<32x2xbf16>, vector<2x32xbf16>, vector<32x32xf32> -> vector<32x32xf32>
    %35 = arith.addf %29, %34 : vector<32x32xf32>
    %36 = vector.extract_strided_slice %0 {offsets = [0, 6, 0], sizes = [2, 16, 2], strides = [1, 1, 1]} : vector<2x22x2xf32> to vector<2x16x2xf32>
    %37 = vector.shape_cast %36 : vector<2x16x2xf32> to vector<32x2xf32>
    %38 = arith.truncf %37 : vector<32x2xf32> to vector<32x2xbf16>
    %c12 = arith.constant 12 : index
    %c0_14 = arith.constant 0 : index
    %39 = vector.load %arg2[%c12, %c0_14] : memref<14x32xbf16, #tpu.memory_space<vmem>>, vector<2x32xbf16>
    %cst_15 = arith.constant dense<0.000000e+00> : vector<32x32xf32>
    %40 = tpu.matmul %38, %39, %cst_15 {dimension_numbers = #tpu.dot_dimension_numbers<[1], [0], [0], [1], [0, 0, 1, 1], [], []>} : vector<32x2xbf16>, vector<2x32xbf16>, vector<32x32xf32> -> vector<32x32xf32>
    %41 = arith.addf %35, %40 : vector<32x32xf32>
    %c0_16 = arith.constant 0 : index
    %c0_17 = arith.constant 0 : index
    %42 = vector.load %arg3[%c0_16, %c0_17] : memref<1x32xf32, #tpu.memory_space<vmem>>, vector<1x32xf32>
    %43 = vector.broadcast %42 : vector<1x32xf32> to vector<32x32xf32>
    %44 = arith.addf %41, %43 : vector<32x32xf32>
    %45 = math.tanh %44 : vector<32x32xf32>
    %46 = vector.shape_cast %45 : vector<32x32xf32> to vector<2x16x32xf32>
    %c0_18 = arith.constant 0 : index
    %c0_19 = arith.constant 0 : index
    %47 = vector.load %arg5[%c0_18, %c0_19] : memref<1x32xf32, #tpu.memory_space<vmem>>, vector<1x32xf32>
    %cst_20 = arith.constant 0.000000e+00 : f32
    %48 = vector.broadcast %cst_20 : f32 to vector<2x1x32xf32>
    %c0_21 = arith.constant 0 : index
    %c0_22 = arith.constant 0 : index
    %c0_23 = arith.constant 0 : index
    %49 = vector.load %arg11[%c0_21, %c0_22, %c0_23] : memref<2x18x32xf32, #tpu.memory_space<vmem>>, vector<2x1x32xf32>
    tpu.vector_store %arg11[%c0_21, %c0_22, %c0_23], %48 {strides = array<i32>} : memref<2x18x32xf32, #tpu.memory_space<vmem>>, vector<2x1x32xf32>,
    %cst_24 = arith.constant 0.000000e+00 : f32
    %50 = vector.broadcast %cst_24 : f32 to vector<2x1x32xf32>
    %c0_25 = arith.constant 0 : index
    %c17 = arith.constant 17 : index
    %c0_26 = arith.constant 0 : index
    %51 = vector.load %arg11[%c0_25, %c17, %c0_26] : memref<2x18x32xf32, #tpu.memory_space<vmem>>, vector<2x1x32xf32>
    tpu.vector_store %arg11[%c0_25, %c17, %c0_26], %50 {strides = array<i32>} : memref<2x18x32xf32, #tpu.memory_space<vmem>>, vector<2x1x32xf32>,
    %c0_27 = arith.constant 0 : index
    %c1 = arith.constant 1 : index
    %c0_28 = arith.constant 0 : index
    %52 = vector.load %arg11[%c0_27, %c1, %c0_28] : memref<2x18x32xf32, #tpu.memory_space<vmem>>, vector<2x16x32xf32>
    tpu.vector_store %arg11[%c0_27, %c1, %c0_28], %46 {strides = array<i32>} : memref<2x18x32xf32, #tpu.memory_space<vmem>>, vector<2x16x32xf32>,
    %c0_29 = arith.constant 0 : index
    %c0_30 = arith.constant 0 : index
    %c0_31 = arith.constant 0 : index
    %53 = vector.load %arg11[%c0_29, %c0_30, %c0_31] : memref<2x18x32xf32, #tpu.memory_space<vmem>>, vector<2x16x32xf32>
    %54 = vector.shape_cast %53 : vector<2x16x32xf32> to vector<32x32xf32>
    %55 = arith.truncf %54 : vector<32x32xf32> to vector<32x32xbf16>
    %c0_32 = arith.constant 0 : index
    %c0_33 = arith.constant 0 : index
    %56 = vector.load %arg4[%c0_32, %c0_33] : memref<96x32xbf16, #tpu.memory_space<vmem>>, vector<32x32xbf16>
    %cst_34 = arith.constant dense<0.000000e+00> : vector<32x32xf32>
    %57 = tpu.matmul %55, %56, %cst_34 {dimension_numbers = #tpu.dot_dimension_numbers<[1], [0], [0], [1], [0, 0, 1, 1], [], []>} : vector<32x32xbf16>, vector<32x32xbf16>, vector<32x32xf32> -> vector<32x32xf32>
    %c0_35 = arith.constant 0 : index
    %c1_36 = arith.constant 1 : index
    %c0_37 = arith.constant 0 : index
    %58 = vector.load %arg11[%c0_35, %c1_36, %c0_37] : memref<2x18x32xf32, #tpu.memory_space<vmem>>, vector<2x16x32xf32>
    %59 = vector.shape_cast %58 : vector<2x16x32xf32> to vector<32x32xf32>
    %60 = arith.truncf %59 : vector<32x32xf32> to vector<32x32xbf16>
    %c32 = arith.constant 32 : index
    %c0_38 = arith.constant 0 : index
    %61 = vector.load %arg4[%c32, %c0_38] : memref<96x32xbf16, #tpu.memory_space<vmem>>, vector<32x32xbf16>
    %cst_39 = arith.constant dense<0.000000e+00> : vector<32x32xf32>
    %62 = tpu.matmul %60, %61, %cst_39 {dimension_numbers = #tpu.dot_dimension_numbers<[1], [0], [0], [1], [0, 0, 1, 1], [], []>} : vector<32x32xbf16>, vector<32x32xbf16>, vector<32x32xf32> -> vector<32x32xf32>
    %63 = arith.addf %57, %62 : vector<32x32xf32>
    %c0_40 = arith.constant 0 : index
    %c2_41 = arith.constant 2 : index
    %c0_42 = arith.constant 0 : index
    %64 = vector.load %arg11[%c0_40, %c2_41, %c0_42] : memref<2x18x32xf32, #tpu.memory_space<vmem>>, vector<2x16x32xf32>
    %65 = vector.shape_cast %64 : vector<2x16x32xf32> to vector<32x32xf32>
    %66 = arith.truncf %65 : vector<32x32xf32> to vector<32x32xbf16>
    %c64 = arith.constant 64 : index
    %c0_43 = arith.constant 0 : index
    %67 = vector.load %arg4[%c64, %c0_43] : memref<96x32xbf16, #tpu.memory_space<vmem>>, vector<32x32xbf16>
    %cst_44 = arith.constant dense<0.000000e+00> : vector<32x32xf32>
    %68 = tpu.matmul %66, %67, %cst_44 {dimension_numbers = #tpu.dot_dimension_numbers<[1], [0], [0], [1], [0, 0, 1, 1], [], []>} : vector<32x32xbf16>, vector<32x32xbf16>, vector<32x32xf32> -> vector<32x32xf32>
    %69 = arith.addf %63, %68 : vector<32x32xf32>
    %70 = vector.broadcast %47 : vector<1x32xf32> to vector<32x32xf32>
    %71 = arith.addf %69, %70 : vector<32x32xf32>
    %72 = math.tanh %71 : vector<32x32xf32>
    %73 = vector.shape_cast %72 : vector<32x32xf32> to vector<2x16x32xf32>
    %c0_45 = arith.constant 0 : index
    %c0_46 = arith.constant 0 : index
    %74 = vector.load %arg7[%c0_45, %c0_46] : memref<1x32xf32, #tpu.memory_space<vmem>>, vector<1x32xf32>
    %cst_47 = arith.constant 0.000000e+00 : f32
    %75 = vector.broadcast %cst_47 : f32 to vector<2x1x32xf32>
    %c0_48 = arith.constant 0 : index
    %c0_49 = arith.constant 0 : index
    %c0_50 = arith.constant 0 : index
    %76 = vector.load %arg11[%c0_48, %c0_49, %c0_50] : memref<2x18x32xf32, #tpu.memory_space<vmem>>, vector<2x1x32xf32>
    tpu.vector_store %arg11[%c0_48, %c0_49, %c0_50], %75 {strides = array<i32>} : memref<2x18x32xf32, #tpu.memory_space<vmem>>, vector<2x1x32xf32>,
    %cst_51 = arith.constant 0.000000e+00 : f32
    %77 = vector.broadcast %cst_51 : f32 to vector<2x1x32xf32>
    %c0_52 = arith.constant 0 : index
    %c17_53 = arith.constant 17 : index
    %c0_54 = arith.constant 0 : index
    %78 = vector.load %arg11[%c0_52, %c17_53, %c0_54] : memref<2x18x32xf32, #tpu.memory_space<vmem>>, vector<2x1x32xf32>
    tpu.vector_store %arg11[%c0_52, %c17_53, %c0_54], %77 {strides = array<i32>} : memref<2x18x32xf32, #tpu.memory_space<vmem>>, vector<2x1x32xf32>,
    %c0_55 = arith.constant 0 : index
    %c1_56 = arith.constant 1 : index
    %c0_57 = arith.constant 0 : index
    %79 = vector.load %arg11[%c0_55, %c1_56, %c0_57] : memref<2x18x32xf32, #tpu.memory_space<vmem>>, vector<2x16x32xf32>
    tpu.vector_store %arg11[%c0_55, %c1_56, %c0_57], %73 {strides = array<i32>} : memref<2x18x32xf32, #tpu.memory_space<vmem>>, vector<2x16x32xf32>,
    %c0_58 = arith.constant 0 : index
    %c0_59 = arith.constant 0 : index
    %c0_60 = arith.constant 0 : index
    %80 = vector.load %arg11[%c0_58, %c0_59, %c0_60] : memref<2x18x32xf32, #tpu.memory_space<vmem>>, vector<2x16x32xf32>
    %81 = vector.shape_cast %80 : vector<2x16x32xf32> to vector<32x32xf32>
    %82 = arith.truncf %81 : vector<32x32xf32> to vector<32x32xbf16>
    %c0_61 = arith.constant 0 : index
    %c0_62 = arith.constant 0 : index
    %83 = vector.load %arg6[%c0_61, %c0_62] : memref<96x32xbf16, #tpu.memory_space<vmem>>, vector<32x32xbf16>
    %cst_63 = arith.constant dense<0.000000e+00> : vector<32x32xf32>
    %84 = tpu.matmul %82, %83, %cst_63 {dimension_numbers = #tpu.dot_dimension_numbers<[1], [0], [0], [1], [0, 0, 1, 1], [], []>} : vector<32x32xbf16>, vector<32x32xbf16>, vector<32x32xf32> -> vector<32x32xf32>
    %c0_64 = arith.constant 0 : index
    %c1_65 = arith.constant 1 : index
    %c0_66 = arith.constant 0 : index
    %85 = vector.load %arg11[%c0_64, %c1_65, %c0_66] : memref<2x18x32xf32, #tpu.memory_space<vmem>>, vector<2x16x32xf32>
    %86 = vector.shape_cast %85 : vector<2x16x32xf32> to vector<32x32xf32>
    %87 = arith.truncf %86 : vector<32x32xf32> to vector<32x32xbf16>
    %c32_67 = arith.constant 32 : index
    %c0_68 = arith.constant 0 : index
    %88 = vector.load %arg6[%c32_67, %c0_68] : memref<96x32xbf16, #tpu.memory_space<vmem>>, vector<32x32xbf16>
    %cst_69 = arith.constant dense<0.000000e+00> : vector<32x32xf32>
    %89 = tpu.matmul %87, %88, %cst_69 {dimension_numbers = #tpu.dot_dimension_numbers<[1], [0], [0], [1], [0, 0, 1, 1], [], []>} : vector<32x32xbf16>, vector<32x32xbf16>, vector<32x32xf32> -> vector<32x32xf32>
    %90 = arith.addf %84, %89 : vector<32x32xf32>
    %c0_70 = arith.constant 0 : index
    %c2_71 = arith.constant 2 : index
    %c0_72 = arith.constant 0 : index
    %91 = vector.load %arg11[%c0_70, %c2_71, %c0_72] : memref<2x18x32xf32, #tpu.memory_space<vmem>>, vector<2x16x32xf32>
    %92 = vector.shape_cast %91 : vector<2x16x32xf32> to vector<32x32xf32>
    %93 = arith.truncf %92 : vector<32x32xf32> to vector<32x32xbf16>
    %c64_73 = arith.constant 64 : index
    %c0_74 = arith.constant 0 : index
    %94 = vector.load %arg6[%c64_73, %c0_74] : memref<96x32xbf16, #tpu.memory_space<vmem>>, vector<32x32xbf16>
    %cst_75 = arith.constant dense<0.000000e+00> : vector<32x32xf32>
    %95 = tpu.matmul %93, %94, %cst_75 {dimension_numbers = #tpu.dot_dimension_numbers<[1], [0], [0], [1], [0, 0, 1, 1], [], []>} : vector<32x32xbf16>, vector<32x32xbf16>, vector<32x32xf32> -> vector<32x32xf32>
    %96 = arith.addf %90, %95 : vector<32x32xf32>
    %97 = vector.broadcast %74 : vector<1x32xf32> to vector<32x32xf32>
    %98 = arith.addf %96, %97 : vector<32x32xf32>
    %99 = math.tanh %98 : vector<32x32xf32>
    %100 = vector.shape_cast %99 : vector<32x32xf32> to vector<2x16x32xf32>
    %c0_76 = arith.constant 0 : index
    %c0_77 = arith.constant 0 : index
    %101 = vector.load %arg9[%c0_76, %c0_77] : memref<1x32xf32, #tpu.memory_space<vmem>>, vector<1x32xf32>
    %102 = vector.shape_cast %100 : vector<2x16x32xf32> to vector<32x32xf32>
    %103 = arith.truncf %102 : vector<32x32xf32> to vector<32x32xbf16>
    %c0_78 = arith.constant 0 : index
    %c0_79 = arith.constant 0 : index
    %104 = vector.load %arg8[%c0_78, %c0_79] : memref<32x32xbf16, #tpu.memory_space<vmem>>, vector<32x32xbf16>
    %cst_80 = arith.constant dense<0.000000e+00> : vector<32x32xf32>
    %105 = tpu.matmul %103, %104, %cst_80 {dimension_numbers = #tpu.dot_dimension_numbers<[1], [0], [0], [1], [0, 0, 1, 1], [], []>} : vector<32x32xbf16>, vector<32x32xbf16>, vector<32x32xf32> -> vector<32x32xf32>
    %106 = vector.broadcast %101 : vector<1x32xf32> to vector<32x32xf32>
    %107 = arith.addf %105, %106 : vector<32x32xf32>
    %108 = vector.shape_cast %107 : vector<32x32xf32> to vector<2x16x32xf32>
    %c0_81 = arith.constant 0 : index
    %c0_82 = arith.constant 0 : index
    %c0_83 = arith.constant 0 : index
    %109 = vector.load %arg10[%c0_81, %c0_82, %c0_83] : memref<2x16x32xf32, #tpu.memory_space<vmem>>, vector<2x16x32xf32>
    tpu.vector_store %arg10[%c0_81, %c0_82, %c0_83], %108 {strides = array<i32>} : memref<2x16x32xf32, #tpu.memory_space<vmem>>, vector<2x16x32xf32>,
    return
  }
  func.func @transform_0(%arg0: i32) -> (i32, i32, i32) {
    %c0_i32 = arith.constant 0 : i32
    %c0_i32_0 = arith.constant 0 : i32
    %c0_i32_1 = arith.constant 0 : i32
    return %arg0, %c0_i32, %c0_i32_0 : i32, i32, i32
  }
  func.func @transform_1(%arg0: i32) -> (i32, i32) {
    %c0_i32 = arith.constant 0 : i32
    %c0_i32_0 = arith.constant 0 : i32
    %c0_i32_1 = arith.constant 0 : i32
    return %c0_i32, %c0_i32_0 : i32, i32
  }
  func.func @transform_2(%arg0: i32) -> (i32, i32) {
    %c0_i32 = arith.constant 0 : i32
    %c0_i32_0 = arith.constant 0 : i32
    %c0_i32_1 = arith.constant 0 : i32
    return %c0_i32, %c0_i32_0 : i32, i32
  }
  func.func @transform_3(%arg0: i32) -> (i32, i32) {
    %c0_i32 = arith.constant 0 : i32
    %c0_i32_0 = arith.constant 0 : i32
    %c0_i32_1 = arith.constant 0 : i32
    return %c0_i32, %c0_i32_0 : i32, i32
  }
  func.func @transform_4(%arg0: i32) -> (i32, i32) {
    %c0_i32 = arith.constant 0 : i32
    %c0_i32_0 = arith.constant 0 : i32
    %c0_i32_1 = arith.constant 0 : i32
    return %c0_i32, %c0_i32_0 : i32, i32
  }
  func.func @transform_5(%arg0: i32) -> (i32, i32) {
    %c0_i32 = arith.constant 0 : i32
    %c0_i32_0 = arith.constant 0 : i32
    %c0_i32_1 = arith.constant 0 : i32
    return %c0_i32, %c0_i32_0 : i32, i32
  }
  func.func @transform_6(%arg0: i32) -> (i32, i32) {
    %c0_i32 = arith.constant 0 : i32
    %c0_i32_0 = arith.constant 0 : i32
    %c0_i32_1 = arith.constant 0 : i32
    return %c0_i32, %c0_i32_0 : i32, i32
  }
  func.func @transform_7(%arg0: i32) -> (i32, i32) {
    %c0_i32 = arith.constant 0 : i32
    %c0_i32_0 = arith.constant 0 : i32
    %c0_i32_1 = arith.constant 0 : i32
    return %c0_i32, %c0_i32_0 : i32, i32
  }
  func.func @transform_8(%arg0: i32) -> (i32, i32) {
    %c0_i32 = arith.constant 0 : i32
    %c0_i32_0 = arith.constant 0 : i32
    %c0_i32_1 = arith.constant 0 : i32
    return %c0_i32, %c0_i32_0 : i32, i32
  }
  func.func @transform_9(%arg0: i32) -> (i32, i32, i32) {
    %c0_i32 = arith.constant 0 : i32
    %c0_i32_0 = arith.constant 0 : i32
    %c0_i32_1 = arith.constant 0 : i32
    return %arg0, %c0_i32, %c0_i32_0 : i32, i32, i32
  }
}

module attributes {stable_mosaic.version = 11 : i64} {
  func.func @_fft_stack_kernel(%arg0: i32, %arg1: i32, %arg2: memref<2xi32, #tpu.memory_space<smem>>, %arg3: memref<2x16x32xf32, #tpu.memory_space<vmem>>, %arg4: memref<16x32xf32, #tpu.memory_space<vmem>>, %arg5: memref<1x32x96xbf16, #tpu.memory_space<vmem>>, %arg6: memref<1x1x96xf32, #tpu.memory_space<vmem>>, %arg7: memref<1x32x32xbf16, #tpu.memory_space<vmem>>, %arg8: memref<1x1x32xf32, #tpu.memory_space<vmem>>, %arg9: memref<1x1x32xf32, #tpu.memory_space<vmem>>, %arg10: memref<1x1x32xf32, #tpu.memory_space<vmem>>, %arg11: memref<1x96x64xbf16, #tpu.memory_space<vmem>>, %arg12: memref<1x1x64xf32, #tpu.memory_space<vmem>>, %arg13: memref<1x192x32xbf16, #tpu.memory_space<vmem>>, %arg14: memref<1x1x32xf32, #tpu.memory_space<vmem>>, %arg15: memref<1x1x32xf32, #tpu.memory_space<vmem>>, %arg16: memref<1x1x32xf32, #tpu.memory_space<vmem>>, %arg17: memref<2x16x32xf32, #tpu.memory_space<vmem>>, %arg18: memref<2x16x32xf32, #tpu.memory_space<vmem>>, %arg19: memref<2x16x32xf32, #tpu.memory_space<vmem>>, %arg20: memref<2x18x32xf32, #tpu.memory_space<vmem>>, %arg21: memref<2x18x64xf32, #tpu.memory_space<vmem>>) attributes {dimension_semantics = [#tpu.dimension_semantics<parallel>, #tpu.dimension_semantics<arbitrary>], iteration_bounds = array<i64: 1, 2>, scalar_prefetch = 1 : i64, scratch_operands = 4 : i64, tpu.core_type = #tpu.core_type<tc>, window_params = [{transform_indices = @transform_0, window_bounds = array<i64: 2, 16, 32>}, {pipeline_mode = #tpu.pipeline_mode<synchronous>, transform_indices = @transform_1, window_bounds = array<i64: 16, 32>}, {transform_indices = @transform_2, window_bounds = array<i64: 1, 32, 96>}, {transform_indices = @transform_3, window_bounds = array<i64: 1, 1, 96>}, {transform_indices = @transform_4, window_bounds = array<i64: 1, 32, 32>}, {transform_indices = @transform_5, window_bounds = array<i64: 1, 1, 32>}, {transform_indices = @transform_6, window_bounds = array<i64: 1, 1, 32>}, {transform_indices = @transform_7, window_bounds = array<i64: 1, 1, 32>}, {transform_indices = @transform_8, window_bounds = array<i64: 1, 96, 64>}, {transform_indices = @transform_9, window_bounds = array<i64: 1, 1, 64>}, {transform_indices = @transform_10, window_bounds = array<i64: 1, 192, 32>}, {transform_indices = @transform_11, window_bounds = array<i64: 1, 1, 32>}, {transform_indices = @transform_12, window_bounds = array<i64: 1, 1, 32>}, {transform_indices = @transform_13, window_bounds = array<i64: 1, 1, 32>}, {transform_indices = @transform_14, window_bounds = array<i64: 2, 16, 32>}]} {
    %c2_i32 = arith.constant 2 : i32
    %0 = arith.muli %arg0, %c2_i32 : i32
    %c0_i32 = arith.constant 0 : i32
    %1 = arith.addi %0, %c0_i32 : i32
    %2 = arith.index_cast %1 : i32 to index
    %3 = memref.load %arg2[%2] : memref<2xi32, #tpu.memory_space<smem>>
    %c1_i32 = arith.constant 1 : i32
    %4 = arith.addi %0, %c1_i32 : i32
    %5 = arith.index_cast %4 : i32 to index
    %6 = memref.load %arg2[%5] : memref<2xi32, #tpu.memory_space<smem>>
    %7 = tpu.iota {dimensions = array<i32: 0>} : vector<2x16x1xi32>
    %8 = tpu.iota {dimensions = array<i32: 1>} : vector<2x16x1xi32>
    %c0_i32_0 = arith.constant 0 : i32
    %9 = vector.broadcast %c0_i32_0 : i32 to vector<2x16x1xi32>
    %c0_i32_1 = arith.constant 0 : i32
    %10 = vector.broadcast %c0_i32_1 : i32 to vector<2x16x1xi32>
    %11 = arith.cmpi eq, %7, %10 : vector<2x16x1xi32>
    %12 = vector.broadcast %3 : i32 to vector<2x16x1xi32>
    %13 = arith.select %11, %12, %9 : vector<2x16x1xi1>, vector<2x16x1xi32>
    %c1_i32_2 = arith.constant 1 : i32
    %14 = vector.broadcast %c1_i32_2 : i32 to vector<2x16x1xi32>
    %15 = arith.cmpi eq, %7, %14 : vector<2x16x1xi32>
    %16 = vector.broadcast %6 : i32 to vector<2x16x1xi32>
    %17 = arith.select %15, %16, %13 : vector<2x16x1xi1>, vector<2x16x1xi32>
    %18 = arith.cmpi slt, %8, %17 : vector<2x16x1xi32>
    %19 = arith.extui %18 : vector<2x16x1xi1> to vector<2x16x1xi32>
    %20 = arith.sitofp %19 : vector<2x16x1xi32> to vector<2x16x1xf32>
    %c0_i32_3 = arith.constant 0 : i32
    %21 = arith.cmpi eq, %arg1, %c0_i32_3 : i32
    %22 = arith.extui %21 : i1 to i32
    %c0_i32_4 = arith.constant 0 : i32
    %23 = arith.cmpi ne, %22, %c0_i32_4 : i32
    scf.if %23 {
      %c0_150 = arith.constant 0 : index
      %c0_151 = arith.constant 0 : index
      %c0_152 = arith.constant 0 : index
      %301 = vector.load %arg3[%c0_150, %c0_151, %c0_152] : memref<2x16x32xf32, #tpu.memory_space<vmem>>, vector<2x16x32xf32>
      %c0_153 = arith.constant 0 : index
      %c0_154 = arith.constant 0 : index
      %302 = vector.load %arg4[%c0_153, %c0_154] : memref<16x32xf32, #tpu.memory_space<vmem>>, vector<16x32xf32>
      %303 = vector.shape_cast %302 : vector<16x32xf32> to vector<1x16x32xf32>
      %304 = vector.broadcast %303 : vector<1x16x32xf32> to vector<2x16x32xf32>
      %305 = vector.broadcast %20 : vector<2x16x1xf32> to vector<2x16x32xf32>
      %306 = arith.mulf %304, %305 : vector<2x16x32xf32>
      %307 = arith.addf %301, %306 : vector<2x16x32xf32>
      %c0_155 = arith.constant 0 : index
      %c0_156 = arith.constant 0 : index
      %c0_157 = arith.constant 0 : index
      %308 = vector.load %arg18[%c0_155, %c0_156, %c0_157] : memref<2x16x32xf32, #tpu.memory_space<vmem>>, vector<2x16x32xf32>
      tpu.vector_store %arg18[%c0_155, %c0_156, %c0_157], %307 {strides = array<i32>} : memref<2x16x32xf32, #tpu.memory_space<vmem>>, vector<2x16x32xf32>,
    } else {
    }
    %c0 = arith.constant 0 : index
    %c0_5 = arith.constant 0 : index
    %c0_6 = arith.constant 0 : index
    %24 = vector.load %arg18[%c0, %c0_5, %c0_6] : memref<2x16x32xf32, #tpu.memory_space<vmem>>, vector<2x16x32xf32>
    %25 = vector.shape_cast %24 : vector<2x16x32xf32> to vector<32x32xf32>
    %26 = arith.truncf %25 : vector<32x32xf32> to vector<32x32xbf16>
    %c0_7 = arith.constant 0 : index
    %c0_8 = arith.constant 0 : index
    %c0_9 = arith.constant 0 : index
    %27 = vector.load %arg5[%c0_7, %c0_8, %c0_9] : memref<1x32x96xbf16, #tpu.memory_space<vmem>>, vector<1x32x96xbf16>
    %28 = vector.shape_cast %27 : vector<1x32x96xbf16> to vector<32x96xbf16>
    %cst = arith.constant dense<0.000000e+00> : vector<32x96xf32>
    %29 = tpu.matmul %26, %28, %cst {dimension_numbers = #tpu.dot_dimension_numbers<[1], [0], [0], [1], [0, 0, 1, 1], [], []>} : vector<32x32xbf16>, vector<32x96xbf16>, vector<32x96xf32> -> vector<32x96xf32>
    %c0_10 = arith.constant 0 : index
    %c0_11 = arith.constant 0 : index
    %c0_12 = arith.constant 0 : index
    %30 = vector.load %arg6[%c0_10, %c0_11, %c0_12] : memref<1x1x96xf32, #tpu.memory_space<vmem>>, vector<1x1x96xf32>
    %31 = vector.shape_cast %30 : vector<1x1x96xf32> to vector<1x96xf32>
    %32 = vector.broadcast %31 : vector<1x96xf32> to vector<32x96xf32>
    %33 = arith.addf %29, %32 : vector<32x96xf32>
    %34 = vector.shape_cast %33 : vector<32x96xf32> to vector<2x16x96xf32>
    %35 = tpu.iota {dimensions = array<i32: 1>} : vector<1x16xi32>
    %36 = vector.broadcast %3 : i32 to vector<1x16xi32>
    %37 = arith.cmpi slt, %35, %36 : vector<1x16xi32>
    %cst_13 = arith.constant 0.000000e+00 : f32
    %cst_14 = arith.constant -1.000000e+09 : f32
    %38 = vector.broadcast %cst_13 : f32 to vector<1x16xf32>
    %39 = vector.broadcast %cst_14 : f32 to vector<1x16xf32>
    %40 = arith.select %37, %38, %39 : vector<1x16xi1>, vector<1x16xf32>
    %41 = vector.extract_strided_slice %34 {offsets = [0, 0, 0], sizes = [1, 16, 16], strides = [1, 1, 1]} : vector<2x16x96xf32> to vector<1x16x16xf32>
    %42 = vector.shape_cast %41 : vector<1x16x16xf32> to vector<16x16xf32>
    %43 = vector.extract_strided_slice %34 {offsets = [0, 0, 32], sizes = [1, 16, 16], strides = [1, 1, 1]} : vector<2x16x96xf32> to vector<1x16x16xf32>
    %44 = vector.shape_cast %43 : vector<1x16x16xf32> to vector<16x16xf32>
    %45 = vector.extract_strided_slice %34 {offsets = [0, 0, 64], sizes = [1, 16, 16], strides = [1, 1, 1]} : vector<2x16x96xf32> to vector<1x16x16xf32>
    %46 = vector.shape_cast %45 : vector<1x16x16xf32> to vector<16x16xf32>
    %47 = arith.truncf %42 : vector<16x16xf32> to vector<16x16xbf16>
    %48 = arith.truncf %44 : vector<16x16xf32> to vector<16x16xbf16>
    %cst_15 = arith.constant dense<0.000000e+00> : vector<16x16xf32>
    %49 = tpu.matmul %47, %48, %cst_15 {dimension_numbers = #tpu.dot_dimension_numbers<[1], [1], [0], [0], [0, 0, 1, 0], [], []>} : vector<16x16xbf16>, vector<16x16xbf16>, vector<16x16xf32> -> vector<16x16xf32>
    %cst_16 = arith.constant 2.500000e-01 : f32
    %50 = vector.broadcast %cst_16 : f32 to vector<16x16xf32>
    %51 = arith.mulf %49, %50 : vector<16x16xf32>
    %52 = vector.broadcast %40 : vector<1x16xf32> to vector<16x16xf32>
    %53 = arith.addf %51, %52 : vector<16x16xf32>
    %cst_17 = arith.constant dense<0xFF800000> : vector<16xf32>
    %54 = vector.multi_reduction <maximumf>, %53, %cst_17 [1] : vector<16x16xf32> to vector<16xf32>
    %55 = vector.shape_cast %54 : vector<16xf32> to vector<16x1xf32>
    %56 = vector.broadcast %55 : vector<16x1xf32> to vector<16x16xf32>
    %57 = arith.subf %53, %56 : vector<16x16xf32>
    %58 = math.exp %57 : vector<16x16xf32>
    %cst_18 = arith.constant dense<0.000000e+00> : vector<16xf32>
    %59 = vector.multi_reduction <add>, %58, %cst_18 [1] : vector<16x16xf32> to vector<16xf32>
    %60 = vector.shape_cast %59 : vector<16xf32> to vector<16x1xf32>
    %61 = tpu.reciprocal %60 {approx = true} : vector<16x1xf32> -> vector<16x1xf32>
    %62 = vector.broadcast %61 : vector<16x1xf32> to vector<16x16xf32>
    %63 = arith.mulf %58, %62 : vector<16x16xf32>
    %64 = arith.truncf %63 : vector<16x16xf32> to vector<16x16xbf16>
    %65 = arith.truncf %46 : vector<16x16xf32> to vector<16x16xbf16>
    %cst_19 = arith.constant dense<0.000000e+00> : vector<16x16xf32>
    %66 = tpu.matmul %64, %65, %cst_19 {dimension_numbers = #tpu.dot_dimension_numbers<[1], [0], [0], [1], [0, 0, 1, 1], [], []>} : vector<16x16xbf16>, vector<16x16xbf16>, vector<16x16xf32> -> vector<16x16xf32>
    %c0_20 = arith.constant 0 : index
    %c0_21 = arith.constant 0 : index
    %c0_22 = arith.constant 0 : index
    %67 = vector.load %arg19[%c0_20, %c0_21, %c0_22] : memref<2x16x32xf32, #tpu.memory_space<vmem>>, vector<1x16x16xf32>
    %68 = vector.shape_cast %67 : vector<1x16x16xf32> to vector<16x16xf32>
    %69 = vector.shape_cast %66 : vector<16x16xf32> to vector<1x16x16xf32>
    tpu.vector_store %arg19[%c0_20, %c0_21, %c0_22], %69 {strides = array<i32>} : memref<2x16x32xf32, #tpu.memory_space<vmem>>, vector<1x16x16xf32>,
    %70 = vector.extract_strided_slice %34 {offsets = [0, 0, 16], sizes = [1, 16, 16], strides = [1, 1, 1]} : vector<2x16x96xf32> to vector<1x16x16xf32>
    %71 = vector.shape_cast %70 : vector<1x16x16xf32> to vector<16x16xf32>
    %72 = vector.extract_strided_slice %34 {offsets = [0, 0, 48], sizes = [1, 16, 16], strides = [1, 1, 1]} : vector<2x16x96xf32> to vector<1x16x16xf32>
    %73 = vector.shape_cast %72 : vector<1x16x16xf32> to vector<16x16xf32>
    %74 = vector.extract_strided_slice %34 {offsets = [0, 0, 80], sizes = [1, 16, 16], strides = [1, 1, 1]} : vector<2x16x96xf32> to vector<1x16x16xf32>
    %75 = vector.shape_cast %74 : vector<1x16x16xf32> to vector<16x16xf32>
    %76 = arith.truncf %71 : vector<16x16xf32> to vector<16x16xbf16>
    %77 = arith.truncf %73 : vector<16x16xf32> to vector<16x16xbf16>
    %cst_23 = arith.constant dense<0.000000e+00> : vector<16x16xf32>
    %78 = tpu.matmul %76, %77, %cst_23 {dimension_numbers = #tpu.dot_dimension_numbers<[1], [1], [0], [0], [0, 0, 1, 0], [], []>} : vector<16x16xbf16>, vector<16x16xbf16>, vector<16x16xf32> -> vector<16x16xf32>
    %cst_24 = arith.constant 2.500000e-01 : f32
    %79 = vector.broadcast %cst_24 : f32 to vector<16x16xf32>
    %80 = arith.mulf %78, %79 : vector<16x16xf32>
    %81 = vector.broadcast %40 : vector<1x16xf32> to vector<16x16xf32>
    %82 = arith.addf %80, %81 : vector<16x16xf32>
    %cst_25 = arith.constant dense<0xFF800000> : vector<16xf32>
    %83 = vector.multi_reduction <maximumf>, %82, %cst_25 [1] : vector<16x16xf32> to vector<16xf32>
    %84 = vector.shape_cast %83 : vector<16xf32> to vector<16x1xf32>
    %85 = vector.broadcast %84 : vector<16x1xf32> to vector<16x16xf32>
    %86 = arith.subf %82, %85 : vector<16x16xf32>
    %87 = math.exp %86 : vector<16x16xf32>
    %cst_26 = arith.constant dense<0.000000e+00> : vector<16xf32>
    %88 = vector.multi_reduction <add>, %87, %cst_26 [1] : vector<16x16xf32> to vector<16xf32>
    %89 = vector.shape_cast %88 : vector<16xf32> to vector<16x1xf32>
    %90 = tpu.reciprocal %89 {approx = true} : vector<16x1xf32> -> vector<16x1xf32>
    %91 = vector.broadcast %90 : vector<16x1xf32> to vector<16x16xf32>
    %92 = arith.mulf %87, %91 : vector<16x16xf32>
    %93 = arith.truncf %92 : vector<16x16xf32> to vector<16x16xbf16>
    %94 = arith.truncf %75 : vector<16x16xf32> to vector<16x16xbf16>
    %cst_27 = arith.constant dense<0.000000e+00> : vector<16x16xf32>
    %95 = tpu.matmul %93, %94, %cst_27 {dimension_numbers = #tpu.dot_dimension_numbers<[1], [0], [0], [1], [0, 0, 1, 1], [], []>} : vector<16x16xbf16>, vector<16x16xbf16>, vector<16x16xf32> -> vector<16x16xf32>
    %c0_28 = arith.constant 0 : index
    %c0_29 = arith.constant 0 : index
    %c16 = arith.constant 16 : index
    %96 = vector.load %arg19[%c0_28, %c0_29, %c16] : memref<2x16x32xf32, #tpu.memory_space<vmem>>, vector<1x16x16xf32>
    %97 = vector.shape_cast %96 : vector<1x16x16xf32> to vector<16x16xf32>
    %98 = vector.shape_cast %95 : vector<16x16xf32> to vector<1x16x16xf32>
    tpu.vector_store %arg19[%c0_28, %c0_29, %c16], %98 {strides = array<i32>} : memref<2x16x32xf32, #tpu.memory_space<vmem>>, vector<1x16x16xf32>,
    %99 = vector.broadcast %6 : i32 to vector<1x16xi32>
    %100 = arith.cmpi slt, %35, %99 : vector<1x16xi32>
    %cst_30 = arith.constant 0.000000e+00 : f32
    %cst_31 = arith.constant -1.000000e+09 : f32
    %101 = vector.broadcast %cst_30 : f32 to vector<1x16xf32>
    %102 = vector.broadcast %cst_31 : f32 to vector<1x16xf32>
    %103 = arith.select %100, %101, %102 : vector<1x16xi1>, vector<1x16xf32>
    %104 = vector.extract_strided_slice %34 {offsets = [1, 0, 0], sizes = [1, 16, 16], strides = [1, 1, 1]} : vector<2x16x96xf32> to vector<1x16x16xf32>
    %105 = vector.shape_cast %104 : vector<1x16x16xf32> to vector<16x16xf32>
    %106 = vector.extract_strided_slice %34 {offsets = [1, 0, 32], sizes = [1, 16, 16], strides = [1, 1, 1]} : vector<2x16x96xf32> to vector<1x16x16xf32>
    %107 = vector.shape_cast %106 : vector<1x16x16xf32> to vector<16x16xf32>
    %108 = vector.extract_strided_slice %34 {offsets = [1, 0, 64], sizes = [1, 16, 16], strides = [1, 1, 1]} : vector<2x16x96xf32> to vector<1x16x16xf32>
    %109 = vector.shape_cast %108 : vector<1x16x16xf32> to vector<16x16xf32>
    %110 = arith.truncf %105 : vector<16x16xf32> to vector<16x16xbf16>
    %111 = arith.truncf %107 : vector<16x16xf32> to vector<16x16xbf16>
    %cst_32 = arith.constant dense<0.000000e+00> : vector<16x16xf32>
    %112 = tpu.matmul %110, %111, %cst_32 {dimension_numbers = #tpu.dot_dimension_numbers<[1], [1], [0], [0], [0, 0, 1, 0], [], []>} : vector<16x16xbf16>, vector<16x16xbf16>, vector<16x16xf32> -> vector<16x16xf32>
    %cst_33 = arith.constant 2.500000e-01 : f32
    %113 = vector.broadcast %cst_33 : f32 to vector<16x16xf32>
    %114 = arith.mulf %112, %113 : vector<16x16xf32>
    %115 = vector.broadcast %103 : vector<1x16xf32> to vector<16x16xf32>
    %116 = arith.addf %114, %115 : vector<16x16xf32>
    %cst_34 = arith.constant dense<0xFF800000> : vector<16xf32>
    %117 = vector.multi_reduction <maximumf>, %116, %cst_34 [1] : vector<16x16xf32> to vector<16xf32>
    %118 = vector.shape_cast %117 : vector<16xf32> to vector<16x1xf32>
    %119 = vector.broadcast %118 : vector<16x1xf32> to vector<16x16xf32>
    %120 = arith.subf %116, %119 : vector<16x16xf32>
    %121 = math.exp %120 : vector<16x16xf32>
    %cst_35 = arith.constant dense<0.000000e+00> : vector<16xf32>
    %122 = vector.multi_reduction <add>, %121, %cst_35 [1] : vector<16x16xf32> to vector<16xf32>
    %123 = vector.shape_cast %122 : vector<16xf32> to vector<16x1xf32>
    %124 = tpu.reciprocal %123 {approx = true} : vector<16x1xf32> -> vector<16x1xf32>
    %125 = vector.broadcast %124 : vector<16x1xf32> to vector<16x16xf32>
    %126 = arith.mulf %121, %125 : vector<16x16xf32>
    %127 = arith.truncf %126 : vector<16x16xf32> to vector<16x16xbf16>
    %128 = arith.truncf %109 : vector<16x16xf32> to vector<16x16xbf16>
    %cst_36 = arith.constant dense<0.000000e+00> : vector<16x16xf32>
    %129 = tpu.matmul %127, %128, %cst_36 {dimension_numbers = #tpu.dot_dimension_numbers<[1], [0], [0], [1], [0, 0, 1, 1], [], []>} : vector<16x16xbf16>, vector<16x16xbf16>, vector<16x16xf32> -> vector<16x16xf32>
    %c1 = arith.constant 1 : index
    %c0_37 = arith.constant 0 : index
    %c0_38 = arith.constant 0 : index
    %130 = vector.load %arg19[%c1, %c0_37, %c0_38] : memref<2x16x32xf32, #tpu.memory_space<vmem>>, vector<1x16x16xf32>
    %131 = vector.shape_cast %130 : vector<1x16x16xf32> to vector<16x16xf32>
    %132 = vector.shape_cast %129 : vector<16x16xf32> to vector<1x16x16xf32>
    tpu.vector_store %arg19[%c1, %c0_37, %c0_38], %132 {strides = array<i32>} : memref<2x16x32xf32, #tpu.memory_space<vmem>>, vector<1x16x16xf32>,
    %133 = vector.extract_strided_slice %34 {offsets = [1, 0, 16], sizes = [1, 16, 16], strides = [1, 1, 1]} : vector<2x16x96xf32> to vector<1x16x16xf32>
    %134 = vector.shape_cast %133 : vector<1x16x16xf32> to vector<16x16xf32>
    %135 = vector.extract_strided_slice %34 {offsets = [1, 0, 48], sizes = [1, 16, 16], strides = [1, 1, 1]} : vector<2x16x96xf32> to vector<1x16x16xf32>
    %136 = vector.shape_cast %135 : vector<1x16x16xf32> to vector<16x16xf32>
    %137 = vector.extract_strided_slice %34 {offsets = [1, 0, 80], sizes = [1, 16, 16], strides = [1, 1, 1]} : vector<2x16x96xf32> to vector<1x16x16xf32>
    %138 = vector.shape_cast %137 : vector<1x16x16xf32> to vector<16x16xf32>
    %139 = arith.truncf %134 : vector<16x16xf32> to vector<16x16xbf16>
    %140 = arith.truncf %136 : vector<16x16xf32> to vector<16x16xbf16>
    %cst_39 = arith.constant dense<0.000000e+00> : vector<16x16xf32>
    %141 = tpu.matmul %139, %140, %cst_39 {dimension_numbers = #tpu.dot_dimension_numbers<[1], [1], [0], [0], [0, 0, 1, 0], [], []>} : vector<16x16xbf16>, vector<16x16xbf16>, vector<16x16xf32> -> vector<16x16xf32>
    %cst_40 = arith.constant 2.500000e-01 : f32
    %142 = vector.broadcast %cst_40 : f32 to vector<16x16xf32>
    %143 = arith.mulf %141, %142 : vector<16x16xf32>
    %144 = vector.broadcast %103 : vector<1x16xf32> to vector<16x16xf32>
    %145 = arith.addf %143, %144 : vector<16x16xf32>
    %cst_41 = arith.constant dense<0xFF800000> : vector<16xf32>
    %146 = vector.multi_reduction <maximumf>, %145, %cst_41 [1] : vector<16x16xf32> to vector<16xf32>
    %147 = vector.shape_cast %146 : vector<16xf32> to vector<16x1xf32>
    %148 = vector.broadcast %147 : vector<16x1xf32> to vector<16x16xf32>
    %149 = arith.subf %145, %148 : vector<16x16xf32>
    %150 = math.exp %149 : vector<16x16xf32>
    %cst_42 = arith.constant dense<0.000000e+00> : vector<16xf32>
    %151 = vector.multi_reduction <add>, %150, %cst_42 [1] : vector<16x16xf32> to vector<16xf32>
    %152 = vector.shape_cast %151 : vector<16xf32> to vector<16x1xf32>
    %153 = tpu.reciprocal %152 {approx = true} : vector<16x1xf32> -> vector<16x1xf32>
    %154 = vector.broadcast %153 : vector<16x1xf32> to vector<16x16xf32>
    %155 = arith.mulf %150, %154 : vector<16x16xf32>
    %156 = arith.truncf %155 : vector<16x16xf32> to vector<16x16xbf16>
    %157 = arith.truncf %138 : vector<16x16xf32> to vector<16x16xbf16>
    %cst_43 = arith.constant dense<0.000000e+00> : vector<16x16xf32>
    %158 = tpu.matmul %156, %157, %cst_43 {dimension_numbers = #tpu.dot_dimension_numbers<[1], [0], [0], [1], [0, 0, 1, 1], [], []>} : vector<16x16xbf16>, vector<16x16xbf16>, vector<16x16xf32> -> vector<16x16xf32>
    %c1_44 = arith.constant 1 : index
    %c0_45 = arith.constant 0 : index
    %c16_46 = arith.constant 16 : index
    %159 = vector.load %arg19[%c1_44, %c0_45, %c16_46] : memref<2x16x32xf32, #tpu.memory_space<vmem>>, vector<1x16x16xf32>
    %160 = vector.shape_cast %159 : vector<1x16x16xf32> to vector<16x16xf32>
    %161 = vector.shape_cast %158 : vector<16x16xf32> to vector<1x16x16xf32>
    tpu.vector_store %arg19[%c1_44, %c0_45, %c16_46], %161 {strides = array<i32>} : memref<2x16x32xf32, #tpu.memory_space<vmem>>, vector<1x16x16xf32>,
    %c0_47 = arith.constant 0 : index
    %c0_48 = arith.constant 0 : index
    %c0_49 = arith.constant 0 : index
    %162 = vector.load %arg19[%c0_47, %c0_48, %c0_49] : memref<2x16x32xf32, #tpu.memory_space<vmem>>, vector<2x16x32xf32>
    %163 = vector.shape_cast %162 : vector<2x16x32xf32> to vector<32x32xf32>
    %164 = arith.truncf %163 : vector<32x32xf32> to vector<32x32xbf16>
    %c0_50 = arith.constant 0 : index
    %c0_51 = arith.constant 0 : index
    %c0_52 = arith.constant 0 : index
    %165 = vector.load %arg7[%c0_50, %c0_51, %c0_52] : memref<1x32x32xbf16, #tpu.memory_space<vmem>>, vector<1x32x32xbf16>
    %166 = vector.shape_cast %165 : vector<1x32x32xbf16> to vector<32x32xbf16>
    %cst_53 = arith.constant dense<0.000000e+00> : vector<32x32xf32>
    %167 = tpu.matmul %164, %166, %cst_53 {dimension_numbers = #tpu.dot_dimension_numbers<[1], [0], [0], [1], [0, 0, 1, 1], [], []>} : vector<32x32xbf16>, vector<32x32xbf16>, vector<32x32xf32> -> vector<32x32xf32>
    %c0_54 = arith.constant 0 : index
    %c0_55 = arith.constant 0 : index
    %c0_56 = arith.constant 0 : index
    %168 = vector.load %arg8[%c0_54, %c0_55, %c0_56] : memref<1x1x32xf32, #tpu.memory_space<vmem>>, vector<1x1x32xf32>
    %169 = vector.shape_cast %168 : vector<1x1x32xf32> to vector<1x32xf32>
    %170 = vector.broadcast %169 : vector<1x32xf32> to vector<32x32xf32>
    %171 = arith.addf %167, %170 : vector<32x32xf32>
    %172 = vector.shape_cast %171 : vector<32x32xf32> to vector<2x16x32xf32>
    %173 = arith.addf %172, %24 : vector<2x16x32xf32>
    %c0_57 = arith.constant 0 : index
    %c0_58 = arith.constant 0 : index
    %c0_59 = arith.constant 0 : index
    %174 = vector.load %arg9[%c0_57, %c0_58, %c0_59] : memref<1x1x32xf32, #tpu.memory_space<vmem>>, vector<1x1x32xf32>
    %175 = vector.shape_cast %174 : vector<1x1x32xf32> to vector<1x32xf32>
    %c0_60 = arith.constant 0 : index
    %c0_61 = arith.constant 0 : index
    %c0_62 = arith.constant 0 : index
    %176 = vector.load %arg10[%c0_60, %c0_61, %c0_62] : memref<1x1x32xf32, #tpu.memory_space<vmem>>, vector<1x1x32xf32>
    %177 = vector.shape_cast %176 : vector<1x1x32xf32> to vector<1x32xf32>
    %cst_63 = arith.constant dense<0.000000e+00> : vector<2x16xf32>
    %178 = vector.multi_reduction <add>, %173, %cst_63 [2] : vector<2x16x32xf32> to vector<2x16xf32>
    %179 = vector.shape_cast %178 : vector<2x16xf32> to vector<2x16x1xf32>
    %cst_64 = arith.constant 3.200000e+01 : f32
    %180 = vector.broadcast %cst_64 : f32 to vector<2x16x1xf32>
    %181 = arith.divf %179, %180 : vector<2x16x1xf32>
    %182 = vector.broadcast %181 : vector<2x16x1xf32> to vector<2x16x32xf32>
    %183 = arith.subf %173, %182 : vector<2x16x32xf32>
    %184 = arith.mulf %183, %183 : vector<2x16x32xf32>
    %cst_65 = arith.constant dense<0.000000e+00> : vector<2x16xf32>
    %185 = vector.multi_reduction <add>, %184, %cst_65 [2] : vector<2x16x32xf32> to vector<2x16xf32>
    %186 = vector.shape_cast %185 : vector<2x16xf32> to vector<2x16x1xf32>
    %cst_66 = arith.constant 3.200000e+01 : f32
    %187 = vector.broadcast %cst_66 : f32 to vector<2x16x1xf32>
    %188 = arith.divf %186, %187 : vector<2x16x1xf32>
    %189 = vector.broadcast %181 : vector<2x16x1xf32> to vector<2x16x32xf32>
    %190 = arith.subf %173, %189 : vector<2x16x32xf32>
    %cst_67 = arith.constant 9.99999974E-6 : f32
    %191 = vector.broadcast %cst_67 : f32 to vector<2x16x1xf32>
    %192 = arith.addf %188, %191 : vector<2x16x1xf32>
    %193 = math.rsqrt %192 : vector<2x16x1xf32>
    %194 = vector.broadcast %193 : vector<2x16x1xf32> to vector<2x16x32xf32>
    %195 = arith.mulf %190, %194 : vector<2x16x32xf32>
    %196 = vector.shape_cast %175 : vector<1x32xf32> to vector<1x1x32xf32>
    %197 = vector.broadcast %196 : vector<1x1x32xf32> to vector<2x16x32xf32>
    %198 = arith.mulf %195, %197 : vector<2x16x32xf32>
    %199 = vector.shape_cast %177 : vector<1x32xf32> to vector<1x1x32xf32>
    %200 = vector.broadcast %199 : vector<1x1x32xf32> to vector<2x16x32xf32>
    %201 = arith.addf %198, %200 : vector<2x16x32xf32>
    %202 = vector.broadcast %20 : vector<2x16x1xf32> to vector<2x16x32xf32>
    %203 = arith.mulf %201, %202 : vector<2x16x32xf32>
    %c0_68 = arith.constant 0 : index
    %c0_69 = arith.constant 0 : index
    %c0_70 = arith.constant 0 : index
    %204 = vector.load %arg12[%c0_68, %c0_69, %c0_70] : memref<1x1x64xf32, #tpu.memory_space<vmem>>, vector<1x1x64xf32>
    %205 = vector.shape_cast %204 : vector<1x1x64xf32> to vector<1x64xf32>
    %cst_71 = arith.constant 0.000000e+00 : f32
    %206 = vector.broadcast %cst_71 : f32 to vector<2x1x32xf32>
    %c0_72 = arith.constant 0 : index
    %c0_73 = arith.constant 0 : index
    %c0_74 = arith.constant 0 : index
    %207 = vector.load %arg20[%c0_72, %c0_73, %c0_74] : memref<2x18x32xf32, #tpu.memory_space<vmem>>, vector<2x1x32xf32>
    tpu.vector_store %arg20[%c0_72, %c0_73, %c0_74], %206 {strides = array<i32>} : memref<2x18x32xf32, #tpu.memory_space<vmem>>, vector<2x1x32xf32>,
    %cst_75 = arith.constant 0.000000e+00 : f32
    %208 = vector.broadcast %cst_75 : f32 to vector<2x1x32xf32>
    %c0_76 = arith.constant 0 : index
    %c17 = arith.constant 17 : index
    %c0_77 = arith.constant 0 : index
    %209 = vector.load %arg20[%c0_76, %c17, %c0_77] : memref<2x18x32xf32, #tpu.memory_space<vmem>>, vector<2x1x32xf32>
    tpu.vector_store %arg20[%c0_76, %c17, %c0_77], %208 {strides = array<i32>} : memref<2x18x32xf32, #tpu.memory_space<vmem>>, vector<2x1x32xf32>,
    %c0_78 = arith.constant 0 : index
    %c1_79 = arith.constant 1 : index
    %c0_80 = arith.constant 0 : index
    %210 = vector.load %arg20[%c0_78, %c1_79, %c0_80] : memref<2x18x32xf32, #tpu.memory_space<vmem>>, vector<2x16x32xf32>
    tpu.vector_store %arg20[%c0_78, %c1_79, %c0_80], %203 {strides = array<i32>} : memref<2x18x32xf32, #tpu.memory_space<vmem>>, vector<2x16x32xf32>,
    %c0_81 = arith.constant 0 : index
    %c0_82 = arith.constant 0 : index
    %c0_83 = arith.constant 0 : index
    %211 = vector.load %arg20[%c0_81, %c0_82, %c0_83] : memref<2x18x32xf32, #tpu.memory_space<vmem>>, vector<2x16x32xf32>
    %212 = vector.shape_cast %211 : vector<2x16x32xf32> to vector<32x32xf32>
    %213 = arith.truncf %212 : vector<32x32xf32> to vector<32x32xbf16>
    %c0_84 = arith.constant 0 : index
    %c0_85 = arith.constant 0 : index
    %c0_86 = arith.constant 0 : index
    %214 = vector.load %arg11[%c0_84, %c0_85, %c0_86] : memref<1x96x64xbf16, #tpu.memory_space<vmem>>, vector<1x32x64xbf16>
    %215 = vector.shape_cast %214 : vector<1x32x64xbf16> to vector<32x64xbf16>
    %cst_87 = arith.constant dense<0.000000e+00> : vector<32x64xf32>
    %216 = tpu.matmul %213, %215, %cst_87 {dimension_numbers = #tpu.dot_dimension_numbers<[1], [0], [0], [1], [0, 0, 1, 1], [], []>} : vector<32x32xbf16>, vector<32x64xbf16>, vector<32x64xf32> -> vector<32x64xf32>
    %c0_88 = arith.constant 0 : index
    %c1_89 = arith.constant 1 : index
    %c0_90 = arith.constant 0 : index
    %217 = vector.load %arg20[%c0_88, %c1_89, %c0_90] : memref<2x18x32xf32, #tpu.memory_space<vmem>>, vector<2x16x32xf32>
    %218 = vector.shape_cast %217 : vector<2x16x32xf32> to vector<32x32xf32>
    %219 = arith.truncf %218 : vector<32x32xf32> to vector<32x32xbf16>
    %c0_91 = arith.constant 0 : index
    %c32 = arith.constant 32 : index
    %c0_92 = arith.constant 0 : index
    %220 = vector.load %arg11[%c0_91, %c32, %c0_92] : memref<1x96x64xbf16, #tpu.memory_space<vmem>>, vector<1x32x64xbf16>
    %221 = vector.shape_cast %220 : vector<1x32x64xbf16> to vector<32x64xbf16>
    %cst_93 = arith.constant dense<0.000000e+00> : vector<32x64xf32>
    %222 = tpu.matmul %219, %221, %cst_93 {dimension_numbers = #tpu.dot_dimension_numbers<[1], [0], [0], [1], [0, 0, 1, 1], [], []>} : vector<32x32xbf16>, vector<32x64xbf16>, vector<32x64xf32> -> vector<32x64xf32>
    %223 = arith.addf %216, %222 : vector<32x64xf32>
    %c0_94 = arith.constant 0 : index
    %c2 = arith.constant 2 : index
    %c0_95 = arith.constant 0 : index
    %224 = vector.load %arg20[%c0_94, %c2, %c0_95] : memref<2x18x32xf32, #tpu.memory_space<vmem>>, vector<2x16x32xf32>
    %225 = vector.shape_cast %224 : vector<2x16x32xf32> to vector<32x32xf32>
    %226 = arith.truncf %225 : vector<32x32xf32> to vector<32x32xbf16>
    %c0_96 = arith.constant 0 : index
    %c64 = arith.constant 64 : index
    %c0_97 = arith.constant 0 : index
    %227 = vector.load %arg11[%c0_96, %c64, %c0_97] : memref<1x96x64xbf16, #tpu.memory_space<vmem>>, vector<1x32x64xbf16>
    %228 = vector.shape_cast %227 : vector<1x32x64xbf16> to vector<32x64xbf16>
    %cst_98 = arith.constant dense<0.000000e+00> : vector<32x64xf32>
    %229 = tpu.matmul %226, %228, %cst_98 {dimension_numbers = #tpu.dot_dimension_numbers<[1], [0], [0], [1], [0, 0, 1, 1], [], []>} : vector<32x32xbf16>, vector<32x64xbf16>, vector<32x64xf32> -> vector<32x64xf32>
    %230 = arith.addf %223, %229 : vector<32x64xf32>
    %231 = vector.broadcast %205 : vector<1x64xf32> to vector<32x64xf32>
    %232 = arith.addf %230, %231 : vector<32x64xf32>
    %cst_99 = arith.constant 0.000000e+00 : f32
    %233 = vector.broadcast %cst_99 : f32 to vector<32x64xf32>
    %234 = arith.maximumf %232, %233 : vector<32x64xf32>
    %235 = vector.shape_cast %234 : vector<32x64xf32> to vector<2x16x64xf32>
    %c0_100 = arith.constant 0 : index
    %c0_101 = arith.constant 0 : index
    %c0_102 = arith.constant 0 : index
    %236 = vector.load %arg14[%c0_100, %c0_101, %c0_102] : memref<1x1x32xf32, #tpu.memory_space<vmem>>, vector<1x1x32xf32>
    %237 = vector.shape_cast %236 : vector<1x1x32xf32> to vector<1x32xf32>
    %cst_103 = arith.constant 0.000000e+00 : f32
    %238 = vector.broadcast %cst_103 : f32 to vector<2x1x64xf32>
    %c0_104 = arith.constant 0 : index
    %c0_105 = arith.constant 0 : index
    %c0_106 = arith.constant 0 : index
    %239 = vector.load %arg21[%c0_104, %c0_105, %c0_106] : memref<2x18x64xf32, #tpu.memory_space<vmem>>, vector<2x1x64xf32>
    tpu.vector_store %arg21[%c0_104, %c0_105, %c0_106], %238 {strides = array<i32>} : memref<2x18x64xf32, #tpu.memory_space<vmem>>, vector<2x1x64xf32>,
    %cst_107 = arith.constant 0.000000e+00 : f32
    %240 = vector.broadcast %cst_107 : f32 to vector<2x1x64xf32>
    %c0_108 = arith.constant 0 : index
    %c17_109 = arith.constant 17 : index
    %c0_110 = arith.constant 0 : index
    %241 = vector.load %arg21[%c0_108, %c17_109, %c0_110] : memref<2x18x64xf32, #tpu.memory_space<vmem>>, vector<2x1x64xf32>
    tpu.vector_store %arg21[%c0_108, %c17_109, %c0_110], %240 {strides = array<i32>} : memref<2x18x64xf32, #tpu.memory_space<vmem>>, vector<2x1x64xf32>,
    %c0_111 = arith.constant 0 : index
    %c1_112 = arith.constant 1 : index
    %c0_113 = arith.constant 0 : index
    %242 = vector.load %arg21[%c0_111, %c1_112, %c0_113] : memref<2x18x64xf32, #tpu.memory_space<vmem>>, vector<2x16x64xf32>
    tpu.vector_store %arg21[%c0_111, %c1_112, %c0_113], %235 {strides = array<i32>} : memref<2x18x64xf32, #tpu.memory_space<vmem>>, vector<2x16x64xf32>,
    %c0_114 = arith.constant 0 : index
    %c0_115 = arith.constant 0 : index
    %c0_116 = arith.constant 0 : index
    %243 = vector.load %arg21[%c0_114, %c0_115, %c0_116] : memref<2x18x64xf32, #tpu.memory_space<vmem>>, vector<2x16x64xf32>
    %244 = vector.shape_cast %243 : vector<2x16x64xf32> to vector<32x64xf32>
    %245 = arith.truncf %244 : vector<32x64xf32> to vector<32x64xbf16>
    %c0_117 = arith.constant 0 : index
    %c0_118 = arith.constant 0 : index
    %c0_119 = arith.constant 0 : index
    %246 = vector.load %arg13[%c0_117, %c0_118, %c0_119] : memref<1x192x32xbf16, #tpu.memory_space<vmem>>, vector<1x64x32xbf16>
    %247 = vector.shape_cast %246 : vector<1x64x32xbf16> to vector<64x32xbf16>
    %cst_120 = arith.constant dense<0.000000e+00> : vector<32x32xf32>
    %248 = tpu.matmul %245, %247, %cst_120 {dimension_numbers = #tpu.dot_dimension_numbers<[1], [0], [0], [1], [0, 0, 1, 1], [], []>} : vector<32x64xbf16>, vector<64x32xbf16>, vector<32x32xf32> -> vector<32x32xf32>
    %c0_121 = arith.constant 0 : index
    %c1_122 = arith.constant 1 : index
    %c0_123 = arith.constant 0 : index
    %249 = vector.load %arg21[%c0_121, %c1_122, %c0_123] : memref<2x18x64xf32, #tpu.memory_space<vmem>>, vector<2x16x64xf32>
    %250 = vector.shape_cast %249 : vector<2x16x64xf32> to vector<32x64xf32>
    %251 = arith.truncf %250 : vector<32x64xf32> to vector<32x64xbf16>
    %c0_124 = arith.constant 0 : index
    %c64_125 = arith.constant 64 : index
    %c0_126 = arith.constant 0 : index
    %252 = vector.load %arg13[%c0_124, %c64_125, %c0_126] : memref<1x192x32xbf16, #tpu.memory_space<vmem>>, vector<1x64x32xbf16>
    %253 = vector.shape_cast %252 : vector<1x64x32xbf16> to vector<64x32xbf16>
    %cst_127 = arith.constant dense<0.000000e+00> : vector<32x32xf32>
    %254 = tpu.matmul %251, %253, %cst_127 {dimension_numbers = #tpu.dot_dimension_numbers<[1], [0], [0], [1], [0, 0, 1, 1], [], []>} : vector<32x64xbf16>, vector<64x32xbf16>, vector<32x32xf32> -> vector<32x32xf32>
    %255 = arith.addf %248, %254 : vector<32x32xf32>
    %c0_128 = arith.constant 0 : index
    %c2_129 = arith.constant 2 : index
    %c0_130 = arith.constant 0 : index
    %256 = vector.load %arg21[%c0_128, %c2_129, %c0_130] : memref<2x18x64xf32, #tpu.memory_space<vmem>>, vector<2x16x64xf32>
    %257 = vector.shape_cast %256 : vector<2x16x64xf32> to vector<32x64xf32>
    %258 = arith.truncf %257 : vector<32x64xf32> to vector<32x64xbf16>
    %c0_131 = arith.constant 0 : index
    %c128 = arith.constant 128 : index
    %c0_132 = arith.constant 0 : index
    %259 = vector.load %arg13[%c0_131, %c128, %c0_132] : memref<1x192x32xbf16, #tpu.memory_space<vmem>>, vector<1x64x32xbf16>
    %260 = vector.shape_cast %259 : vector<1x64x32xbf16> to vector<64x32xbf16>
    %cst_133 = arith.constant dense<0.000000e+00> : vector<32x32xf32>
    %261 = tpu.matmul %258, %260, %cst_133 {dimension_numbers = #tpu.dot_dimension_numbers<[1], [0], [0], [1], [0, 0, 1, 1], [], []>} : vector<32x64xbf16>, vector<64x32xbf16>, vector<32x32xf32> -> vector<32x32xf32>
    %262 = arith.addf %255, %261 : vector<32x32xf32>
    %263 = vector.broadcast %237 : vector<1x32xf32> to vector<32x32xf32>
    %264 = arith.addf %262, %263 : vector<32x32xf32>
    %265 = vector.shape_cast %264 : vector<32x32xf32> to vector<2x16x32xf32>
    %266 = arith.addf %265, %203 : vector<2x16x32xf32>
    %c0_134 = arith.constant 0 : index
    %c0_135 = arith.constant 0 : index
    %c0_136 = arith.constant 0 : index
    %267 = vector.load %arg15[%c0_134, %c0_135, %c0_136] : memref<1x1x32xf32, #tpu.memory_space<vmem>>, vector<1x1x32xf32>
    %268 = vector.shape_cast %267 : vector<1x1x32xf32> to vector<1x32xf32>
    %c0_137 = arith.constant 0 : index
    %c0_138 = arith.constant 0 : index
    %c0_139 = arith.constant 0 : index
    %269 = vector.load %arg16[%c0_137, %c0_138, %c0_139] : memref<1x1x32xf32, #tpu.memory_space<vmem>>, vector<1x1x32xf32>
    %270 = vector.shape_cast %269 : vector<1x1x32xf32> to vector<1x32xf32>
    %cst_140 = arith.constant dense<0.000000e+00> : vector<2x16xf32>
    %271 = vector.multi_reduction <add>, %266, %cst_140 [2] : vector<2x16x32xf32> to vector<2x16xf32>
    %272 = vector.shape_cast %271 : vector<2x16xf32> to vector<2x16x1xf32>
    %cst_141 = arith.constant 3.200000e+01 : f32
    %273 = vector.broadcast %cst_141 : f32 to vector<2x16x1xf32>
    %274 = arith.divf %272, %273 : vector<2x16x1xf32>
    %275 = vector.broadcast %274 : vector<2x16x1xf32> to vector<2x16x32xf32>
    %276 = arith.subf %266, %275 : vector<2x16x32xf32>
    %277 = arith.mulf %276, %276 : vector<2x16x32xf32>
    %cst_142 = arith.constant dense<0.000000e+00> : vector<2x16xf32>
    %278 = vector.multi_reduction <add>, %277, %cst_142 [2] : vector<2x16x32xf32> to vector<2x16xf32>
    %279 = vector.shape_cast %278 : vector<2x16xf32> to vector<2x16x1xf32>
    %cst_143 = arith.constant 3.200000e+01 : f32
    %280 = vector.broadcast %cst_143 : f32 to vector<2x16x1xf32>
    %281 = arith.divf %279, %280 : vector<2x16x1xf32>
    %282 = vector.broadcast %274 : vector<2x16x1xf32> to vector<2x16x32xf32>
    %283 = arith.subf %266, %282 : vector<2x16x32xf32>
    %cst_144 = arith.constant 9.99999974E-6 : f32
    %284 = vector.broadcast %cst_144 : f32 to vector<2x16x1xf32>
    %285 = arith.addf %281, %284 : vector<2x16x1xf32>
    %286 = math.rsqrt %285 : vector<2x16x1xf32>
    %287 = vector.broadcast %286 : vector<2x16x1xf32> to vector<2x16x32xf32>
    %288 = arith.mulf %283, %287 : vector<2x16x32xf32>
    %289 = vector.shape_cast %268 : vector<1x32xf32> to vector<1x1x32xf32>
    %290 = vector.broadcast %289 : vector<1x1x32xf32> to vector<2x16x32xf32>
    %291 = arith.mulf %288, %290 : vector<2x16x32xf32>
    %292 = vector.shape_cast %270 : vector<1x32xf32> to vector<1x1x32xf32>
    %293 = vector.broadcast %292 : vector<1x1x32xf32> to vector<2x16x32xf32>
    %294 = arith.addf %291, %293 : vector<2x16x32xf32>
    %295 = vector.broadcast %20 : vector<2x16x1xf32> to vector<2x16x32xf32>
    %296 = arith.mulf %294, %295 : vector<2x16x32xf32>
    %c0_145 = arith.constant 0 : index
    %c0_146 = arith.constant 0 : index
    %c0_147 = arith.constant 0 : index
    %297 = vector.load %arg18[%c0_145, %c0_146, %c0_147] : memref<2x16x32xf32, #tpu.memory_space<vmem>>, vector<2x16x32xf32>
    tpu.vector_store %arg18[%c0_145, %c0_146, %c0_147], %296 {strides = array<i32>} : memref<2x16x32xf32, #tpu.memory_space<vmem>>, vector<2x16x32xf32>,
    %c1_i32_148 = arith.constant 1 : i32
    %298 = arith.cmpi eq, %arg1, %c1_i32_148 : i32
    %299 = arith.extui %298 : i1 to i32
    %c0_i32_149 = arith.constant 0 : i32
    %300 = arith.cmpi ne, %299, %c0_i32_149 : i32
    scf.if %300 {
      %c0_150 = arith.constant 0 : index
      %c0_151 = arith.constant 0 : index
      %c0_152 = arith.constant 0 : index
      %301 = vector.load %arg17[%c0_150, %c0_151, %c0_152] : memref<2x16x32xf32, #tpu.memory_space<vmem>>, vector<2x16x32xf32>
      tpu.vector_store %arg17[%c0_150, %c0_151, %c0_152], %296 {strides = array<i32>} : memref<2x16x32xf32, #tpu.memory_space<vmem>>, vector<2x16x32xf32>,
    } else {
    }
    return
  }
  func.func @transform_0(%arg0: i32, %arg1: i32, %arg2: memref<2xi32, #tpu.memory_space<smem>>) -> (i32, i32, i32) {
    %c0_i32 = arith.constant 0 : i32
    %c0_i32_0 = arith.constant 0 : i32
    %c0_i32_1 = arith.constant 0 : i32
    return %arg0, %c0_i32, %c0_i32_0 : i32, i32, i32
  }
  func.func @transform_1(%arg0: i32, %arg1: i32, %arg2: memref<2xi32, #tpu.memory_space<smem>>) -> (i32, i32) {
    %c0_i32 = arith.constant 0 : i32
    %c0_i32_0 = arith.constant 0 : i32
    %c0_i32_1 = arith.constant 0 : i32
    return %c0_i32, %c0_i32_0 : i32, i32
  }
  func.func @transform_2(%arg0: i32, %arg1: i32, %arg2: memref<2xi32, #tpu.memory_space<smem>>) -> (i32, i32, i32) {
    %c0_i32 = arith.constant 0 : i32
    %c0_i32_0 = arith.constant 0 : i32
    %c0_i32_1 = arith.constant 0 : i32
    return %arg1, %c0_i32, %c0_i32_0 : i32, i32, i32
  }
  func.func @transform_3(%arg0: i32, %arg1: i32, %arg2: memref<2xi32, #tpu.memory_space<smem>>) -> (i32, i32, i32) {
    %c0_i32 = arith.constant 0 : i32
    %c0_i32_0 = arith.constant 0 : i32
    %c0_i32_1 = arith.constant 0 : i32
    return %arg1, %c0_i32, %c0_i32_0 : i32, i32, i32
  }
  func.func @transform_4(%arg0: i32, %arg1: i32, %arg2: memref<2xi32, #tpu.memory_space<smem>>) -> (i32, i32, i32) {
    %c0_i32 = arith.constant 0 : i32
    %c0_i32_0 = arith.constant 0 : i32
    %c0_i32_1 = arith.constant 0 : i32
    return %arg1, %c0_i32, %c0_i32_0 : i32, i32, i32
  }
  func.func @transform_5(%arg0: i32, %arg1: i32, %arg2: memref<2xi32, #tpu.memory_space<smem>>) -> (i32, i32, i32) {
    %c0_i32 = arith.constant 0 : i32
    %c0_i32_0 = arith.constant 0 : i32
    %c0_i32_1 = arith.constant 0 : i32
    return %arg1, %c0_i32, %c0_i32_0 : i32, i32, i32
  }
  func.func @transform_6(%arg0: i32, %arg1: i32, %arg2: memref<2xi32, #tpu.memory_space<smem>>) -> (i32, i32, i32) {
    %c0_i32 = arith.constant 0 : i32
    %c0_i32_0 = arith.constant 0 : i32
    %c0_i32_1 = arith.constant 0 : i32
    return %arg1, %c0_i32, %c0_i32_0 : i32, i32, i32
  }
  func.func @transform_7(%arg0: i32, %arg1: i32, %arg2: memref<2xi32, #tpu.memory_space<smem>>) -> (i32, i32, i32) {
    %c0_i32 = arith.constant 0 : i32
    %c0_i32_0 = arith.constant 0 : i32
    %c0_i32_1 = arith.constant 0 : i32
    return %arg1, %c0_i32, %c0_i32_0 : i32, i32, i32
  }
  func.func @transform_8(%arg0: i32, %arg1: i32, %arg2: memref<2xi32, #tpu.memory_space<smem>>) -> (i32, i32, i32) {
    %c0_i32 = arith.constant 0 : i32
    %c0_i32_0 = arith.constant 0 : i32
    %c0_i32_1 = arith.constant 0 : i32
    return %arg1, %c0_i32, %c0_i32_0 : i32, i32, i32
  }
  func.func @transform_9(%arg0: i32, %arg1: i32, %arg2: memref<2xi32, #tpu.memory_space<smem>>) -> (i32, i32, i32) {
    %c0_i32 = arith.constant 0 : i32
    %c0_i32_0 = arith.constant 0 : i32
    %c0_i32_1 = arith.constant 0 : i32
    return %arg1, %c0_i32, %c0_i32_0 : i32, i32, i32
  }
  func.func @transform_10(%arg0: i32, %arg1: i32, %arg2: memref<2xi32, #tpu.memory_space<smem>>) -> (i32, i32, i32) {
    %c0_i32 = arith.constant 0 : i32
    %c0_i32_0 = arith.constant 0 : i32
    %c0_i32_1 = arith.constant 0 : i32
    return %arg1, %c0_i32, %c0_i32_0 : i32, i32, i32
  }
  func.func @transform_11(%arg0: i32, %arg1: i32, %arg2: memref<2xi32, #tpu.memory_space<smem>>) -> (i32, i32, i32) {
    %c0_i32 = arith.constant 0 : i32
    %c0_i32_0 = arith.constant 0 : i32
    %c0_i32_1 = arith.constant 0 : i32
    return %arg1, %c0_i32, %c0_i32_0 : i32, i32, i32
  }
  func.func @transform_12(%arg0: i32, %arg1: i32, %arg2: memref<2xi32, #tpu.memory_space<smem>>) -> (i32, i32, i32) {
    %c0_i32 = arith.constant 0 : i32
    %c0_i32_0 = arith.constant 0 : i32
    %c0_i32_1 = arith.constant 0 : i32
    return %arg1, %c0_i32, %c0_i32_0 : i32, i32, i32
  }
  func.func @transform_13(%arg0: i32, %arg1: i32, %arg2: memref<2xi32, #tpu.memory_space<smem>>) -> (i32, i32, i32) {
    %c0_i32 = arith.constant 0 : i32
    %c0_i32_0 = arith.constant 0 : i32
    %c0_i32_1 = arith.constant 0 : i32
    return %arg1, %c0_i32, %c0_i32_0 : i32, i32, i32
  }
  func.func @transform_14(%arg0: i32, %arg1: i32, %arg2: memref<2xi32, #tpu.memory_space<smem>>) -> (i32, i32, i32) {
    %c0_i32 = arith.constant 0 : i32
    %c0_i32_0 = arith.constant 0 : i32
    %c0_i32_1 = arith.constant 0 : i32
    return %arg0, %c0_i32, %c0_i32_0 : i32, i32, i32
  }
}

module attributes {stable_mosaic.version = 11 : i64} {
  func.func @_fft_stack_kernel(%arg0: i32, %arg1: i32, %arg2: memref<2xi32, #tpu.memory_space<smem>>, %arg3: memref<2x8x32xf32, #tpu.memory_space<vmem>>, %arg4: memref<8x32xf32, #tpu.memory_space<vmem>>, %arg5: memref<2x8x32xf32, #tpu.memory_space<vmem>>, %arg6: memref<1x32x96xbf16, #tpu.memory_space<vmem>>, %arg7: memref<1x1x96xf32, #tpu.memory_space<vmem>>, %arg8: memref<1x32x32xbf16, #tpu.memory_space<vmem>>, %arg9: memref<1x1x32xf32, #tpu.memory_space<vmem>>, %arg10: memref<1x1x32xf32, #tpu.memory_space<vmem>>, %arg11: memref<1x1x32xf32, #tpu.memory_space<vmem>>, %arg12: memref<1x96x64xbf16, #tpu.memory_space<vmem>>, %arg13: memref<1x1x64xf32, #tpu.memory_space<vmem>>, %arg14: memref<1x192x32xbf16, #tpu.memory_space<vmem>>, %arg15: memref<1x1x32xf32, #tpu.memory_space<vmem>>, %arg16: memref<1x1x32xf32, #tpu.memory_space<vmem>>, %arg17: memref<1x1x32xf32, #tpu.memory_space<vmem>>, %arg18: memref<2x8x32xf32, #tpu.memory_space<vmem>>, %arg19: memref<2x8x32xf32, #tpu.memory_space<vmem>>, %arg20: memref<2x8x32xf32, #tpu.memory_space<vmem>>, %arg21: memref<2x10x32xf32, #tpu.memory_space<vmem>>, %arg22: memref<2x10x64xf32, #tpu.memory_space<vmem>>) attributes {dimension_semantics = [#tpu.dimension_semantics<parallel>, #tpu.dimension_semantics<arbitrary>], iteration_bounds = array<i64: 1, 2>, scalar_prefetch = 1 : i64, scratch_operands = 4 : i64, tpu.core_type = #tpu.core_type<tc>, window_params = [{transform_indices = @transform_0, window_bounds = array<i64: 2, 8, 32>}, {pipeline_mode = #tpu.pipeline_mode<synchronous>, transform_indices = @transform_1, window_bounds = array<i64: 8, 32>}, {transform_indices = @transform_2, window_bounds = array<i64: 2, 8, 32>}, {transform_indices = @transform_3, window_bounds = array<i64: 1, 32, 96>}, {transform_indices = @transform_4, window_bounds = array<i64: 1, 1, 96>}, {transform_indices = @transform_5, window_bounds = array<i64: 1, 32, 32>}, {transform_indices = @transform_6, window_bounds = array<i64: 1, 1, 32>}, {transform_indices = @transform_7, window_bounds = array<i64: 1, 1, 32>}, {transform_indices = @transform_8, window_bounds = array<i64: 1, 1, 32>}, {transform_indices = @transform_9, window_bounds = array<i64: 1, 96, 64>}, {transform_indices = @transform_10, window_bounds = array<i64: 1, 1, 64>}, {transform_indices = @transform_11, window_bounds = array<i64: 1, 192, 32>}, {transform_indices = @transform_12, window_bounds = array<i64: 1, 1, 32>}, {transform_indices = @transform_13, window_bounds = array<i64: 1, 1, 32>}, {transform_indices = @transform_14, window_bounds = array<i64: 1, 1, 32>}, {transform_indices = @transform_15, window_bounds = array<i64: 2, 8, 32>}]} {
    %c2_i32 = arith.constant 2 : i32
    %0 = arith.muli %arg0, %c2_i32 : i32
    %c0_i32 = arith.constant 0 : i32
    %1 = arith.addi %0, %c0_i32 : i32
    %2 = arith.index_cast %1 : i32 to index
    %3 = memref.load %arg2[%2] : memref<2xi32, #tpu.memory_space<smem>>
    %c1_i32 = arith.constant 1 : i32
    %4 = arith.addi %0, %c1_i32 : i32
    %5 = arith.index_cast %4 : i32 to index
    %6 = memref.load %arg2[%5] : memref<2xi32, #tpu.memory_space<smem>>
    %7 = tpu.iota {dimensions = array<i32: 0>} : vector<2x8x1xi32>
    %8 = tpu.iota {dimensions = array<i32: 1>} : vector<2x8x1xi32>
    %c0_i32_0 = arith.constant 0 : i32
    %9 = vector.broadcast %c0_i32_0 : i32 to vector<2x8x1xi32>
    %c0_i32_1 = arith.constant 0 : i32
    %10 = vector.broadcast %c0_i32_1 : i32 to vector<2x8x1xi32>
    %11 = arith.cmpi eq, %7, %10 : vector<2x8x1xi32>
    %12 = vector.broadcast %3 : i32 to vector<2x8x1xi32>
    %13 = arith.select %11, %12, %9 : vector<2x8x1xi1>, vector<2x8x1xi32>
    %c1_i32_2 = arith.constant 1 : i32
    %14 = vector.broadcast %c1_i32_2 : i32 to vector<2x8x1xi32>
    %15 = arith.cmpi eq, %7, %14 : vector<2x8x1xi32>
    %16 = vector.broadcast %6 : i32 to vector<2x8x1xi32>
    %17 = arith.select %15, %16, %13 : vector<2x8x1xi1>, vector<2x8x1xi32>
    %18 = arith.cmpi slt, %8, %17 : vector<2x8x1xi32>
    %19 = arith.extui %18 : vector<2x8x1xi1> to vector<2x8x1xi32>
    %20 = arith.sitofp %19 : vector<2x8x1xi32> to vector<2x8x1xf32>
    %c0_i32_3 = arith.constant 0 : i32
    %21 = arith.cmpi eq, %arg1, %c0_i32_3 : i32
    %22 = arith.extui %21 : i1 to i32
    %c0_i32_4 = arith.constant 0 : i32
    %23 = arith.cmpi ne, %22, %c0_i32_4 : i32
    scf.if %23 {
      %c0_150 = arith.constant 0 : index
      %c0_151 = arith.constant 0 : index
      %c0_152 = arith.constant 0 : index
      %301 = vector.load %arg3[%c0_150, %c0_151, %c0_152] : memref<2x8x32xf32, #tpu.memory_space<vmem>>, vector<2x8x32xf32>
      %c0_153 = arith.constant 0 : index
      %c0_154 = arith.constant 0 : index
      %302 = vector.load %arg4[%c0_153, %c0_154] : memref<8x32xf32, #tpu.memory_space<vmem>>, vector<8x32xf32>
      %303 = vector.shape_cast %302 : vector<8x32xf32> to vector<1x8x32xf32>
      %304 = vector.broadcast %303 : vector<1x8x32xf32> to vector<2x8x32xf32>
      %305 = vector.broadcast %20 : vector<2x8x1xf32> to vector<2x8x32xf32>
      %306 = arith.mulf %304, %305 : vector<2x8x32xf32>
      %307 = arith.addf %301, %306 : vector<2x8x32xf32>
      %c0_155 = arith.constant 0 : index
      %c0_156 = arith.constant 0 : index
      %c0_157 = arith.constant 0 : index
      %308 = vector.load %arg19[%c0_155, %c0_156, %c0_157] : memref<2x8x32xf32, #tpu.memory_space<vmem>>, vector<2x8x32xf32>
      tpu.vector_store %arg19[%c0_155, %c0_156, %c0_157], %307 {strides = array<i32>} : memref<2x8x32xf32, #tpu.memory_space<vmem>>, vector<2x8x32xf32>,
    } else {
    }
    %c0 = arith.constant 0 : index
    %c0_5 = arith.constant 0 : index
    %c0_6 = arith.constant 0 : index
    %24 = vector.load %arg19[%c0, %c0_5, %c0_6] : memref<2x8x32xf32, #tpu.memory_space<vmem>>, vector<2x8x32xf32>
    %25 = vector.shape_cast %24 : vector<2x8x32xf32> to vector<16x32xf32>
    %26 = arith.truncf %25 : vector<16x32xf32> to vector<16x32xbf16>
    %c0_7 = arith.constant 0 : index
    %c0_8 = arith.constant 0 : index
    %c0_9 = arith.constant 0 : index
    %27 = vector.load %arg6[%c0_7, %c0_8, %c0_9] : memref<1x32x96xbf16, #tpu.memory_space<vmem>>, vector<1x32x96xbf16>
    %28 = vector.shape_cast %27 : vector<1x32x96xbf16> to vector<32x96xbf16>
    %cst = arith.constant dense<0.000000e+00> : vector<16x96xf32>
    %29 = tpu.matmul %26, %28, %cst {dimension_numbers = #tpu.dot_dimension_numbers<[1], [0], [0], [1], [0, 0, 1, 1], [], []>} : vector<16x32xbf16>, vector<32x96xbf16>, vector<16x96xf32> -> vector<16x96xf32>
    %c0_10 = arith.constant 0 : index
    %c0_11 = arith.constant 0 : index
    %c0_12 = arith.constant 0 : index
    %30 = vector.load %arg7[%c0_10, %c0_11, %c0_12] : memref<1x1x96xf32, #tpu.memory_space<vmem>>, vector<1x1x96xf32>
    %31 = vector.shape_cast %30 : vector<1x1x96xf32> to vector<1x96xf32>
    %32 = vector.broadcast %31 : vector<1x96xf32> to vector<16x96xf32>
    %33 = arith.addf %29, %32 : vector<16x96xf32>
    %34 = vector.shape_cast %33 : vector<16x96xf32> to vector<2x8x96xf32>
    %35 = tpu.iota {dimensions = array<i32: 1>} : vector<1x8xi32>
    %36 = vector.broadcast %3 : i32 to vector<1x8xi32>
    %37 = arith.cmpi slt, %35, %36 : vector<1x8xi32>
    %cst_13 = arith.constant 0.000000e+00 : f32
    %cst_14 = arith.constant -1.000000e+09 : f32
    %38 = vector.broadcast %cst_13 : f32 to vector<1x8xf32>
    %39 = vector.broadcast %cst_14 : f32 to vector<1x8xf32>
    %40 = arith.select %37, %38, %39 : vector<1x8xi1>, vector<1x8xf32>
    %41 = vector.extract_strided_slice %34 {offsets = [0, 0, 0], sizes = [1, 8, 16], strides = [1, 1, 1]} : vector<2x8x96xf32> to vector<1x8x16xf32>
    %42 = vector.shape_cast %41 : vector<1x8x16xf32> to vector<8x16xf32>
    %43 = vector.extract_strided_slice %34 {offsets = [0, 0, 32], sizes = [1, 8, 16], strides = [1, 1, 1]} : vector<2x8x96xf32> to vector<1x8x16xf32>
    %44 = vector.shape_cast %43 : vector<1x8x16xf32> to vector<8x16xf32>
    %45 = vector.extract_strided_slice %34 {offsets = [0, 0, 64], sizes = [1, 8, 16], strides = [1, 1, 1]} : vector<2x8x96xf32> to vector<1x8x16xf32>
    %46 = vector.shape_cast %45 : vector<1x8x16xf32> to vector<8x16xf32>
    %47 = arith.truncf %42 : vector<8x16xf32> to vector<8x16xbf16>
    %48 = arith.truncf %44 : vector<8x16xf32> to vector<8x16xbf16>
    %cst_15 = arith.constant dense<0.000000e+00> : vector<8x8xf32>
    %49 = tpu.matmul %47, %48, %cst_15 {dimension_numbers = #tpu.dot_dimension_numbers<[1], [1], [0], [0], [0, 0, 1, 0], [], []>} : vector<8x16xbf16>, vector<8x16xbf16>, vector<8x8xf32> -> vector<8x8xf32>
    %cst_16 = arith.constant 2.500000e-01 : f32
    %50 = vector.broadcast %cst_16 : f32 to vector<8x8xf32>
    %51 = arith.mulf %49, %50 : vector<8x8xf32>
    %52 = vector.broadcast %40 : vector<1x8xf32> to vector<8x8xf32>
    %53 = arith.addf %51, %52 : vector<8x8xf32>
    %cst_17 = arith.constant dense<0xFF800000> : vector<8xf32>
    %54 = vector.multi_reduction <maximumf>, %53, %cst_17 [1] : vector<8x8xf32> to vector<8xf32>
    %55 = vector.shape_cast %54 : vector<8xf32> to vector<8x1xf32>
    %56 = vector.broadcast %55 : vector<8x1xf32> to vector<8x8xf32>
    %57 = arith.subf %53, %56 : vector<8x8xf32>
    %58 = math.exp %57 : vector<8x8xf32>
    %cst_18 = arith.constant dense<0.000000e+00> : vector<8xf32>
    %59 = vector.multi_reduction <add>, %58, %cst_18 [1] : vector<8x8xf32> to vector<8xf32>
    %60 = vector.shape_cast %59 : vector<8xf32> to vector<8x1xf32>
    %61 = tpu.reciprocal %60 {approx = true} : vector<8x1xf32> -> vector<8x1xf32>
    %62 = vector.broadcast %61 : vector<8x1xf32> to vector<8x8xf32>
    %63 = arith.mulf %58, %62 : vector<8x8xf32>
    %64 = arith.truncf %63 : vector<8x8xf32> to vector<8x8xbf16>
    %65 = arith.truncf %46 : vector<8x16xf32> to vector<8x16xbf16>
    %cst_19 = arith.constant dense<0.000000e+00> : vector<8x16xf32>
    %66 = tpu.matmul %64, %65, %cst_19 {dimension_numbers = #tpu.dot_dimension_numbers<[1], [0], [0], [1], [0, 0, 1, 1], [], []>} : vector<8x8xbf16>, vector<8x16xbf16>, vector<8x16xf32> -> vector<8x16xf32>
    %c0_20 = arith.constant 0 : index
    %c0_21 = arith.constant 0 : index
    %c0_22 = arith.constant 0 : index
    %67 = vector.load %arg20[%c0_20, %c0_21, %c0_22] : memref<2x8x32xf32, #tpu.memory_space<vmem>>, vector<1x8x16xf32>
    %68 = vector.shape_cast %67 : vector<1x8x16xf32> to vector<8x16xf32>
    %69 = vector.shape_cast %66 : vector<8x16xf32> to vector<1x8x16xf32>
    tpu.vector_store %arg20[%c0_20, %c0_21, %c0_22], %69 {strides = array<i32>} : memref<2x8x32xf32, #tpu.memory_space<vmem>>, vector<1x8x16xf32>,
    %70 = vector.extract_strided_slice %34 {offsets = [0, 0, 16], sizes = [1, 8, 16], strides = [1, 1, 1]} : vector<2x8x96xf32> to vector<1x8x16xf32>
    %71 = vector.shape_cast %70 : vector<1x8x16xf32> to vector<8x16xf32>
    %72 = vector.extract_strided_slice %34 {offsets = [0, 0, 48], sizes = [1, 8, 16], strides = [1, 1, 1]} : vector<2x8x96xf32> to vector<1x8x16xf32>
    %73 = vector.shape_cast %72 : vector<1x8x16xf32> to vector<8x16xf32>
    %74 = vector.extract_strided_slice %34 {offsets = [0, 0, 80], sizes = [1, 8, 16], strides = [1, 1, 1]} : vector<2x8x96xf32> to vector<1x8x16xf32>
    %75 = vector.shape_cast %74 : vector<1x8x16xf32> to vector<8x16xf32>
    %76 = arith.truncf %71 : vector<8x16xf32> to vector<8x16xbf16>
    %77 = arith.truncf %73 : vector<8x16xf32> to vector<8x16xbf16>
    %cst_23 = arith.constant dense<0.000000e+00> : vector<8x8xf32>
    %78 = tpu.matmul %76, %77, %cst_23 {dimension_numbers = #tpu.dot_dimension_numbers<[1], [1], [0], [0], [0, 0, 1, 0], [], []>} : vector<8x16xbf16>, vector<8x16xbf16>, vector<8x8xf32> -> vector<8x8xf32>
    %cst_24 = arith.constant 2.500000e-01 : f32
    %79 = vector.broadcast %cst_24 : f32 to vector<8x8xf32>
    %80 = arith.mulf %78, %79 : vector<8x8xf32>
    %81 = vector.broadcast %40 : vector<1x8xf32> to vector<8x8xf32>
    %82 = arith.addf %80, %81 : vector<8x8xf32>
    %cst_25 = arith.constant dense<0xFF800000> : vector<8xf32>
    %83 = vector.multi_reduction <maximumf>, %82, %cst_25 [1] : vector<8x8xf32> to vector<8xf32>
    %84 = vector.shape_cast %83 : vector<8xf32> to vector<8x1xf32>
    %85 = vector.broadcast %84 : vector<8x1xf32> to vector<8x8xf32>
    %86 = arith.subf %82, %85 : vector<8x8xf32>
    %87 = math.exp %86 : vector<8x8xf32>
    %cst_26 = arith.constant dense<0.000000e+00> : vector<8xf32>
    %88 = vector.multi_reduction <add>, %87, %cst_26 [1] : vector<8x8xf32> to vector<8xf32>
    %89 = vector.shape_cast %88 : vector<8xf32> to vector<8x1xf32>
    %90 = tpu.reciprocal %89 {approx = true} : vector<8x1xf32> -> vector<8x1xf32>
    %91 = vector.broadcast %90 : vector<8x1xf32> to vector<8x8xf32>
    %92 = arith.mulf %87, %91 : vector<8x8xf32>
    %93 = arith.truncf %92 : vector<8x8xf32> to vector<8x8xbf16>
    %94 = arith.truncf %75 : vector<8x16xf32> to vector<8x16xbf16>
    %cst_27 = arith.constant dense<0.000000e+00> : vector<8x16xf32>
    %95 = tpu.matmul %93, %94, %cst_27 {dimension_numbers = #tpu.dot_dimension_numbers<[1], [0], [0], [1], [0, 0, 1, 1], [], []>} : vector<8x8xbf16>, vector<8x16xbf16>, vector<8x16xf32> -> vector<8x16xf32>
    %c0_28 = arith.constant 0 : index
    %c0_29 = arith.constant 0 : index
    %c16 = arith.constant 16 : index
    %96 = vector.load %arg20[%c0_28, %c0_29, %c16] : memref<2x8x32xf32, #tpu.memory_space<vmem>>, vector<1x8x16xf32>
    %97 = vector.shape_cast %96 : vector<1x8x16xf32> to vector<8x16xf32>
    %98 = vector.shape_cast %95 : vector<8x16xf32> to vector<1x8x16xf32>
    tpu.vector_store %arg20[%c0_28, %c0_29, %c16], %98 {strides = array<i32>} : memref<2x8x32xf32, #tpu.memory_space<vmem>>, vector<1x8x16xf32>,
    %99 = vector.broadcast %6 : i32 to vector<1x8xi32>
    %100 = arith.cmpi slt, %35, %99 : vector<1x8xi32>
    %cst_30 = arith.constant 0.000000e+00 : f32
    %cst_31 = arith.constant -1.000000e+09 : f32
    %101 = vector.broadcast %cst_30 : f32 to vector<1x8xf32>
    %102 = vector.broadcast %cst_31 : f32 to vector<1x8xf32>
    %103 = arith.select %100, %101, %102 : vector<1x8xi1>, vector<1x8xf32>
    %104 = vector.extract_strided_slice %34 {offsets = [1, 0, 0], sizes = [1, 8, 16], strides = [1, 1, 1]} : vector<2x8x96xf32> to vector<1x8x16xf32>
    %105 = vector.shape_cast %104 : vector<1x8x16xf32> to vector<8x16xf32>
    %106 = vector.extract_strided_slice %34 {offsets = [1, 0, 32], sizes = [1, 8, 16], strides = [1, 1, 1]} : vector<2x8x96xf32> to vector<1x8x16xf32>
    %107 = vector.shape_cast %106 : vector<1x8x16xf32> to vector<8x16xf32>
    %108 = vector.extract_strided_slice %34 {offsets = [1, 0, 64], sizes = [1, 8, 16], strides = [1, 1, 1]} : vector<2x8x96xf32> to vector<1x8x16xf32>
    %109 = vector.shape_cast %108 : vector<1x8x16xf32> to vector<8x16xf32>
    %110 = arith.truncf %105 : vector<8x16xf32> to vector<8x16xbf16>
    %111 = arith.truncf %107 : vector<8x16xf32> to vector<8x16xbf16>
    %cst_32 = arith.constant dense<0.000000e+00> : vector<8x8xf32>
    %112 = tpu.matmul %110, %111, %cst_32 {dimension_numbers = #tpu.dot_dimension_numbers<[1], [1], [0], [0], [0, 0, 1, 0], [], []>} : vector<8x16xbf16>, vector<8x16xbf16>, vector<8x8xf32> -> vector<8x8xf32>
    %cst_33 = arith.constant 2.500000e-01 : f32
    %113 = vector.broadcast %cst_33 : f32 to vector<8x8xf32>
    %114 = arith.mulf %112, %113 : vector<8x8xf32>
    %115 = vector.broadcast %103 : vector<1x8xf32> to vector<8x8xf32>
    %116 = arith.addf %114, %115 : vector<8x8xf32>
    %cst_34 = arith.constant dense<0xFF800000> : vector<8xf32>
    %117 = vector.multi_reduction <maximumf>, %116, %cst_34 [1] : vector<8x8xf32> to vector<8xf32>
    %118 = vector.shape_cast %117 : vector<8xf32> to vector<8x1xf32>
    %119 = vector.broadcast %118 : vector<8x1xf32> to vector<8x8xf32>
    %120 = arith.subf %116, %119 : vector<8x8xf32>
    %121 = math.exp %120 : vector<8x8xf32>
    %cst_35 = arith.constant dense<0.000000e+00> : vector<8xf32>
    %122 = vector.multi_reduction <add>, %121, %cst_35 [1] : vector<8x8xf32> to vector<8xf32>
    %123 = vector.shape_cast %122 : vector<8xf32> to vector<8x1xf32>
    %124 = tpu.reciprocal %123 {approx = true} : vector<8x1xf32> -> vector<8x1xf32>
    %125 = vector.broadcast %124 : vector<8x1xf32> to vector<8x8xf32>
    %126 = arith.mulf %121, %125 : vector<8x8xf32>
    %127 = arith.truncf %126 : vector<8x8xf32> to vector<8x8xbf16>
    %128 = arith.truncf %109 : vector<8x16xf32> to vector<8x16xbf16>
    %cst_36 = arith.constant dense<0.000000e+00> : vector<8x16xf32>
    %129 = tpu.matmul %127, %128, %cst_36 {dimension_numbers = #tpu.dot_dimension_numbers<[1], [0], [0], [1], [0, 0, 1, 1], [], []>} : vector<8x8xbf16>, vector<8x16xbf16>, vector<8x16xf32> -> vector<8x16xf32>
    %c1 = arith.constant 1 : index
    %c0_37 = arith.constant 0 : index
    %c0_38 = arith.constant 0 : index
    %130 = vector.load %arg20[%c1, %c0_37, %c0_38] : memref<2x8x32xf32, #tpu.memory_space<vmem>>, vector<1x8x16xf32>
    %131 = vector.shape_cast %130 : vector<1x8x16xf32> to vector<8x16xf32>
    %132 = vector.shape_cast %129 : vector<8x16xf32> to vector<1x8x16xf32>
    tpu.vector_store %arg20[%c1, %c0_37, %c0_38], %132 {strides = array<i32>} : memref<2x8x32xf32, #tpu.memory_space<vmem>>, vector<1x8x16xf32>,
    %133 = vector.extract_strided_slice %34 {offsets = [1, 0, 16], sizes = [1, 8, 16], strides = [1, 1, 1]} : vector<2x8x96xf32> to vector<1x8x16xf32>
    %134 = vector.shape_cast %133 : vector<1x8x16xf32> to vector<8x16xf32>
    %135 = vector.extract_strided_slice %34 {offsets = [1, 0, 48], sizes = [1, 8, 16], strides = [1, 1, 1]} : vector<2x8x96xf32> to vector<1x8x16xf32>
    %136 = vector.shape_cast %135 : vector<1x8x16xf32> to vector<8x16xf32>
    %137 = vector.extract_strided_slice %34 {offsets = [1, 0, 80], sizes = [1, 8, 16], strides = [1, 1, 1]} : vector<2x8x96xf32> to vector<1x8x16xf32>
    %138 = vector.shape_cast %137 : vector<1x8x16xf32> to vector<8x16xf32>
    %139 = arith.truncf %134 : vector<8x16xf32> to vector<8x16xbf16>
    %140 = arith.truncf %136 : vector<8x16xf32> to vector<8x16xbf16>
    %cst_39 = arith.constant dense<0.000000e+00> : vector<8x8xf32>
    %141 = tpu.matmul %139, %140, %cst_39 {dimension_numbers = #tpu.dot_dimension_numbers<[1], [1], [0], [0], [0, 0, 1, 0], [], []>} : vector<8x16xbf16>, vector<8x16xbf16>, vector<8x8xf32> -> vector<8x8xf32>
    %cst_40 = arith.constant 2.500000e-01 : f32
    %142 = vector.broadcast %cst_40 : f32 to vector<8x8xf32>
    %143 = arith.mulf %141, %142 : vector<8x8xf32>
    %144 = vector.broadcast %103 : vector<1x8xf32> to vector<8x8xf32>
    %145 = arith.addf %143, %144 : vector<8x8xf32>
    %cst_41 = arith.constant dense<0xFF800000> : vector<8xf32>
    %146 = vector.multi_reduction <maximumf>, %145, %cst_41 [1] : vector<8x8xf32> to vector<8xf32>
    %147 = vector.shape_cast %146 : vector<8xf32> to vector<8x1xf32>
    %148 = vector.broadcast %147 : vector<8x1xf32> to vector<8x8xf32>
    %149 = arith.subf %145, %148 : vector<8x8xf32>
    %150 = math.exp %149 : vector<8x8xf32>
    %cst_42 = arith.constant dense<0.000000e+00> : vector<8xf32>
    %151 = vector.multi_reduction <add>, %150, %cst_42 [1] : vector<8x8xf32> to vector<8xf32>
    %152 = vector.shape_cast %151 : vector<8xf32> to vector<8x1xf32>
    %153 = tpu.reciprocal %152 {approx = true} : vector<8x1xf32> -> vector<8x1xf32>
    %154 = vector.broadcast %153 : vector<8x1xf32> to vector<8x8xf32>
    %155 = arith.mulf %150, %154 : vector<8x8xf32>
    %156 = arith.truncf %155 : vector<8x8xf32> to vector<8x8xbf16>
    %157 = arith.truncf %138 : vector<8x16xf32> to vector<8x16xbf16>
    %cst_43 = arith.constant dense<0.000000e+00> : vector<8x16xf32>
    %158 = tpu.matmul %156, %157, %cst_43 {dimension_numbers = #tpu.dot_dimension_numbers<[1], [0], [0], [1], [0, 0, 1, 1], [], []>} : vector<8x8xbf16>, vector<8x16xbf16>, vector<8x16xf32> -> vector<8x16xf32>
    %c1_44 = arith.constant 1 : index
    %c0_45 = arith.constant 0 : index
    %c16_46 = arith.constant 16 : index
    %159 = vector.load %arg20[%c1_44, %c0_45, %c16_46] : memref<2x8x32xf32, #tpu.memory_space<vmem>>, vector<1x8x16xf32>
    %160 = vector.shape_cast %159 : vector<1x8x16xf32> to vector<8x16xf32>
    %161 = vector.shape_cast %158 : vector<8x16xf32> to vector<1x8x16xf32>
    tpu.vector_store %arg20[%c1_44, %c0_45, %c16_46], %161 {strides = array<i32>} : memref<2x8x32xf32, #tpu.memory_space<vmem>>, vector<1x8x16xf32>,
    %c0_47 = arith.constant 0 : index
    %c0_48 = arith.constant 0 : index
    %c0_49 = arith.constant 0 : index
    %162 = vector.load %arg20[%c0_47, %c0_48, %c0_49] : memref<2x8x32xf32, #tpu.memory_space<vmem>>, vector<2x8x32xf32>
    %163 = vector.shape_cast %162 : vector<2x8x32xf32> to vector<16x32xf32>
    %164 = arith.truncf %163 : vector<16x32xf32> to vector<16x32xbf16>
    %c0_50 = arith.constant 0 : index
    %c0_51 = arith.constant 0 : index
    %c0_52 = arith.constant 0 : index
    %165 = vector.load %arg8[%c0_50, %c0_51, %c0_52] : memref<1x32x32xbf16, #tpu.memory_space<vmem>>, vector<1x32x32xbf16>
    %166 = vector.shape_cast %165 : vector<1x32x32xbf16> to vector<32x32xbf16>
    %cst_53 = arith.constant dense<0.000000e+00> : vector<16x32xf32>
    %167 = tpu.matmul %164, %166, %cst_53 {dimension_numbers = #tpu.dot_dimension_numbers<[1], [0], [0], [1], [0, 0, 1, 1], [], []>} : vector<16x32xbf16>, vector<32x32xbf16>, vector<16x32xf32> -> vector<16x32xf32>
    %c0_54 = arith.constant 0 : index
    %c0_55 = arith.constant 0 : index
    %c0_56 = arith.constant 0 : index
    %168 = vector.load %arg9[%c0_54, %c0_55, %c0_56] : memref<1x1x32xf32, #tpu.memory_space<vmem>>, vector<1x1x32xf32>
    %169 = vector.shape_cast %168 : vector<1x1x32xf32> to vector<1x32xf32>
    %170 = vector.broadcast %169 : vector<1x32xf32> to vector<16x32xf32>
    %171 = arith.addf %167, %170 : vector<16x32xf32>
    %172 = vector.shape_cast %171 : vector<16x32xf32> to vector<2x8x32xf32>
    %173 = arith.addf %172, %24 : vector<2x8x32xf32>
    %c0_57 = arith.constant 0 : index
    %c0_58 = arith.constant 0 : index
    %c0_59 = arith.constant 0 : index
    %174 = vector.load %arg10[%c0_57, %c0_58, %c0_59] : memref<1x1x32xf32, #tpu.memory_space<vmem>>, vector<1x1x32xf32>
    %175 = vector.shape_cast %174 : vector<1x1x32xf32> to vector<1x32xf32>
    %c0_60 = arith.constant 0 : index
    %c0_61 = arith.constant 0 : index
    %c0_62 = arith.constant 0 : index
    %176 = vector.load %arg11[%c0_60, %c0_61, %c0_62] : memref<1x1x32xf32, #tpu.memory_space<vmem>>, vector<1x1x32xf32>
    %177 = vector.shape_cast %176 : vector<1x1x32xf32> to vector<1x32xf32>
    %cst_63 = arith.constant dense<0.000000e+00> : vector<2x8xf32>
    %178 = vector.multi_reduction <add>, %173, %cst_63 [2] : vector<2x8x32xf32> to vector<2x8xf32>
    %179 = vector.shape_cast %178 : vector<2x8xf32> to vector<2x8x1xf32>
    %cst_64 = arith.constant 3.200000e+01 : f32
    %180 = vector.broadcast %cst_64 : f32 to vector<2x8x1xf32>
    %181 = arith.divf %179, %180 : vector<2x8x1xf32>
    %182 = vector.broadcast %181 : vector<2x8x1xf32> to vector<2x8x32xf32>
    %183 = arith.subf %173, %182 : vector<2x8x32xf32>
    %184 = arith.mulf %183, %183 : vector<2x8x32xf32>
    %cst_65 = arith.constant dense<0.000000e+00> : vector<2x8xf32>
    %185 = vector.multi_reduction <add>, %184, %cst_65 [2] : vector<2x8x32xf32> to vector<2x8xf32>
    %186 = vector.shape_cast %185 : vector<2x8xf32> to vector<2x8x1xf32>
    %cst_66 = arith.constant 3.200000e+01 : f32
    %187 = vector.broadcast %cst_66 : f32 to vector<2x8x1xf32>
    %188 = arith.divf %186, %187 : vector<2x8x1xf32>
    %189 = vector.broadcast %181 : vector<2x8x1xf32> to vector<2x8x32xf32>
    %190 = arith.subf %173, %189 : vector<2x8x32xf32>
    %cst_67 = arith.constant 9.99999974E-6 : f32
    %191 = vector.broadcast %cst_67 : f32 to vector<2x8x1xf32>
    %192 = arith.addf %188, %191 : vector<2x8x1xf32>
    %193 = math.rsqrt %192 : vector<2x8x1xf32>
    %194 = vector.broadcast %193 : vector<2x8x1xf32> to vector<2x8x32xf32>
    %195 = arith.mulf %190, %194 : vector<2x8x32xf32>
    %196 = vector.shape_cast %175 : vector<1x32xf32> to vector<1x1x32xf32>
    %197 = vector.broadcast %196 : vector<1x1x32xf32> to vector<2x8x32xf32>
    %198 = arith.mulf %195, %197 : vector<2x8x32xf32>
    %199 = vector.shape_cast %177 : vector<1x32xf32> to vector<1x1x32xf32>
    %200 = vector.broadcast %199 : vector<1x1x32xf32> to vector<2x8x32xf32>
    %201 = arith.addf %198, %200 : vector<2x8x32xf32>
    %202 = vector.broadcast %20 : vector<2x8x1xf32> to vector<2x8x32xf32>
    %203 = arith.mulf %201, %202 : vector<2x8x32xf32>
    %c0_68 = arith.constant 0 : index
    %c0_69 = arith.constant 0 : index
    %c0_70 = arith.constant 0 : index
    %204 = vector.load %arg13[%c0_68, %c0_69, %c0_70] : memref<1x1x64xf32, #tpu.memory_space<vmem>>, vector<1x1x64xf32>
    %205 = vector.shape_cast %204 : vector<1x1x64xf32> to vector<1x64xf32>
    %cst_71 = arith.constant 0.000000e+00 : f32
    %206 = vector.broadcast %cst_71 : f32 to vector<2x1x32xf32>
    %c0_72 = arith.constant 0 : index
    %c0_73 = arith.constant 0 : index
    %c0_74 = arith.constant 0 : index
    %207 = vector.load %arg21[%c0_72, %c0_73, %c0_74] : memref<2x10x32xf32, #tpu.memory_space<vmem>>, vector<2x1x32xf32>
    tpu.vector_store %arg21[%c0_72, %c0_73, %c0_74], %206 {strides = array<i32>} : memref<2x10x32xf32, #tpu.memory_space<vmem>>, vector<2x1x32xf32>,
    %cst_75 = arith.constant 0.000000e+00 : f32
    %208 = vector.broadcast %cst_75 : f32 to vector<2x1x32xf32>
    %c0_76 = arith.constant 0 : index
    %c9 = arith.constant 9 : index
    %c0_77 = arith.constant 0 : index
    %209 = vector.load %arg21[%c0_76, %c9, %c0_77] : memref<2x10x32xf32, #tpu.memory_space<vmem>>, vector<2x1x32xf32>
    tpu.vector_store %arg21[%c0_76, %c9, %c0_77], %208 {strides = array<i32>} : memref<2x10x32xf32, #tpu.memory_space<vmem>>, vector<2x1x32xf32>,
    %c0_78 = arith.constant 0 : index
    %c1_79 = arith.constant 1 : index
    %c0_80 = arith.constant 0 : index
    %210 = vector.load %arg21[%c0_78, %c1_79, %c0_80] : memref<2x10x32xf32, #tpu.memory_space<vmem>>, vector<2x8x32xf32>
    tpu.vector_store %arg21[%c0_78, %c1_79, %c0_80], %203 {strides = array<i32>} : memref<2x10x32xf32, #tpu.memory_space<vmem>>, vector<2x8x32xf32>,
    %c0_81 = arith.constant 0 : index
    %c0_82 = arith.constant 0 : index
    %c0_83 = arith.constant 0 : index
    %211 = vector.load %arg21[%c0_81, %c0_82, %c0_83] : memref<2x10x32xf32, #tpu.memory_space<vmem>>, vector<2x8x32xf32>
    %212 = vector.shape_cast %211 : vector<2x8x32xf32> to vector<16x32xf32>
    %213 = arith.truncf %212 : vector<16x32xf32> to vector<16x32xbf16>
    %c0_84 = arith.constant 0 : index
    %c0_85 = arith.constant 0 : index
    %c0_86 = arith.constant 0 : index
    %214 = vector.load %arg12[%c0_84, %c0_85, %c0_86] : memref<1x96x64xbf16, #tpu.memory_space<vmem>>, vector<1x32x64xbf16>
    %215 = vector.shape_cast %214 : vector<1x32x64xbf16> to vector<32x64xbf16>
    %cst_87 = arith.constant dense<0.000000e+00> : vector<16x64xf32>
    %216 = tpu.matmul %213, %215, %cst_87 {dimension_numbers = #tpu.dot_dimension_numbers<[1], [0], [0], [1], [0, 0, 1, 1], [], []>} : vector<16x32xbf16>, vector<32x64xbf16>, vector<16x64xf32> -> vector<16x64xf32>
    %c0_88 = arith.constant 0 : index
    %c1_89 = arith.constant 1 : index
    %c0_90 = arith.constant 0 : index
    %217 = vector.load %arg21[%c0_88, %c1_89, %c0_90] : memref<2x10x32xf32, #tpu.memory_space<vmem>>, vector<2x8x32xf32>
    %218 = vector.shape_cast %217 : vector<2x8x32xf32> to vector<16x32xf32>
    %219 = arith.truncf %218 : vector<16x32xf32> to vector<16x32xbf16>
    %c0_91 = arith.constant 0 : index
    %c32 = arith.constant 32 : index
    %c0_92 = arith.constant 0 : index
    %220 = vector.load %arg12[%c0_91, %c32, %c0_92] : memref<1x96x64xbf16, #tpu.memory_space<vmem>>, vector<1x32x64xbf16>
    %221 = vector.shape_cast %220 : vector<1x32x64xbf16> to vector<32x64xbf16>
    %cst_93 = arith.constant dense<0.000000e+00> : vector<16x64xf32>
    %222 = tpu.matmul %219, %221, %cst_93 {dimension_numbers = #tpu.dot_dimension_numbers<[1], [0], [0], [1], [0, 0, 1, 1], [], []>} : vector<16x32xbf16>, vector<32x64xbf16>, vector<16x64xf32> -> vector<16x64xf32>
    %223 = arith.addf %216, %222 : vector<16x64xf32>
    %c0_94 = arith.constant 0 : index
    %c2 = arith.constant 2 : index
    %c0_95 = arith.constant 0 : index
    %224 = vector.load %arg21[%c0_94, %c2, %c0_95] : memref<2x10x32xf32, #tpu.memory_space<vmem>>, vector<2x8x32xf32>
    %225 = vector.shape_cast %224 : vector<2x8x32xf32> to vector<16x32xf32>
    %226 = arith.truncf %225 : vector<16x32xf32> to vector<16x32xbf16>
    %c0_96 = arith.constant 0 : index
    %c64 = arith.constant 64 : index
    %c0_97 = arith.constant 0 : index
    %227 = vector.load %arg12[%c0_96, %c64, %c0_97] : memref<1x96x64xbf16, #tpu.memory_space<vmem>>, vector<1x32x64xbf16>
    %228 = vector.shape_cast %227 : vector<1x32x64xbf16> to vector<32x64xbf16>
    %cst_98 = arith.constant dense<0.000000e+00> : vector<16x64xf32>
    %229 = tpu.matmul %226, %228, %cst_98 {dimension_numbers = #tpu.dot_dimension_numbers<[1], [0], [0], [1], [0, 0, 1, 1], [], []>} : vector<16x32xbf16>, vector<32x64xbf16>, vector<16x64xf32> -> vector<16x64xf32>
    %230 = arith.addf %223, %229 : vector<16x64xf32>
    %231 = vector.broadcast %205 : vector<1x64xf32> to vector<16x64xf32>
    %232 = arith.addf %230, %231 : vector<16x64xf32>
    %cst_99 = arith.constant 0.000000e+00 : f32
    %233 = vector.broadcast %cst_99 : f32 to vector<16x64xf32>
    %234 = arith.maximumf %232, %233 : vector<16x64xf32>
    %235 = vector.shape_cast %234 : vector<16x64xf32> to vector<2x8x64xf32>
    %c0_100 = arith.constant 0 : index
    %c0_101 = arith.constant 0 : index
    %c0_102 = arith.constant 0 : index
    %236 = vector.load %arg15[%c0_100, %c0_101, %c0_102] : memref<1x1x32xf32, #tpu.memory_space<vmem>>, vector<1x1x32xf32>
    %237 = vector.shape_cast %236 : vector<1x1x32xf32> to vector<1x32xf32>
    %cst_103 = arith.constant 0.000000e+00 : f32
    %238 = vector.broadcast %cst_103 : f32 to vector<2x1x64xf32>
    %c0_104 = arith.constant 0 : index
    %c0_105 = arith.constant 0 : index
    %c0_106 = arith.constant 0 : index
    %239 = vector.load %arg22[%c0_104, %c0_105, %c0_106] : memref<2x10x64xf32, #tpu.memory_space<vmem>>, vector<2x1x64xf32>
    tpu.vector_store %arg22[%c0_104, %c0_105, %c0_106], %238 {strides = array<i32>} : memref<2x10x64xf32, #tpu.memory_space<vmem>>, vector<2x1x64xf32>,
    %cst_107 = arith.constant 0.000000e+00 : f32
    %240 = vector.broadcast %cst_107 : f32 to vector<2x1x64xf32>
    %c0_108 = arith.constant 0 : index
    %c9_109 = arith.constant 9 : index
    %c0_110 = arith.constant 0 : index
    %241 = vector.load %arg22[%c0_108, %c9_109, %c0_110] : memref<2x10x64xf32, #tpu.memory_space<vmem>>, vector<2x1x64xf32>
    tpu.vector_store %arg22[%c0_108, %c9_109, %c0_110], %240 {strides = array<i32>} : memref<2x10x64xf32, #tpu.memory_space<vmem>>, vector<2x1x64xf32>,
    %c0_111 = arith.constant 0 : index
    %c1_112 = arith.constant 1 : index
    %c0_113 = arith.constant 0 : index
    %242 = vector.load %arg22[%c0_111, %c1_112, %c0_113] : memref<2x10x64xf32, #tpu.memory_space<vmem>>, vector<2x8x64xf32>
    tpu.vector_store %arg22[%c0_111, %c1_112, %c0_113], %235 {strides = array<i32>} : memref<2x10x64xf32, #tpu.memory_space<vmem>>, vector<2x8x64xf32>,
    %c0_114 = arith.constant 0 : index
    %c0_115 = arith.constant 0 : index
    %c0_116 = arith.constant 0 : index
    %243 = vector.load %arg22[%c0_114, %c0_115, %c0_116] : memref<2x10x64xf32, #tpu.memory_space<vmem>>, vector<2x8x64xf32>
    %244 = vector.shape_cast %243 : vector<2x8x64xf32> to vector<16x64xf32>
    %245 = arith.truncf %244 : vector<16x64xf32> to vector<16x64xbf16>
    %c0_117 = arith.constant 0 : index
    %c0_118 = arith.constant 0 : index
    %c0_119 = arith.constant 0 : index
    %246 = vector.load %arg14[%c0_117, %c0_118, %c0_119] : memref<1x192x32xbf16, #tpu.memory_space<vmem>>, vector<1x64x32xbf16>
    %247 = vector.shape_cast %246 : vector<1x64x32xbf16> to vector<64x32xbf16>
    %cst_120 = arith.constant dense<0.000000e+00> : vector<16x32xf32>
    %248 = tpu.matmul %245, %247, %cst_120 {dimension_numbers = #tpu.dot_dimension_numbers<[1], [0], [0], [1], [0, 0, 1, 1], [], []>} : vector<16x64xbf16>, vector<64x32xbf16>, vector<16x32xf32> -> vector<16x32xf32>
    %c0_121 = arith.constant 0 : index
    %c1_122 = arith.constant 1 : index
    %c0_123 = arith.constant 0 : index
    %249 = vector.load %arg22[%c0_121, %c1_122, %c0_123] : memref<2x10x64xf32, #tpu.memory_space<vmem>>, vector<2x8x64xf32>
    %250 = vector.shape_cast %249 : vector<2x8x64xf32> to vector<16x64xf32>
    %251 = arith.truncf %250 : vector<16x64xf32> to vector<16x64xbf16>
    %c0_124 = arith.constant 0 : index
    %c64_125 = arith.constant 64 : index
    %c0_126 = arith.constant 0 : index
    %252 = vector.load %arg14[%c0_124, %c64_125, %c0_126] : memref<1x192x32xbf16, #tpu.memory_space<vmem>>, vector<1x64x32xbf16>
    %253 = vector.shape_cast %252 : vector<1x64x32xbf16> to vector<64x32xbf16>
    %cst_127 = arith.constant dense<0.000000e+00> : vector<16x32xf32>
    %254 = tpu.matmul %251, %253, %cst_127 {dimension_numbers = #tpu.dot_dimension_numbers<[1], [0], [0], [1], [0, 0, 1, 1], [], []>} : vector<16x64xbf16>, vector<64x32xbf16>, vector<16x32xf32> -> vector<16x32xf32>
    %255 = arith.addf %248, %254 : vector<16x32xf32>
    %c0_128 = arith.constant 0 : index
    %c2_129 = arith.constant 2 : index
    %c0_130 = arith.constant 0 : index
    %256 = vector.load %arg22[%c0_128, %c2_129, %c0_130] : memref<2x10x64xf32, #tpu.memory_space<vmem>>, vector<2x8x64xf32>
    %257 = vector.shape_cast %256 : vector<2x8x64xf32> to vector<16x64xf32>
    %258 = arith.truncf %257 : vector<16x64xf32> to vector<16x64xbf16>
    %c0_131 = arith.constant 0 : index
    %c128 = arith.constant 128 : index
    %c0_132 = arith.constant 0 : index
    %259 = vector.load %arg14[%c0_131, %c128, %c0_132] : memref<1x192x32xbf16, #tpu.memory_space<vmem>>, vector<1x64x32xbf16>
    %260 = vector.shape_cast %259 : vector<1x64x32xbf16> to vector<64x32xbf16>
    %cst_133 = arith.constant dense<0.000000e+00> : vector<16x32xf32>
    %261 = tpu.matmul %258, %260, %cst_133 {dimension_numbers = #tpu.dot_dimension_numbers<[1], [0], [0], [1], [0, 0, 1, 1], [], []>} : vector<16x64xbf16>, vector<64x32xbf16>, vector<16x32xf32> -> vector<16x32xf32>
    %262 = arith.addf %255, %261 : vector<16x32xf32>
    %263 = vector.broadcast %237 : vector<1x32xf32> to vector<16x32xf32>
    %264 = arith.addf %262, %263 : vector<16x32xf32>
    %265 = vector.shape_cast %264 : vector<16x32xf32> to vector<2x8x32xf32>
    %266 = arith.addf %265, %203 : vector<2x8x32xf32>
    %c0_134 = arith.constant 0 : index
    %c0_135 = arith.constant 0 : index
    %c0_136 = arith.constant 0 : index
    %267 = vector.load %arg16[%c0_134, %c0_135, %c0_136] : memref<1x1x32xf32, #tpu.memory_space<vmem>>, vector<1x1x32xf32>
    %268 = vector.shape_cast %267 : vector<1x1x32xf32> to vector<1x32xf32>
    %c0_137 = arith.constant 0 : index
    %c0_138 = arith.constant 0 : index
    %c0_139 = arith.constant 0 : index
    %269 = vector.load %arg17[%c0_137, %c0_138, %c0_139] : memref<1x1x32xf32, #tpu.memory_space<vmem>>, vector<1x1x32xf32>
    %270 = vector.shape_cast %269 : vector<1x1x32xf32> to vector<1x32xf32>
    %cst_140 = arith.constant dense<0.000000e+00> : vector<2x8xf32>
    %271 = vector.multi_reduction <add>, %266, %cst_140 [2] : vector<2x8x32xf32> to vector<2x8xf32>
    %272 = vector.shape_cast %271 : vector<2x8xf32> to vector<2x8x1xf32>
    %cst_141 = arith.constant 3.200000e+01 : f32
    %273 = vector.broadcast %cst_141 : f32 to vector<2x8x1xf32>
    %274 = arith.divf %272, %273 : vector<2x8x1xf32>
    %275 = vector.broadcast %274 : vector<2x8x1xf32> to vector<2x8x32xf32>
    %276 = arith.subf %266, %275 : vector<2x8x32xf32>
    %277 = arith.mulf %276, %276 : vector<2x8x32xf32>
    %cst_142 = arith.constant dense<0.000000e+00> : vector<2x8xf32>
    %278 = vector.multi_reduction <add>, %277, %cst_142 [2] : vector<2x8x32xf32> to vector<2x8xf32>
    %279 = vector.shape_cast %278 : vector<2x8xf32> to vector<2x8x1xf32>
    %cst_143 = arith.constant 3.200000e+01 : f32
    %280 = vector.broadcast %cst_143 : f32 to vector<2x8x1xf32>
    %281 = arith.divf %279, %280 : vector<2x8x1xf32>
    %282 = vector.broadcast %274 : vector<2x8x1xf32> to vector<2x8x32xf32>
    %283 = arith.subf %266, %282 : vector<2x8x32xf32>
    %cst_144 = arith.constant 9.99999974E-6 : f32
    %284 = vector.broadcast %cst_144 : f32 to vector<2x8x1xf32>
    %285 = arith.addf %281, %284 : vector<2x8x1xf32>
    %286 = math.rsqrt %285 : vector<2x8x1xf32>
    %287 = vector.broadcast %286 : vector<2x8x1xf32> to vector<2x8x32xf32>
    %288 = arith.mulf %283, %287 : vector<2x8x32xf32>
    %289 = vector.shape_cast %268 : vector<1x32xf32> to vector<1x1x32xf32>
    %290 = vector.broadcast %289 : vector<1x1x32xf32> to vector<2x8x32xf32>
    %291 = arith.mulf %288, %290 : vector<2x8x32xf32>
    %292 = vector.shape_cast %270 : vector<1x32xf32> to vector<1x1x32xf32>
    %293 = vector.broadcast %292 : vector<1x1x32xf32> to vector<2x8x32xf32>
    %294 = arith.addf %291, %293 : vector<2x8x32xf32>
    %295 = vector.broadcast %20 : vector<2x8x1xf32> to vector<2x8x32xf32>
    %296 = arith.mulf %294, %295 : vector<2x8x32xf32>
    %c0_145 = arith.constant 0 : index
    %c0_146 = arith.constant 0 : index
    %c0_147 = arith.constant 0 : index
    %297 = vector.load %arg19[%c0_145, %c0_146, %c0_147] : memref<2x8x32xf32, #tpu.memory_space<vmem>>, vector<2x8x32xf32>
    tpu.vector_store %arg19[%c0_145, %c0_146, %c0_147], %296 {strides = array<i32>} : memref<2x8x32xf32, #tpu.memory_space<vmem>>, vector<2x8x32xf32>,
    %c1_i32_148 = arith.constant 1 : i32
    %298 = arith.cmpi eq, %arg1, %c1_i32_148 : i32
    %299 = arith.extui %298 : i1 to i32
    %c0_i32_149 = arith.constant 0 : i32
    %300 = arith.cmpi ne, %299, %c0_i32_149 : i32
    scf.if %300 {
      %c0_150 = arith.constant 0 : index
      %c0_151 = arith.constant 0 : index
      %c0_152 = arith.constant 0 : index
      %301 = vector.load %arg5[%c0_150, %c0_151, %c0_152] : memref<2x8x32xf32, #tpu.memory_space<vmem>>, vector<2x8x32xf32>
      %302 = arith.addf %296, %301 : vector<2x8x32xf32>
      %c0_153 = arith.constant 0 : index
      %c0_154 = arith.constant 0 : index
      %c0_155 = arith.constant 0 : index
      %303 = vector.load %arg18[%c0_153, %c0_154, %c0_155] : memref<2x8x32xf32, #tpu.memory_space<vmem>>, vector<2x8x32xf32>
      tpu.vector_store %arg18[%c0_153, %c0_154, %c0_155], %302 {strides = array<i32>} : memref<2x8x32xf32, #tpu.memory_space<vmem>>, vector<2x8x32xf32>,
    } else {
    }
    return
  }
  func.func @transform_0(%arg0: i32, %arg1: i32, %arg2: memref<2xi32, #tpu.memory_space<smem>>) -> (i32, i32, i32) {
    %c0_i32 = arith.constant 0 : i32
    %c0_i32_0 = arith.constant 0 : i32
    %c0_i32_1 = arith.constant 0 : i32
    return %arg0, %c0_i32, %c0_i32_0 : i32, i32, i32
  }
  func.func @transform_1(%arg0: i32, %arg1: i32, %arg2: memref<2xi32, #tpu.memory_space<smem>>) -> (i32, i32) {
    %c0_i32 = arith.constant 0 : i32
    %c0_i32_0 = arith.constant 0 : i32
    %c0_i32_1 = arith.constant 0 : i32
    return %c0_i32, %c0_i32_0 : i32, i32
  }
  func.func @transform_2(%arg0: i32, %arg1: i32, %arg2: memref<2xi32, #tpu.memory_space<smem>>) -> (i32, i32, i32) {
    %c0_i32 = arith.constant 0 : i32
    %c0_i32_0 = arith.constant 0 : i32
    %c0_i32_1 = arith.constant 0 : i32
    return %arg0, %c0_i32, %c0_i32_0 : i32, i32, i32
  }
  func.func @transform_3(%arg0: i32, %arg1: i32, %arg2: memref<2xi32, #tpu.memory_space<smem>>) -> (i32, i32, i32) {
    %c0_i32 = arith.constant 0 : i32
    %c0_i32_0 = arith.constant 0 : i32
    %c0_i32_1 = arith.constant 0 : i32
    return %arg1, %c0_i32, %c0_i32_0 : i32, i32, i32
  }
  func.func @transform_4(%arg0: i32, %arg1: i32, %arg2: memref<2xi32, #tpu.memory_space<smem>>) -> (i32, i32, i32) {
    %c0_i32 = arith.constant 0 : i32
    %c0_i32_0 = arith.constant 0 : i32
    %c0_i32_1 = arith.constant 0 : i32
    return %arg1, %c0_i32, %c0_i32_0 : i32, i32, i32
  }
  func.func @transform_5(%arg0: i32, %arg1: i32, %arg2: memref<2xi32, #tpu.memory_space<smem>>) -> (i32, i32, i32) {
    %c0_i32 = arith.constant 0 : i32
    %c0_i32_0 = arith.constant 0 : i32
    %c0_i32_1 = arith.constant 0 : i32
    return %arg1, %c0_i32, %c0_i32_0 : i32, i32, i32
  }
  func.func @transform_6(%arg0: i32, %arg1: i32, %arg2: memref<2xi32, #tpu.memory_space<smem>>) -> (i32, i32, i32) {
    %c0_i32 = arith.constant 0 : i32
    %c0_i32_0 = arith.constant 0 : i32
    %c0_i32_1 = arith.constant 0 : i32
    return %arg1, %c0_i32, %c0_i32_0 : i32, i32, i32
  }
  func.func @transform_7(%arg0: i32, %arg1: i32, %arg2: memref<2xi32, #tpu.memory_space<smem>>) -> (i32, i32, i32) {
    %c0_i32 = arith.constant 0 : i32
    %c0_i32_0 = arith.constant 0 : i32
    %c0_i32_1 = arith.constant 0 : i32
    return %arg1, %c0_i32, %c0_i32_0 : i32, i32, i32
  }
  func.func @transform_8(%arg0: i32, %arg1: i32, %arg2: memref<2xi32, #tpu.memory_space<smem>>) -> (i32, i32, i32) {
    %c0_i32 = arith.constant 0 : i32
    %c0_i32_0 = arith.constant 0 : i32
    %c0_i32_1 = arith.constant 0 : i32
    return %arg1, %c0_i32, %c0_i32_0 : i32, i32, i32
  }
  func.func @transform_9(%arg0: i32, %arg1: i32, %arg2: memref<2xi32, #tpu.memory_space<smem>>) -> (i32, i32, i32) {
    %c0_i32 = arith.constant 0 : i32
    %c0_i32_0 = arith.constant 0 : i32
    %c0_i32_1 = arith.constant 0 : i32
    return %arg1, %c0_i32, %c0_i32_0 : i32, i32, i32
  }
  func.func @transform_10(%arg0: i32, %arg1: i32, %arg2: memref<2xi32, #tpu.memory_space<smem>>) -> (i32, i32, i32) {
    %c0_i32 = arith.constant 0 : i32
    %c0_i32_0 = arith.constant 0 : i32
    %c0_i32_1 = arith.constant 0 : i32
    return %arg1, %c0_i32, %c0_i32_0 : i32, i32, i32
  }
  func.func @transform_11(%arg0: i32, %arg1: i32, %arg2: memref<2xi32, #tpu.memory_space<smem>>) -> (i32, i32, i32) {
    %c0_i32 = arith.constant 0 : i32
    %c0_i32_0 = arith.constant 0 : i32
    %c0_i32_1 = arith.constant 0 : i32
    return %arg1, %c0_i32, %c0_i32_0 : i32, i32, i32
  }
  func.func @transform_12(%arg0: i32, %arg1: i32, %arg2: memref<2xi32, #tpu.memory_space<smem>>) -> (i32, i32, i32) {
    %c0_i32 = arith.constant 0 : i32
    %c0_i32_0 = arith.constant 0 : i32
    %c0_i32_1 = arith.constant 0 : i32
    return %arg1, %c0_i32, %c0_i32_0 : i32, i32, i32
  }
  func.func @transform_13(%arg0: i32, %arg1: i32, %arg2: memref<2xi32, #tpu.memory_space<smem>>) -> (i32, i32, i32) {
    %c0_i32 = arith.constant 0 : i32
    %c0_i32_0 = arith.constant 0 : i32
    %c0_i32_1 = arith.constant 0 : i32
    return %arg1, %c0_i32, %c0_i32_0 : i32, i32, i32
  }
  func.func @transform_14(%arg0: i32, %arg1: i32, %arg2: memref<2xi32, #tpu.memory_space<smem>>) -> (i32, i32, i32) {
    %c0_i32 = arith.constant 0 : i32
    %c0_i32_0 = arith.constant 0 : i32
    %c0_i32_1 = arith.constant 0 : i32
    return %arg1, %c0_i32, %c0_i32_0 : i32, i32, i32
  }
  func.func @transform_15(%arg0: i32, %arg1: i32, %arg2: memref<2xi32, #tpu.memory_space<smem>>) -> (i32, i32, i32) {
    %c0_i32 = arith.constant 0 : i32
    %c0_i32_0 = arith.constant 0 : i32
    %c0_i32_1 = arith.constant 0 : i32
    return %arg0, %c0_i32, %c0_i32_0 : i32, i32, i32
  }
}

</mosaic_0001>

<bundles_post_ra>
// kernel: forward.3
= control target key start
LH: loop header
LB: loop body
LE: loop exit
PB: predicated region body
PF: predicated region fallthrough
CT: control target
= control target key end

     0   :  { %vm77_vm0 = vcmask 1040384   ;;  %vm48_vm1 = vcmask 1046528   ;;  %vm70_vm2 = vcmask 15360   ;;  %vm188_vm3 = vcmask 1045504   ;;  %s1817_s1 = inlined_call_operand.vmem [shape: bf16[14,32], index: 1, kind: input, shape index: {}]   ;;  %s1818_s0 = inlined_call_operand.vmem [shape: f32[2,22,2], index: 0, kind: input, shape index: {}]   ;;  %s1819_s3 = inlined_call_operand.vmem [shape: bf16[96,32], index: 3, kind: input, shape index: {}]   ;;  %s1820_s2 = inlined_call_operand.vmem [shape: f32[1,32], index: 2, kind: input, shape index: {}]   ;;  %s1821_s5 = inlined_call_operand.vmem [shape: bf16[96,32], index: 5, kind: input, shape index: {}]   ;;  %s1822_s4 = inlined_call_operand.vmem [shape: f32[1,32], index: 4, kind: input, shape index: {}]   ;;  %s1823_s7 = inlined_call_operand.vmem [shape: bf16[32,32], index: 7, kind: input, shape index: {}]   ;;  %s1824_s6 = inlined_call_operand.vmem [shape: f32[1,32], index: 6, kind: input, shape index: {}]   ;;  %s1825_s8 = inlined_call_operand.vmem [shape: f32[1,32], index: 8, kind: input, shape index: {}]   ;;  %s1826_s9 = inlined_call_operand.vmem [shape: f32[2,16,32], index: 9, kind: output, shape index: {}]  }
   0x1   :  { %v1471_v0 = vld [vmem:[%s1817_s1] ss:$0 sps:$4 sm:$0x22]   ;;  %v1576_v2 = vld [vmem:[%s1818_s0 + $0x8] sm:$0xff]  ;;  %v1581_v3 = vld [vmem:[%s1818_s0 + $0x10] sm:$0x3f] }
   0x2   :  { %v1571_v1 = vld [vmem:[%s1818_s0] sm:$0xff]  ;;  %v1587_v5 = vld [vmem:[%s1818_s0 + $0x18] sm:$0xff]  ;;  %v69_v6 = vrot.slane %v1471_v0, 1  ;;  %v50_v7 = vrot.slane %v1576_v2, 1  ;;  %v52_v8 = vrot.slane %v1581_v3, 1  ;;  %v190_v27 = vrot.slane %v1576_v2, 2 }
   0x3   :  { %v49_v4 = vrot.slane %v1571_v1, 1  ;;  %v1594_v9 = vld [vmem:[%s1818_s0 + $0x20] sm:$0xff]  ;;  %v1599_v10 = vld [vmem:[%s1818_s0 + $0x28] sm:$0x3f]  ;;  %v54_v11 = vrot.slane %v1587_v5, 1  ;;  %v39_v21 = vpack.c.bf16 %v1576_v2, %v1571_v1  ;;  %v189_v26 = vrot.slane %v1571_v1, 2 }
   0x4   :  { %v55_v12 = vrot.slane %v1594_v9, 1  ;;  %v57_v13 = vrot.slane %v1599_v10, 1  ;;  %v41_v14 = vld [vmem:[%s1817_s1] sm:$0x1]  ;;  %1463 = vmatprep.subr.msk.bf16.mxu0 %vm77_vm0, %v69_v6  ;;  %v79_v15 = vsel %vm77_vm0, %v69_v6, 0  ;;  %v53_v17 = vsel %vm48_vm1, %v50_v7, %v52_v8 }
   0x5   :  { %v51_v16 = vsel %vm48_vm1, %v49_v4, %v50_v7  ;;  %1326 = vmatpush3.bf16.msra.mxu0 %v79_v15  ;;  %v1472_v22 = vld [vmem:[%s1817_s1] ss:$0 sps:$4 sm:$0x44]   ;;  %v137_v24 = vsel %vm77_vm0, %v41_v14, 0  ;;  %v192_v28 = vrot.slane %v1581_v3, 2  ;;  %v191_v29 = vsel %vm188_vm3, %v189_v26, %v190_v27 }
   0x6   :  { %v63_v18 = vpack.c.bf16 %v53_v17, %v51_v16  ;;  %v56_v19 = vsel %vm48_vm1, %v54_v11, %v55_v12  ;;  %v58_v20 = vsel %vm48_vm1, %v55_v12, %v57_v13  ;;  %1464 = vmatprep.subr.msk.bf16.mxu0 %vm77_vm0, %v41_v14  ;;  %v209_v25 = vrot.slane %v1472_v22, 2  ;;  %v1473_v31 = vld [vmem:[%s1817_s1] ss:$0 sps:$4 sm:$0x88]   ;;  %v373_v55 = vld [vmem:[%s1817_s1 + $0x4] sm:$0x1] }
   0x7   :  { %v64_v23 = vpack.c.bf16 %v58_v20, %v56_v19  ;;  %v193_v30 = vsel %vm188_vm3, %v190_v27, %v192_v28  ;;  %v40_v32 = vpack.c.bf16 %v1594_v9, %v1587_v5  ;;  %v293_v35 = vrot.slane %v1473_v31, 3  ;;  %v1474_v6 = vld [vmem:[%s1817_s1 + $0x4] ss:$0 sps:$4 sm:$0x22]  }
   0x8   :  { %1327 = vmatprep.mubr.msk.bf16.mxu0 %vm70_vm2, %v63_v18  ;;  %v203_v33 = vpack.c.bf16 %v193_v30, %v191_v29  ;;  %v217_v34 = vsel %vm77_vm0, %v209_v25, 0  ;;  %v194_v36 = vrot.slane %v1587_v5, 2  ;;  %v195_v37 = vrot.slane %v1594_v9, 2 }
   0x9   :  { %1328 = vmatmul.mubr.msk.bf16.vlgmr.msra.gmra.mrb[0].mxu0 %vm70_vm2, %v64_v23  ;;  %v197_v38 = vrot.slane %v1599_v10, 2  ;;  %v273_v39 = vrot.slane %v1571_v1, 3  ;;  %vm520_vm4 = vcmask 1041408   ;;  %v526_v40 = vrot.slane %v1587_v5, 6 }
   0xa   :  { %1332 = vmatpush3.bf16.msra.mxu0 %v137_v24  ;;  %1333 = vmatprep.mubr.msk.bf16.mxu0 %vm70_vm2, %v39_v21  ;;  %v274_v41 = vrot.slane %v1576_v2, 3  ;;  %v276_v42 = vrot.slane %v1581_v3, 3  ;;  %v527_v43 = vrot.slane %v1594_v9, 6  ;;  %v529_v44 = vrot.slane %v1599_v10, 6 }
   0xb   :  { %1465 = vmatprep.subr.msk.bf16.mxu0 %vm77_vm0, %v209_v25  ;;  %vm272_vm5 = vcmask 1044480   ;;  %v196_v47 = vsel %vm188_vm3, %v194_v36, %v195_v37  ;;  %v198_v48 = vsel %vm188_vm3, %v195_v37, %v197_v38  ;;  %v301_v54 = vsel %vm77_vm0, %v293_v35, 0  ;;  %v1475_v23 = vld [vmem:[%s1817_s1 + $0x4] ss:$0 sps:$4 sm:$0x44]  }
   0xc   :  { %v1648_v45 = vsel %vm520_vm4, %v526_v40, %v527_v43  ;;  %v1651_v46 = vsel %vm520_vm4, %v527_v43, %v529_v44  ;;  %v275_v50 = vsel %vm272_vm5, %v273_v39, %v274_v41  ;;  %v277_v51 = vsel %vm272_vm5, %v274_v41, %v276_v42  ;;  %v1478_v38 = vld [vmem:[%s1819_s3] sm:$0xff]  }
   0xd   :  { %v536_v49 = vpack.c.bf16 %v1651_v46, %v1648_v45  ;;  %v204_v52 = vpack.c.bf16 %v198_v48, %v196_v47  ;;  %v287_v53 = vpack.c.bf16 %v277_v51, %v275_v50  ;;  %v278_v56 = vrot.slane %v1587_v5, 3  ;;  %v1244_v39 = vld [vmem:[%s1820_s2] ss:$0 sm:$0xff] }
   0xe   :  { %v279_v57 = vrot.slane %v1594_v9, 3  ;;  %v281_v58 = vrot.slane %v1599_v10, 3  ;;  %v357_v59 = vrot.slane %v1571_v1, 4  ;;  %v358_v60 = vrot.slane %v1576_v2, 4 }
   0xf   :  { %v360_v61 = vrot.slane %v1581_v3, 4  ;;  %vm356_vm6 = vcmask 1043456   ;;  %v381_v11 = vsel %vm77_vm0, %v373_v55, 0  ;;  %v457_v12 = vrot.slane %v1474_v6, 1 }
  0x10   :  { %v280_v62 = vsel %vm272_vm5, %v278_v56, %v279_v57  ;;  %v282_v63 = vsel %vm272_vm5, %v279_v57, %v281_v58  ;;  %v359_v0 = vsel %vm356_vm6, %v357_v59, %v358_v60  ;;  %v362_v13 = vrot.slane %v1587_v5, 4 }
  0x11   :  { %v361_v4 = vsel %vm356_vm6, %v358_v60, %v360_v61  ;;  %v288_v7 = vpack.c.bf16 %v282_v63, %v280_v62  ;;  %v363_v14 = vrot.slane %v1594_v9, 4  ;;  %v365_v15 = vrot.slane %v1599_v10, 4  ;;  %v1479_v63 = vld [vmem:[%s1819_s3 + $0x8] sm:$0xff]  }
  0x12   :  { %v371_v8 = vpack.c.bf16 %v361_v4, %v359_v0  ;;  %v437_v16 = vrot.slane %v1571_v1, 5  ;;  %v438_v17 = vrot.slane %v1576_v2, 5  ;;  %v440_v18 = vrot.slane %v1581_v3, 5  ;;  %v1480_v4 = vld [vmem:[%s1819_s3 + $0x20] sm:$0xff]  }
  0x13   :  { %vm436_vm7 = vcmask 1042432   ;;  %v364_v19 = vsel %vm356_vm6, %v362_v13, %v363_v14  ;;  %v366_v20 = vsel %vm356_vm6, %v363_v14, %v365_v15  ;;  %v465_v26 = vsel %vm77_vm0, %v457_v12, 0  ;;  %v1482_v15 = vld [vmem:[%s1821_s5 + $0x10] sm:$0xff]  }
  0x14   :  { %v439_v21 = vsel %vm436_vm7, %v437_v16, %v438_v17  ;;  %v441_v22 = vsel %vm436_vm7, %v438_v17, %v440_v18  ;;  %v372_v24 = vpack.c.bf16 %v366_v20, %v364_v19  ;;  %v541_v27 = vrot.slane %v1475_v23, 2  ;;  %v1483_v16 = vld [vmem:[%s1821_s5 + $0x18] sm:$0xff]   ;;  %v1484_v17 = vld [vmem:[%s1821_s5] sm:$0xff]  }
  0x15   :  { %1334 = vmatmul.mubr.msk.bf16.vlgmr.msra.gmra.mrb[0].mxu0 %vm70_vm2, %v40_v32  ;;  %v451_v25 = vpack.c.bf16 %v441_v22, %v439_v21  ;;  %v442_v28 = vrot.slane %v1587_v5, 5  ;;  %v443_v29 = vrot.slane %v1594_v9, 5  ;;  %v445_v30 = vrot.slane %v1599_v10, 5  ;;  %v1257_v18 = vld [vmem:[%s1822_s4] ss:$0 sm:$0xff] }
  0x16   :  { %1338 = vmatpush3.bf16.msra.mxu0 %v217_v34  ;;  %1339 = vmatprep.mubr.msk.bf16.mxu0 %vm70_vm2, %v203_v33  ;;  %v521_v31 = vrot.slane %v1571_v1, 6  ;;  %v522_v32 = vrot.slane %v1576_v2, 6  ;;  %v524_v33 = vrot.slane %v1581_v3, 6  ;;  %v549_v10 = vsel %vm77_vm0, %v541_v27, 0  ;;  %v1476_v2 = vld [vmem:[%s1819_s3 + $0x10] sm:$0xff]   ;;  %v1477_v3 = vld [vmem:[%s1819_s3 + $0x18] sm:$0xff]  }
  0x17   :  { %1466 = vmatprep.subr.msk.bf16.mxu0 %vm77_vm0, %v293_v35  ;;  %v444_v34 = vsel %vm436_vm7, %v442_v28, %v443_v29  ;;  %v446_v35 = vsel %vm436_vm7, %v443_v29, %v445_v30  ;;  %vm620_vm8 = vcmask 253952   ;;  %v1514_v1 = vmov 0.0   ;;  %1367 = vmatprep.subr.bf16.mxu1 %v1476_v2 }
  0x18   :  { %v523_v36 = vsel %vm520_vm4, %v521_v31, %v522_v32  ;;  %v525_v5 = vsel %vm520_vm4, %v522_v32, %v524_v33  ;;  %v452_v37 = vpack.c.bf16 %v446_v35, %v444_v34  ;;  %621 = vst.msk [vmem:[#allocation2] sm:$0x1] %vm620_vm8, %v1514_v1  ;;  %622 = vst.msk [vmem:[#allocation2 + $0x18] sm:$0x1] %vm620_vm8, %v1514_v1  ;;  %1368 = vmatpush3.bf16.msra.mxu1 %v1476_v2  ;;  %vm625_vm9 = vcmask 261120  }
  0x19   :  { %v535_v9 = vpack.c.bf16 %v525_v5, %v523_v36  ;;  %623 = vst.msk [vmem:[#allocation2 + $0x11] sm:$0x1] %vm620_vm8, %v1514_v1  ;;  %624 = vst.msk [vmem:[#allocation2 + $0x29] sm:$0x1] %vm620_vm8, %v1514_v1  ;;  %1369 = vmatprep.subr.bf16.mxu1 %v1477_v3 }
  0x1c   :  { %1370 = vmatpush3.bf16.msra.mxu1 %v1477_v3 }
  0x1d   :  { %1375 = vmatprep.subr.bf16.mxu1 %v1478_v38 }
  0x21   :  { %1340 = vmatmul.mubr.msk.bf16.vlgmr.msra.gmra.mrb[0].mxu0 %vm70_vm2, %v204_v52 }
  0x22   :  { %1344 = vmatpush3.bf16.msra.mxu0 %v301_v54  ;;  %1345 = vmatprep.mubr.msk.bf16.mxu0 %vm70_vm2, %v287_v53 }
  0x23   :  { %1467 = vmatprep.subr.msk.bf16.mxu0 %vm77_vm0, %v373_v55 }
  0x2d   :  { %1346 = vmatmul.mubr.msk.bf16.vlgmr.msra.gmra.mrb[0].mxu0 %vm70_vm2, %v288_v7 }
  0x2e   :  { %1350 = vmatpush3.bf16.msra.mxu0 %v381_v11  ;;  %1351 = vmatprep.mubr.msk.bf16.mxu0 %vm70_vm2, %v371_v8  ;;  %v1481_v11 = vld [vmem:[%s1819_s3 + $0x28] sm:$0xff]  }
  0x2f   :  { %1468 = vmatprep.subr.msk.bf16.mxu0 %vm77_vm0, %v457_v12 }
  0x39   :  { %1352 = vmatmul.mubr.msk.bf16.vlgmr.msra.gmra.mrb[0].mxu0 %vm70_vm2, %v372_v24 }
  0x3a   :  { %1356 = vmatpush3.bf16.msra.mxu0 %v465_v26  ;;  %1357 = vmatprep.mubr.msk.bf16.mxu0 %vm70_vm2, %v451_v25 }
  0x3b   :  { %1469 = vmatprep.subr.msk.bf16.mxu0 %vm77_vm0, %v541_v27 }
  0x45   :  { %1358 = vmatmul.mubr.msk.bf16.vlgmr.msra.gmra.mrb[0].mxu0 %vm70_vm2, %v452_v37 }
  0x46   :  { %1362 = vmatpush3.bf16.msra.mxu0 %v549_v10  ;;  %1363 = vmatprep.mubr.msk.bf16.mxu0 %vm70_vm2, %v535_v9  ;;  %v1485_v9 = vld [vmem:[%s1821_s5 + $0x8] sm:$0xff]  }
  0x51   :  { %1364 = vmatmul.mubr.msk.bf16.vlgmr.msra.gmra.mrb[0].mxu0 %vm70_vm2, %v536_v49 }
 0x124   :  { %v1365_v40 = vpop.f32.mrb[0].mxu0 }
 0x125   :  { %v613_v41 = vadd.f32 %v1365_v40, %v1244_v39  ;;  %v585_v42 = vpop.f32.mrb[1].mxu0 }
 0x126   :  { %v611_v43 = vadd.f32 %v1244_v39, %v585_v42  ;;  %v1366_v44 = vpop.f32.mrb[2].mxu0 }
 0x127   :  { %1490 = vtanh.f32 %v613_v41  ;;  %v614_v45 = vadd.f32 %v1366_v44, %v1244_v39  ;;  %v588_v46 = vpop.f32.mrb[3].mxu0  ;;  %v1487_v41 = vld [vmem:[%s1821_s5 + $0x28] sm:$0xff]  }
 0x128   :  { %1492 = vtanh.f32 %v611_v43  ;;  %v612_v47 = vadd.f32 %v1244_v39, %v588_v46  ;;  %v1488_v46 = vld [vmem:[%s1823_s7] sm:$0xff]  }
 0x129   :  { %1494 = vtanh.f32 %v614_v45 }
 0x12a   :  { %1496 = vtanh.f32 %v612_v47  ;;  %v1489_v47 = vld [vmem:[%s1823_s7 + $0x8] sm:$0xff]  }
 0x131   :  { %v1491_v48 = vpop.eup %1490 }
 0x132   :  { %v1493_v49 = vpop.eup %1492  ;;  %628 = vst.msk [vmem:[#allocation2 + $0x19] sm:$0xff] %vm625_vm9, %v1491_v48  ;;  %v1270_v48 = vld [vmem:[%s1824_s6] ss:$0 sm:$0xff] }
 0x133   :  { %v1495_v50 = vpop.eup %1494  ;;  %626 = vst.msk [vmem:[#allocation2 + $0x1] sm:$0xff] %vm625_vm9, %v1493_v49 }
 0x134   :  { %v1497_v51 = vpop.eup %1496  ;;  %629 = vst.msk [vmem:[#allocation2 + $0x21] sm:$0xff] %vm625_vm9, %v1495_v50 }
 0x135   :  { %627 = vst.msk [vmem:[#allocation2 + $0x9] sm:$0xff] %vm625_vm9, %v1497_v51 }
 0x139   :  { %v632_v52 = vld [vmem:[#allocation2 + $0x18] sm:$0xff] }
 0x13a   :  { %v630_v53 = vld [vmem:[#allocation2] sm:$0xff]  ;;  %881 = vst.msk [vmem:[#allocation2 + $0x18] sm:$0x1] %vm620_vm8, %v1514_v1 }
 0x13b   :  { %v643_v54 = vld [vmem:[#allocation2 + $0x21] sm:$0xff]  ;;  %880 = vst.msk [vmem:[#allocation2] sm:$0x1] %vm620_vm8, %v1514_v1  ;;  %v642_v59 = vld [vmem:[#allocation2 + $0x19] sm:$0xff] }
 0x13c   :  { %v640_v55 = vld [vmem:[#allocation2 + $0x1] sm:$0xff]  ;;  %v641_v56 = vld [vmem:[#allocation2 + $0x9] sm:$0xff]  ;;  %v645_v62 = vpack.c.bf16 %v643_v54, %v642_v59 }
 0x13d   :  { %v631_v57 = vld [vmem:[#allocation2 + $0x8] sm:$0xff]  ;;  %v644_v58 = vpack.c.bf16 %v641_v56, %v640_v55  ;;  %v633_v6 = vld [vmem:[#allocation2 + $0x20] sm:$0xff] }
 0x13e   :  { %v785_v60 = vld [vmem:[#allocation2 + $0xa] sm:$0xff]  ;;  %v787_v61 = vld [vmem:[#allocation2 + $0x22] sm:$0xff]  ;;  %v634_v0 = vpack.c.bf16 %v631_v57, %v630_v53  ;;  %v635_v8 = vpack.c.bf16 %v633_v6, %v632_v52  ;;  %v786_v13 = vld [vmem:[#allocation2 + $0x1a] sm:$0xff] }
 0x13f   :  { %882 = vst.msk [vmem:[#allocation2 + $0x11] sm:$0x1] %vm620_vm8, %v1514_v1  ;;  %883 = vst.msk [vmem:[#allocation2 + $0x29] sm:$0x1] %vm620_vm8, %v1514_v1  ;;  %1371 = vmatprep.mubr.msk.bf16.mxu1 %vm625_vm9, %v644_v58  ;;  %v784_v7 = vld [vmem:[#allocation2 + $0x2] sm:$0xff]  ;;  %v789_v14 = vpack.c.bf16 %v787_v61, %v786_v13 }
 0x140   :  { %1372 = vmatmul.mubr.msk.bf16.vlgmr.msra.gmra.mrb[0].mxu1 %vm625_vm9, %v645_v62  ;;  %v788_v12 = vpack.c.bf16 %v785_v60, %v784_v7  ;;  %v1486_v1 = vld [vmem:[%s1821_s5 + $0x20] sm:$0xff]  }
 0x141   :  { %1376 = vmatpush3.bf16.msra.mxu1 %v1478_v38  ;;  %1379 = vmatprep.mubr.msk.bf16.mxu1 %vm625_vm9, %v634_v0 }
 0x142   :  { %1377 = vmatprep.subr.bf16.mxu1 %v1479_v63 }
 0x145   :  { %1378 = vmatpush3.bf16.msra.mxu1 %v1479_v63  ;;  %v1271_v63 = vld [vmem:[%s1825_s8] ss:$0 sm:$0xff] }
 0x146   :  { %1383 = vmatprep.subr.bf16.mxu1 %v1480_v4 }
 0x14c   :  { %1380 = vmatmul.mubr.msk.bf16.vlgmr.msra.gmra.mrb[0].mxu1 %vm625_vm9, %v635_v8 }
 0x14d   :  { %1384 = vmatpush3.bf16.msra.mxu1 %v1480_v4  ;;  %1387 = vmatprep.mubr.msk.bf16.mxu1 %vm625_vm9, %v788_v12 }
 0x14e   :  { %1385 = vmatprep.subr.bf16.mxu1 %v1481_v11 }
 0x151   :  { %1386 = vmatpush3.bf16.msra.mxu1 %v1481_v11 }
 0x152   :  { %1391 = vmatprep.subr.bf16.mxu1 %v1482_v15 }
 0x158   :  { %1388 = vmatmul.mubr.msk.bf16.vlgmr.msra.gmra.mrb[0].mxu1 %vm625_vm9, %v789_v14 }
 0x159   :  { %1392 = vmatpush3.bf16.msra.mxu1 %v1482_v15 }
 0x15a   :  { %1393 = vmatprep.subr.bf16.mxu1 %v1483_v16 }
 0x15d   :  { %1394 = vmatpush3.bf16.msra.mxu1 %v1483_v16 }
 0x15e   :  { %1399 = vmatprep.subr.bf16.mxu1 %v1484_v17 }
 0x22b   :  { %v1389_v19 = vpop.f32.mrb[0].mxu1 }
 0x22c   :  { %v873_v20 = vadd.f32 %v1389_v19, %v1257_v18  ;;  %v846_v21 = vpop.f32.mrb[1].mxu1 }
 0x22d   :  { %v871_v22 = vadd.f32 %v1257_v18, %v846_v21  ;;  %v1390_v23 = vpop.f32.mrb[2].mxu1 }
 0x22e   :  { %1498 = vtanh.f32 %v873_v20  ;;  %v874_v24 = vadd.f32 %v1390_v23, %v1257_v18  ;;  %v849_v25 = vpop.f32.mrb[3].mxu1 }
 0x22f   :  { %1500 = vtanh.f32 %v871_v22  ;;  %v872_v26 = vadd.f32 %v1257_v18, %v849_v25 }
 0x230   :  { %1502 = vtanh.f32 %v874_v24 }
 0x231   :  { %1504 = vtanh.f32 %v872_v26 }
 0x238   :  { %v1499_v27 = vpop.eup %1498 }
 0x239   :  { %v1501_v28 = vpop.eup %1500  ;;  %886 = vst.msk [vmem:[#allocation2 + $0x19] sm:$0xff] %vm625_vm9, %v1499_v27 }
 0x23a   :  { %v1503_v29 = vpop.eup %1502  ;;  %884 = vst.msk [vmem:[#allocation2 + $0x1] sm:$0xff] %vm625_vm9, %v1501_v28 }
 0x23b   :  { %v1505_v30 = vpop.eup %1504  ;;  %887 = vst.msk [vmem:[#allocation2 + $0x21] sm:$0xff] %vm625_vm9, %v1503_v29 }
 0x23c   :  { %885 = vst.msk [vmem:[#allocation2 + $0x9] sm:$0xff] %vm625_vm9, %v1505_v30 }
 0x240   :  { %v900_v36 = vld [vmem:[#allocation2 + $0x19] sm:$0xff] }
 0x241   :  { %v898_v32 = vld [vmem:[#allocation2 + $0x1] sm:$0xff]  ;;  %v890_v39 = vld [vmem:[#allocation2 + $0x18] sm:$0xff] }
 0x242   :  { %v901_v31 = vld [vmem:[#allocation2 + $0x21] sm:$0xff] }
 0x243   :  { %v899_v33 = vld [vmem:[#allocation2 + $0x9] sm:$0xff]  ;;  %v903_v5 = vpack.c.bf16 %v901_v31, %v900_v36  ;;  %v888_v37 = vld [vmem:[#allocation2] sm:$0xff] }
 0x244   :  { %v889_v34 = vld [vmem:[#allocation2 + $0x8] sm:$0xff]  ;;  %v902_v35 = vpack.c.bf16 %v899_v33, %v898_v32  ;;  %v891_v2 = vld [vmem:[#allocation2 + $0x20] sm:$0xff] }
 0x245   :  { %v892_v10 = vpack.c.bf16 %v889_v34, %v888_v37  ;;  %v1042_v3 = vld [vmem:[#allocation2 + $0x2] sm:$0xff]  ;;  %v1043_v38 = vld [vmem:[#allocation2 + $0xa] sm:$0xff]  ;;  %v893_v40 = vpack.c.bf16 %v891_v2, %v890_v39  ;;  %v1044_v43 = vld [vmem:[#allocation2 + $0x1a] sm:$0xff] }
 0x246   :  { %1395 = vmatprep.mubr.msk.bf16.mxu1 %vm625_vm9, %v902_v35  ;;  %v1046_v42 = vpack.c.bf16 %v1043_v38, %v1042_v3  ;;  %v1045_v44 = vld [vmem:[#allocation2 + $0x22] sm:$0xff] }
 0x247   :  { %1396 = vmatmul.mubr.msk.bf16.vlgmr.msra.gmra.mrb[4].mxu1 %vm625_vm9, %v903_v5  ;;  %v1047_v45 = vpack.c.bf16 %v1045_v44, %v1044_v43 }
 0x248   :  { %1400 = vmatpush3.bf16.msra.mxu1 %v1484_v17  ;;  %1403 = vmatprep.mubr.msk.bf16.mxu1 %vm625_vm9, %v892_v10 }
 0x249   :  { %1401 = vmatprep.subr.bf16.mxu1 %v1485_v9 }
 0x24c   :  { %1402 = vmatpush3.bf16.msra.mxu1 %v1485_v9 }
 0x24d   :  { %1407 = vmatprep.subr.bf16.mxu1 %v1486_v1 }
 0x253   :  { %1404 = vmatmul.mubr.msk.bf16.vlgmr.msra.gmra.mrb[4].mxu1 %vm625_vm9, %v893_v40 }
 0x254   :  { %1408 = vmatpush3.bf16.msra.mxu1 %v1486_v1  ;;  %1411 = vmatprep.mubr.msk.bf16.mxu1 %vm625_vm9, %v1046_v42 }
 0x255   :  { %1409 = vmatprep.subr.bf16.mxu1 %v1487_v41 }
 0x258   :  { %1410 = vmatpush3.bf16.msra.mxu1 %v1487_v41 }
 0x259   :  { %1415 = vmatprep.subr.bf16.mxu1 %v1488_v46 }
 0x25f   :  { %1412 = vmatmul.mubr.msk.bf16.vlgmr.msra.gmra.mrb[4].mxu1 %vm625_vm9, %v1047_v45 }
 0x260   :  { %1416 = vmatpush3.bf16.msra.mxu1 %v1488_v46 }
 0x261   :  { %1417 = vmatprep.subr.bf16.mxu1 %v1489_v47 }
 0x264   :  { %1418 = vmatpush3.bf16.msra.mxu1 %v1489_v47 }
 0x332   :  { %v1413_v49 = vpop.f32.mrb[4].mxu1 }
 0x333   :  { %v1131_v50 = vadd.f32 %v1413_v49, %v1270_v48  ;;  %v1104_v51 = vpop.f32.mrb[5].mxu1 }
 0x334   :  { %v1129_v52 = vadd.f32 %v1270_v48, %v1104_v51  ;;  %v1414_v53 = vpop.f32.mrb[6].mxu1 }
 0x335   :  { %1506 = vtanh.f32 %v1131_v50  ;;  %v1132_v54 = vadd.f32 %v1414_v53, %v1270_v48  ;;  %v1107_v55 = vpop.f32.mrb[7].mxu1 }
 0x336   :  { %1508 = vtanh.f32 %v1129_v52  ;;  %v1130_v56 = vadd.f32 %v1270_v48, %v1107_v55 }
 0x337   :  { %1510 = vtanh.f32 %v1132_v54 }
 0x338   :  { %1512 = vtanh.f32 %v1130_v56 }
 0x33f   :  { %v1507_v57 = vpop.eup %1506 }
 0x340   :  { %v1509_v58 = vpop.eup %1508 }
 0x341   :  { %v1511_v59 = vpop.eup %1510 }
 0x342   :  { %v1513_v60 = vpop.eup %1512  ;;  %v1139_v61 = vpack.c.bf16 %v1511_v59, %v1507_v57 }
 0x343   :  { %v1138_v62 = vpack.c.bf16 %v1513_v60, %v1509_v58 }
 0x345   :  { %1419 = vmatprep.mubr.msk.bf16.mxu1 %vm625_vm9, %v1138_v62 }
 0x346   :  { %1420 = vmatmul.mubr.msk.bf16.vlgmr.msra.gmra.mrb[8].mxu1 %vm625_vm9, %v1139_v61 }
 0x419   :  { %v1421_v0 = vpop.f32.mrb[8].mxu1 }
 0x41a   :  { %v1211_v4 = vadd.f32 %v1421_v0, %v1271_v63  ;;  %v1202_v6 = vpop.f32.mrb[9].mxu1 }
 0x41b   :  { %v1203_v7 = vadd.f32 %v1271_v63, %v1202_v6  ;;  %v1422_v8 = vpop.f32.mrb[10].mxu1 }
 0x41c   :  { %1219 = vst.msk [vmem:[%s1826_s9 + $0x10] sm:$0xff] %vm625_vm9, %v1211_v4  ;;  %v1214_v11 = vadd.f32 %v1422_v8, %v1271_v63  ;;  %v1205_v12 = vpop.f32.mrb[11].mxu1 }
 0x41d   :  { %1217 = vst.msk [vmem:[%s1826_s9] sm:$0xff] %vm625_vm9, %v1203_v7  ;;  %v1206_v13 = vadd.f32 %v1271_v63, %v1205_v12 }
 0x41e   :  { %1220 = vst.msk [vmem:[%s1826_s9 + $0x18] sm:$0xff] %vm625_vm9, %v1214_v11 }
 0x41f   :  { %1218 = vst.msk [vmem:[%s1826_s9 + $0x8] sm:$0xff] %vm625_vm9, %v1206_v13 }

// kernel: forward.4
= control target key start
LH: loop header
LB: loop body
LE: loop exit
PB: predicated region body
PF: predicated region fallthrough
CT: control target
= control target key end

     0   :  { %s3250_s0 = inlined_call_operand.vmem [shape: s32[2], index: 0, kind: input, shape index: {}]   ;;  %s3251_s1 = inlined_call_operand.vmem [shape: f32[2,16,32], index: 1, kind: input, shape index: {}]   ;;  %s3252_s2 = inlined_call_operand.vmem [shape: f32[16,32], index: 2, kind: input, shape index: {}]   ;;  %s3253_s3 = inlined_call_operand.vmem [shape: bf16[2,32,96], index: 3, kind: input, shape index: {}]   ;;  %s3254_s4 = inlined_call_operand.vmem [shape: f32[2,1,96], index: 4, kind: input, shape index: {}]   ;;  %s3255_s5 = inlined_call_operand.vmem [shape: bf16[2,32,32], index: 5, kind: input, shape index: {}]   ;;  %s3256_s6 = inlined_call_operand.vmem [shape: f32[2,1,32], index: 6, kind: input, shape index: {}]   ;;  %s3257_s7 = inlined_call_operand.vmem [shape: f32[2,1,32], index: 7, kind: input, shape index: {}]   ;;  %s3258_s8 = inlined_call_operand.vmem [shape: f32[2,1,32], index: 8, kind: input, shape index: {}]   ;;  %s3259_s9 = inlined_call_operand.vmem [shape: bf16[2,96,64], index: 9, kind: input, shape index: {}]   ;;  %s3260_s10 = inlined_call_operand.vmem [shape: f32[2,1,64], index: 10, kind: input, shape index: {}]   ;;  %s3261_s11 = inlined_call_operand.vmem [shape: bf16[2,192,32], index: 11, kind: input, shape index: {}]   ;;  %s3262_s12 = inlined_call_operand.vmem [shape: f32[2,1,32], index: 12, kind: input, shape index: {}]   ;;  %s3263_s13 = inlined_call_operand.vmem [shape: f32[2,1,32], index: 13, kind: input, shape index: {}]   ;;  %s3264_s14 = inlined_call_operand.vmem [shape: f32[2,1,32], index: 14, kind: input, shape index: {}]   ;;  %s3265_s15 = inlined_call_operand.vmem [shape: f32[2,16,32], index: 15, kind: output, shape index: {}]  }
   0x1   :  { %3271 = sst [smem:[#allocation12_spill]] %s3251_s1  ;;  %s20_s20 = sshll.u32 %s3250_s0, 4  ;;  %s21_s20 = int_to_ptr.vmem [resolvable:$true] %s20_s20 }
   0x2   :  { %3272 = sst [smem:[#allocation13_spill]] %s3252_s2  ;;  %s2739_s21 = scalar_lea.vmem %s21_s20, 16 }
   0x3   :  { %3273 = sst [smem:[#allocation14_spill]] %s3253_s3  ;;  %p2740_p0 = scmp.ne.s32.totalorder %s21_s20, %s2739_s21 }
   0x4   :  { %3274 = sst [smem:[#allocation15_spill]] %s3265_s15  ;;  %p2744_p1 = scmp.lt.s32.totalorder %s21_s20, %s21_s20 }
   0x5   :  { %p2745_p2 = scmp.lt.s32.totalorder %s2739_s21, %s2739_s21 }
   0x7   :  { %p2746_p3 = por %p2745_p2, %p2744_p1 }
   0x9   :  { %p2747_p4 = pnand %p2746_p3, %p2740_p0 }
   0xb   :  { %2750 = shalt.err (!%p2747_p4)  }
   0xc   :  { %s2777_s22 = smov [#allocation7]  }
   0xd   :  { %23 = dma.vmem_to_smem %s21_s20, 16, %s2777_s22, [#allocation6] }
   0xe   :  { %2763 = dma.done.wait [#allocation6], 16 }
   0xf   :  { %2764 = vsyncadd [#allocation6], 4294967280 }
  0x10   :  { %25 = sfence }
  0x11   :  { %s2870_s23 = smov 0   ;;  %s2872_s24 = smov 0  }
  0x12   :  { %s2874_s25 = smov 0  }
  0x13 LB: > { %3275 = sst [smem:[#allocation9_spill]] %s2771_s24  ;;  %s40_s0 = sadd.s32 1, %s2771_s24  ;;  %s2775_s25 = sphi %s2874_s25, %s31_s25   ;;  %s2771_s24 = sphi %s2872_s24, %s3290_s24   ;;  %s2767_s23 = sphi %s2870_s23, %s3289_s23  }
  0x14   : > { %3276 = sst [smem:[#allocation10_spill]] %s2775_s25  ;;  %p2365_p5 = scmp.ge.s32.totalorder %s2775_s25, 1 }
  0x15   : > { %p41_p6 = scmp.ge.s32.totalorder %s40_s0, 2  ;;  %p537_p7 = scmp.lt.s32.totalorder %s2775_s25, 3 }
  0x17   : > { %s3292_s0 = smov (%p41_p6, %s40_s0), 0  ;;  %p538_p8 = pnand %p2365_p5, %p537_p7 }
  0x18   : > { %3277 = sst [smem:[#allocation11_spill]] %s3292_s0  ;;  %p636_p9 = scmp.lt.s32.totalorder (!%p538_p8), %s2767_s23, 1  ;;  %v692_v0 = vlaneseq (!%p538_p8)  ;;  %v2778_v5 = vmov (!%p538_p8), 0.0  }
  0x19   : > { %541 = sbr.rel (%p538_p8) target bundleno = 2679 (0xa77), region = 76  ;;  %s689_s26 = sld [smem:[#allocation7]] (!%p538_p8) }
  0x1a   : > { %s2372_s27 = sld [smem:[#allocation7 + $0x1]] (!%p538_p8)  ;;  %v693_v1 = vshrl.u32 (!%p538_p8), %v692_v0, 7  ;;  %s3278_s3 = sld [smem:[#allocation14_spill]] (!%p538_p8) }
  0x1b   : > { %p2377_p10 = scmp.ne.s32.totalorder (!%p538_p8), %s2767_s23, 0 }
  0x1c   : > { %v694_v2 = vadd.s32 (!%p538_p8), 8, %v693_v1 }
  0x1f   : > { %v2918_v3 = vstv (!%p538_p8), %s689_s26 }
  0x20   : > { %s2892_s28 = scalar_select %p636_p9, %s2767_s23, 1  ;;  %v2925_v4 = vstv %s2372_s27  ;;  %vm697_vm0 = vcmp.lt.s32.totalorder %v693_v1, %v2918_v3  ;;  %vm698_vm1 = vcmp.lt.s32.totalorder %v694_v2, %v2918_v3 }
  0x21   : > { %vm699_vm2 = vcmp.lt.s32.totalorder %v693_v1, %v2925_v4  ;;  %vm700_vm3 = vcmp.lt.s32.totalorder %v694_v2, %v2925_v4  ;;  %v2937_v6 = vsel %vm697_vm0, 1.0, %v2778_v5  ;;  %v2940_v7 = vsel %vm698_vm1, 1.0, %v2778_v5  ;;  %712 = sbr.rel (%p2377_p10) target bundleno = 51 (0x33), region = 80  ;;  %s3279_s30 = sld [smem:[#allocation12_spill]] (!%p2377_p10) }
  0x22   : > { %s2437_s29 = sshll.u32 %s2892_s28, 4  ;;  %s2633_s17 = smul.u32 48, %s2892_s28  ;;  %v2952_v8 = vsel %vm699_vm2, 1.0, %v2778_v5  ;;  %v2955_v9 = vsel %vm700_vm3, 1.0, %v2778_v5  ;;  %vm727_vm4 = vcmask (!%p2377_p10), 261120  }
  0x23   : > { %s2903_s20 = scalar_lea.vmem %s3278_s3, %s2437_s29  ;;  %s2908_s0 = scalar_lea.vmem %s3255_s5, %s2437_s29 }
  0x24   : > { %s2634_s2 = smul.u32 96, %s2892_s28  ;;  %s2945_s29 = scalar_lea.vmem %s3259_s9, %s2633_s17 }
  0x25   : > { %s676_s17 = scalar_lea.vmem %s3263_s13, %s2892_s28  ;;  %s679_s21 = scalar_lea.vmem %s3264_s14, %s2892_s28 }
  0x26   : > { %s2960_s25 = scalar_lea.vmem %s3261_s11, %s2634_s2  ;;  %s3280_s18 = sld [smem:[#allocation13_spill]] (!%p2377_p10) }
  0x27   : > { %v713_v10 = vld [vmem:[%s3279_s30] sm:$0xff] (!%p2377_p10)  ;;  %v714_v12 = vld [vmem:[%s3279_s30 + $0x8] sm:$0xff] (!%p2377_p10)  ;;  %v715_v15 = vld [vmem:[%s3279_s30 + $0x10] sm:$0xff] (!%p2377_p10) }
  0x28   : > { %v716_v17 = vld [vmem:[%s3279_s30 + $0x18] sm:$0xff] }
  0x2c   : > { %v717_v11 = vld [vmem:[%s3280_s18] sm:$0xff]  ;;  %v718_v14 = vld [vmem:[%s3280_s18 + $0x8] sm:$0xff] }
  0x2d   : > { %v719_v13 = vmul.f32 %v2937_v6, %v717_v11  ;;  %v721_v16 = vmul.f32 %v2952_v8, %v717_v11  ;;  %v720_v18 = vmul.f32 %v2940_v7, %v718_v14  ;;  %v722_v19 = vmul.f32 %v2955_v9, %v718_v14 }
  0x2f   : > { %v723_v20 = vadd.f32 %v719_v13, %v713_v10  ;;  %v725_v21 = vadd.f32 %v721_v16, %v715_v15  ;;  %v724_v22 = vadd.f32 %v720_v18, %v714_v12  ;;  %v726_v23 = vadd.f32 %v722_v19, %v716_v17 }
  0x31   : > { %728 = vst.msk [vmem:[#allocation2] sm:$0xff] %vm727_vm4, %v723_v20  ;;  %730 = vst.msk [vmem:[#allocation2 + $0x10] sm:$0xff] %vm727_vm4, %v725_v21 }
  0x32   : > { %729 = vst.msk [vmem:[#allocation2 + $0x8] sm:$0xff] %vm727_vm4, %v724_v22  ;;  %731 = vst.msk [vmem:[#allocation2 + $0x18] sm:$0xff] %vm727_vm4, %v726_v23 }
  0x33 PF: > { %v2669_v24 = vld [vmem:[%s2903_s20] sm:$0xff]   ;;  %2513 = vmatprep.subr.bf16.mxu1 %v2778_v5  ;;  %v2670_v25 = vld [vmem:[%s2903_s20 + $0x8] sm:$0xff]   ;;  %vm761_vm5 = vcmask 261120   ;;  %s3281_s20 = scalar_lea.vmem %s3254_s4, %s2892_s28  ;;  %vm2779_vm6 = vmmov 0   ;;  %s2780_s2 = smov 112   ;;  %vm825_vm7 = vcmask 130048  }
  0x34   : > { %2493 = vmatprep.subr.bf16.mxu0 %v2669_v24  ;;  %v2378_v33 = vld [vmem:[%s3281_s20] ss:$0 sm:$0xff]  ;;  %2515 = vmatprep.mubr.msk.bf16.mxu1 %vm2779_vm6, %v2778_v5  ;;  %s2781_s24 = smov 96   ;;  %s2782_s19 = smov 80   ;;  %v818_v53 = vand.u32 127, %v692_v0  ;;  %vm1082_vm10 = vcmask 261248  }
  0x35   : > { %2494 = vmatpush3.bf16.msra.mxu0 %v2669_v24  ;;  %v2783_v55 = vmov -1e+09   ;;  %s2784_s1 = smov 64   ;;  %s2785_s26 = smov 48   ;;  %vm1518_vm11 = vcmask 253952   ;;  %vm1777_vm12 = vcmask 516096  }
  0x36   : > { %2495 = vmatprep.subr.bf16.mxu0 %v2670_v25  ;;  %vm819_vm8 = vcmp.lt.s32.totalorder %v818_v53, %v2918_v3  ;;  %vm1085_vm9 = vcmp.lt.s32.totalorder %v818_v53, %v2925_v4  ;;  %s2786_s27 = smov 16   ;;  %s3282_s22 = scalar_lea.vmem %s3256_s6, %s2892_s28  ;;  %1519 = vst.msk [vmem:[#allocation4] sm:$0x1] %vm1518_vm11, %v2778_v5  ;;  %1520 = vst.msk [vmem:[#allocation4 + $0x18] sm:$0x1] %vm1518_vm11, %v2778_v5  ;;  %vm1782_vm13 = vcmask 523264  }
  0x37   : > { %v820_v56 = vsel %vm819_vm8, 0.0, %v2783_v55  ;;  %v1086_v18 = vsel %vm1085_vm9, 0.0, %v2783_v55  ;;  %1521 = vst.msk [vmem:[#allocation4 + $0x11] sm:$0x1] %vm1518_vm11, %v2778_v5  ;;  %1522 = vst.msk [vmem:[#allocation4 + $0x29] sm:$0x1] %vm1518_vm11, %v2778_v5  ;;  %s3283_s20 = scalar_lea.vmem %s3257_s7, %s2892_s28  ;;  %s3286_s16 = scalar_lea.vmem %s3262_s12, %s2892_s28 }
  0x38   : > { %v2996_v26 = vld [vmem:[#allocation2] sm:$0xff]  ;;  %v3000_v28 = vld [vmem:[#allocation2 + $0x10] sm:$0xff]  ;;  %1778 = vst.msk [vmem:[#allocation5] sm:$0x1] %vm1777_vm12, %v2778_v5  ;;  %1779 = vst.msk [vmem:[#allocation5 + $0x18] sm:$0x1] %vm1777_vm12, %v2778_v5 }
  0x39   : > { %v2998_v27 = vld [vmem:[#allocation2 + $0x8] sm:$0xff]  ;;  %v3004_v30 = vld [vmem:[#allocation2 + $0x18] sm:$0xff]  ;;  %2496 = vmatpush3.bf16.msra.mxu0 %v2670_v25  ;;  %1780 = vst.msk [vmem:[#allocation5 + $0x11] sm:$0x1] %vm1777_vm12, %v2778_v5  ;;  %1781 = vst.msk [vmem:[#allocation5 + $0x29] sm:$0x1] %vm1777_vm12, %v2778_v5 }
  0x3a   : > { %v736_v29 = vpack.c.bf16 %v2998_v27, %v2996_v26  ;;  %v737_v31 = vpack.c.bf16 %v3004_v30, %v3000_v28  ;;  %2501 = vmatprep.subr.bf16.mxu0 %v2778_v5  ;;  %p2432_p11 = scmp.ne.s32.totalorder %s2767_s23, 1 }
  0x3c   : > { %2497 = vmatprep.mubr.msk.bf16.mxu0 %vm761_vm5, %v736_v29 }
  0x3d   : > { %2498 = vmatmul.mubr.msk.bf16.vlgmr.msra.gmra.mrb[0].mxu0 %vm761_vm5, %v737_v31 }
  0x3e   : > { %2503 = vmatprep.mubr.msk.bf16.mxu0 %vm2779_vm6, %v2778_v5 }
 0x110   : > { %v2499_v32 = vpop.f32.mrb[0].mxu0 }
 0x111   : > { %v802_v34 = vpop.f32.mrb[1].mxu0  ;;  %v811_v36 = vadd.f32 %v2499_v32, %v2378_v33 }
 0x112   : > { %v2500_v35 = vpop.f32.mrb[2].mxu0  ;;  %v803_v39 = vadd.f32 %v2378_v33, %v802_v34 }
 0x113   : > { %v814_v37 = vadd.f32 %v2500_v35, %v2378_v33  ;;  %v805_v38 = vpop.f32.mrb[3].mxu0 }
 0x114   : > { %v806_v40 = vadd.f32 %v2378_v33, %v805_v38 }
 0x115   : > { %v3020_v41 = vpack.c.bf16 %v814_v37, %v811_v36 }
 0x116   : > { %v3022_v42 = vpack.c.bf16 %v806_v40, %v803_v39 }
 0x118   : > { %949 = vrot.lane.b32.xlu1 %v3022_v42, %s2780_s2  ;;  %823 = vrot.lane.b32.xlu0 %v3022_v42, %s2781_s24 }
 0x11c   : > { %1089 = vrot.lane.b32.xlu1 %v3020_v41, %s2781_s24  ;;  %951 = vrot.lane.b32.xlu0 %v3022_v42, %s2782_s19 }
 0x120   : > { %1215 = vrot.lane.b32.xlu1 %v3020_v41, %s2780_s2  ;;  %1217 = vrot.lane.b32.xlu0 %v3020_v41, %s2782_s19  ;;  %s3284_s19 = scalar_lea.vmem %s3258_s8, %s2892_s28 }
 0x18a   : > { %v824_v43 = vpop.permute.xlu0 %823  ;;  %v950_v45 = vpop.permute.xlu1 %949 }
 0x18b   : > { %v830_v44 = vsel %vm825_vm7, %v824_v43, 0 }
 0x18c   : > { %2502 = vmatpush3.bf16.xpose.msra.mxu0 %v830_v44 }
 0x18d   : > { %2507 = vmatprep.subr.bf16.mxu0 %v2778_v5 }
 0x18e   : > { %v952_v46 = vpop.permute.xlu0 %951  ;;  %v1090_v48 = vpop.permute.xlu1 %1089 }
 0x18f   : > { %v957_v47 = vsel %vm825_vm7, %v952_v46, 0  ;;  %v1095_v49 = vsel %vm825_vm7, %v1090_v48, 0 }
 0x190   : > { %2514 = vmatpush3.bf16.xpose.msra.mxu1 %v957_v47 }
 0x191   : > { %2525 = vmatprep.subr.bf16.mxu1 %v2778_v5 }
 0x192   : > { %v1218_v50 = vpop.permute.xlu0 %1217  ;;  %v1216_v52 = vpop.permute.xlu1 %1215 }
 0x193   : > { %2504 = vmatmul.mubr.msk.bf16.vlgmr.msra.gmra.mrb[4].mxu0 %vm825_vm7, %v3022_v42  ;;  %v1223_v51 = vsel %vm825_vm7, %v1218_v50, 0 }
 0x194   : > { %2509 = vmatprep.mubr.msk.bf16.mxu0 %vm2779_vm6, %v2778_v5 }
 0x197   : > { %2516 = vmatmul.mubr.msk.bf16.vlgmr.msra.gmra.mrb[0].mxu1 %vm825_vm7, %v950_v45 }
 0x198   : > { %2526 = vmatpush3.bf16.xpose.msra.mxu1 %v1095_v49  ;;  %2527 = vmatprep.mubr.msk.bf16.mxu1 %vm2779_vm6, %v2778_v5 }
 0x199   : > { %2537 = vmatprep.subr.bf16.mxu1 %v2778_v5 }
 0x19f   : > { %2528 = vmatmul.mubr.msk.bf16.vlgmr.msra.gmra.mrb[4].mxu1 %vm825_vm7, %v3020_v41 }
 0x1a0   : > { %2538 = vmatpush3.bf16.xpose.msra.mxu1 %v1223_v51  ;;  %2539 = vmatprep.mubr.msk.bf16.mxu1 %vm2779_vm6, %v2778_v5 }
 0x1a7   : > { %2540 = vmatmul.mubr.msk.bf16.vlgmr.msra.gmra.mrb[8].mxu1 %vm825_vm7, %v1216_v52 }
 0x266   : > { %v866_v54 = vpop.f32.mrb[4].mxu0 }
 0x267   : > { %v873_v57 = vmul.f32 0.25, %v866_v54  ;;  %v2505_v58 = vpop.f32.mrb[5].mxu0 }
 0x268   : > { %v869_v59 = vpop.f32.mrb[6].mxu0 }
 0x269   : > { %v874_v60 = vmul.f32 0.25, %v869_v59  ;;  %v2506_v61 = vpop.f32.mrb[7].mxu0  ;;  %v875_v62 = vadd.f32 %v873_v57, %v820_v56 }
 0x26a   : > { %v993_v63 = vpop.f32.mrb[0].mxu1 }
 0x26b   : > { %v1000_v1 = vmul.f32 0.25, %v993_v63  ;;  %v2517_v2 = vpop.f32.mrb[1].mxu1  ;;  %v877_v10 = vsel %vm825_vm7, %v875_v62, -inf  ;;  %v876_v11 = vadd.f32 %v874_v60, %v820_v56 }
 0x26c   : > { %878 = vmax.xlane.f32.xlu0 %v877_v10  ;;  %v996_v12 = vpop.f32.mrb[2].mxu1 }
 0x26d   : > { %v1001_v0 = vmul.f32 0.25, %v996_v12  ;;  %v2518_v13 = vpop.f32.mrb[3].mxu1  ;;  %v880_v3 = vsel %vm825_vm7, %v876_v11, -inf  ;;  %v1002_v14 = vadd.f32 %v1000_v1, %v820_v56 }
 0x26e   : > { %881 = vmax.xlane.f32.xlu1 %v880_v3 }
 0x26f   : > { %v1004_v15 = vsel %vm825_vm7, %v1002_v14, -inf  ;;  %v1003_v16 = vadd.f32 %v1001_v0, %v820_v56 }
 0x270   : > { %1005 = vmax.xlane.f32.xlu0 %v1004_v15 }
 0x271   : > { %v1007_v21 = vsel %vm825_vm7, %v1003_v16, -inf }
 0x272   : > { %v1131_v17 = vpop.f32.mrb[4].mxu1 }
 0x273   : > { %v1138_v19 = vmul.f32 0.25, %v1131_v17  ;;  %v2529_v20 = vpop.f32.mrb[5].mxu1 }
 0x274   : > { %1008 = vmax.xlane.f32.xlu0 %v1007_v21  ;;  %v1134_v22 = vpop.f32.mrb[6].mxu1 }
 0x275   : > { %v1139_v23 = vmul.f32 0.25, %v1134_v22  ;;  %v2530_v24 = vpop.f32.mrb[7].mxu1  ;;  %v1140_v25 = vadd.f32 %v1138_v19, %v1086_v18 }
 0x277   : > { %v1142_v29 = vsel %vm825_vm7, %v1140_v25, -inf  ;;  %v1141_v31 = vadd.f32 %v1139_v23, %v1086_v18 }
 0x278   : > { %1143 = vmax.xlane.f32.xlu1 %v1142_v29 }
 0x279   : > { %v1145_v32 = vsel %vm825_vm7, %v1141_v31, -inf }
 0x27a   : > { %1146 = vmax.xlane.f32.xlu0 %v1145_v32  ;;  %v1259_v4 = vpop.f32.mrb[8].mxu1 }
 0x27b   : > { %v1266_v33 = vmul.f32 0.25, %v1259_v4  ;;  %v2541_v34 = vpop.f32.mrb[9].mxu1 }
 0x27c   : > { %v1262_v35 = vpop.f32.mrb[10].mxu1 }
 0x27d   : > { %v1267_v36 = vmul.f32 0.25, %v1262_v35  ;;  %v2542_v37 = vpop.f32.mrb[11].mxu1  ;;  %v1268_v38 = vadd.f32 %v1266_v33, %v1086_v18 }
 0x27f   : > { %v1270_v39 = vsel %vm825_vm7, %v1268_v38, -inf  ;;  %v1269_v40 = vadd.f32 %v1267_v36, %v1086_v18 }
 0x280   : > { %1271 = vmax.xlane.f32.xlu1 %v1270_v39 }
 0x281   : > { %v1273_v43 = vsel %vm825_vm7, %v1269_v40, -inf }
 0x282   : > { %1274 = vmax.xlane.f32.xlu0 %v1273_v43 }
 0x291   : > { %900 = vrot.lane.b32.xlu1 %v3022_v42, %s2784_s1 }
 0x2f9   : > { %v879_v44 = vpop.xlane.xlu0 %878 }
 0x2fa   : > { %v883_v45 = vsub.f32 %v875_v62, %v879_v44 }
 0x2fb   : > { %v882_v46 = vpop.xlane.xlu1 %881 }
 0x2fc   : > { %v885_v47 = vmul.f32 1.442695, %v883_v45  ;;  %v884_v48 = vsub.f32 %v876_v11, %v882_v46 }
 0x2fd   : > { %v1006_v49 = vpop.xlane.xlu0 %1005 }
 0x2fe   : > { %2691 = vpow2.f32 %v885_v47  ;;  %v887_v50 = vmul.f32 1.442695, %v884_v48  ;;  %v1010_v51 = vsub.f32 %v1002_v14, %v1006_v49 }
 0x300   : > { %2693 = vpow2.f32 %v887_v50  ;;  %v1012_v52 = vmul.f32 1.442695, %v1010_v51 }
 0x301   : > { %v1009_v53 = vpop.xlane.xlu0 %1008 }
 0x302   : > { %2695 = vpow2.f32 %v1012_v52  ;;  %v1011_v54 = vsub.f32 %v1003_v16, %v1009_v53 }
 0x304   : > { %v1014_v55 = vmul.f32 1.442695, %v1011_v54 }
 0x305   : > { %v1144_v56 = vpop.xlane.xlu1 %1143 }
 0x306   : > { %2697 = vpow2.f32 %v1014_v55  ;;  %v1148_v57 = vsub.f32 %v1140_v25, %v1144_v56 }
 0x307   : > { %v1147_v58 = vpop.xlane.xlu0 %1146 }
 0x308   : > { %v2692_v59 = vpop.eup %2691  ;;  %v1150_v60 = vmul.f32 1.442695, %v1148_v57  ;;  %v1149_v61 = vsub.f32 %v1141_v31, %v1147_v58 }
 0x309   : > { %v889_v62 = vsel %vm825_vm7, %v2692_v59, 0.0 }
 0x30a   : > { %v2694_v63 = vpop.eup %2693  ;;  %2699 = vpow2.f32 %v1150_v60  ;;  %v1152_v1 = vmul.f32 1.442695, %v1149_v61  ;;  %890 = vadd.xlane.f32.xlu1 %v889_v62 }
 0x30b   : > { %v892_v2 = vsel %vm825_vm7, %v2694_v63, 0.0 }
 0x30c   : > { %v2696_v10 = vpop.eup %2695  ;;  %2701 = vpow2.f32 %v1152_v1  ;;  %893 = vadd.xlane.f32.xlu0 %v892_v2 }
 0x30d   : > { %v1272_v11 = vpop.xlane.xlu1 %1271  ;;  %v1016_v12 = vsel %vm825_vm7, %v2696_v10, 0.0 }
 0x30e   : > { %v1276_v0 = vsub.f32 %v1268_v38, %v1272_v11  ;;  %1017 = vadd.xlane.f32.xlu1 %v1016_v12 }
 0x30f   : > { %v1275_v13 = vpop.xlane.xlu0 %1274 }
 0x310   : > { %v2698_v3 = vpop.eup %2697  ;;  %v1278_v14 = vmul.f32 1.442695, %v1276_v0  ;;  %v1277_v15 = vsub.f32 %v1269_v40, %v1275_v13  ;;  %v2671_v0 = vld [vmem:[%s2908_s0] sm:$0xff]   ;;  %v2672_v13 = vld [vmem:[%s2908_s0 + $0x8] sm:$0xff]  }
 0x311   : > { %v901_v16 = vpop.permute.xlu1 %900  ;;  %v1019_v17 = vsel %vm825_vm7, %v2698_v3, 0.0  ;;  %2549 = vmatprep.subr.bf16.mxu1 %v2671_v0 }
 0x312   : > { %2703 = vpow2.f32 %v1278_v14  ;;  %v1280_v18 = vmul.f32 1.442695, %v1277_v15  ;;  %2508 = vmatpush3.bf16.msra.mxu0 %v901_v16  ;;  %1020 = vadd.xlane.f32.xlu0 %v1019_v17 }
 0x313   : > { %2519 = vmatprep.subr.bf16.mxu0 %v2778_v5  ;;  %2550 = vmatpush3.bf16.msra.mxu1 %v2671_v0  ;;  %v2675_v0 = vld [vmem:[%s2945_s29] sm:$0xff]  }
 0x314   : > { %v2700_v19 = vpop.eup %2699  ;;  %2705 = vpow2.f32 %v1280_v18  ;;  %2551 = vmatprep.subr.bf16.mxu1 %v2672_v13 }
 0x315   : > { %v1154_v20 = vsel %vm825_vm7, %v2700_v19, 0.0 }
 0x316   : > { %v2702_v21 = vpop.eup %2701  ;;  %1155 = vadd.xlane.f32.xlu1 %v1154_v20 }
 0x317   : > { %v1157_v22 = vsel %vm825_vm7, %v2702_v21, 0.0  ;;  %2552 = vmatpush3.bf16.msra.mxu1 %v2672_v13 }
 0x318   : > { %1158 = vadd.xlane.f32.xlu0 %v1157_v22 }
 0x31c   : > { %v2704_v23 = vpop.eup %2703 }
 0x31d   : > { %v1282_v24 = vsel %vm825_vm7, %v2704_v23, 0.0 }
 0x31e   : > { %v2706_v25 = vpop.eup %2705  ;;  %1283 = vadd.xlane.f32.xlu1 %v1282_v24 }
 0x31f   : > { %v1285_v29 = vsel %vm825_vm7, %v2706_v25, 0.0 }
 0x320   : > { %1286 = vadd.xlane.f32.xlu0 %v1285_v29 }
 0x32f   : > { %1165 = vrot.lane.b32.xlu1 %v3020_v41, %s2784_s1 }
 0x333   : > { %1293 = vrot.lane.b32.xlu1 %v3020_v41, %s2785_s26 }
 0x336   : > { %1027 = vrot.lane.b32.xlu0 %v3022_v42, %s2785_s26  ;;  %s3285_s26 = scalar_lea.vmem %s3260_s10, %s2892_s28 }
 0x397   : > { %v891_v31 = vpop.xlane.xlu1 %890 }
 0x398   : > { %2707 = vrcp.f32 %v891_v31 }
 0x399   : > { %v894_v32 = vpop.xlane.xlu0 %893 }
 0x39a   : > { %2709 = vrcp.f32 %v894_v32 }
 0x39b   : > { %v1018_v33 = vpop.xlane.xlu1 %1017 }
 0x39f   : > { %v1021_v4 = vpop.xlane.xlu0 %1020 }
 0x3a0   : > { %2711 = vrcp.f32 %v1021_v4 }
 0x3a1   : > { %2713 = vrcp.f32 %v1018_v33 }
 0x3a2   : > { %v2708_v34 = vpop.eup %2707 }
 0x3a3   : > { %v897_v36 = vmul.f32 %v2708_v34, %v2692_v59  ;;  %v1156_v40 = vpop.xlane.xlu1 %1155  ;;  %v2391_v34 = vld [vmem:[%s3282_s22] ss:$0 sm:$0xff] }
 0x3a4   : > { %v2710_v35 = vpop.eup %2709 }
 0x3a5   : > { %v898_v37 = vmul.f32 %v2710_v35, %v2694_v63  ;;  %v1159_v38 = vpop.xlane.xlu0 %1158 }
 0x3a6   : > { %2715 = vrcp.f32 %v1159_v38 }
 0x3a7   : > { %v899_v39 = vpack.c.bf16 %v898_v37, %v897_v36  ;;  %2717 = vrcp.f32 %v1156_v40 }
 0x3a9   : > { %2510 = vmatmul.mubr.msk.bf16.vlgmr.msra.gmra.mrb[8].mxu0 %vm825_vm7, %v899_v39 }
 0x3aa   : > { %2521 = vmatprep.mubr.msk.bf16.mxu0 %vm2779_vm6, %v2778_v5  ;;  %v2712_v41 = vpop.eup %2711 }
 0x3ab   : > { %v2714_v43 = vpop.eup %2713  ;;  %v1025_v44 = vmul.f32 %v2712_v41, %v2698_v3  ;;  %v1284_v45 = vpop.xlane.xlu1 %1283 }
 0x3ac   : > { %v1024_v46 = vmul.f32 %v2714_v43, %v2696_v10 }
 0x3ad   : > { %v1287_v42 = vpop.xlane.xlu0 %1286 }
 0x3ae   : > { %2719 = vrcp.f32 %v1287_v42  ;;  %v1026_v48 = vpack.c.bf16 %v1025_v44, %v1024_v46 }
 0x3af   : > { %2721 = vrcp.f32 %v1284_v45  ;;  %v1166_v50 = vpop.permute.xlu1 %1165 }
 0x3b0   : > { %v2716_v49 = vpop.eup %2715 }
 0x3b1   : > { %v1028_v47 = vpop.permute.xlu0 %1027  ;;  %v2718_v51 = vpop.eup %2717  ;;  %v1163_v52 = vmul.f32 %v2716_v49, %v2702_v21 }
 0x3b2   : > { %2520 = vmatpush3.bf16.msra.mxu0 %v1028_v47  ;;  %v1162_v53 = vmul.f32 %v2718_v51, %v2700_v19 }
 0x3b3   : > { %2531 = vmatprep.subr.bf16.mxu0 %v2778_v5  ;;  %v1294_v56 = vpop.permute.xlu1 %1293 }
 0x3b4   : > { %v1164_v54 = vpack.c.bf16 %v1163_v52, %v1162_v53 }
 0x3b5   : > { %2522 = vmatmul.mubr.msk.bf16.vlgmr.msra.gmra.mrb[12].mxu0 %vm825_vm7, %v1026_v48 }
 0x3b6   : > { %2532 = vmatpush3.bf16.msra.mxu0 %v1166_v50  ;;  %2533 = vmatprep.mubr.msk.bf16.mxu0 %vm2779_vm6, %v2778_v5 }
 0x3b7   : > { %2543 = vmatprep.subr.bf16.mxu0 %v2778_v5 }
 0x3b8   : > { %v2720_v55 = vpop.eup %2719 }
 0x3b9   : > { %v2722_v57 = vpop.eup %2721  ;;  %v1291_v58 = vmul.f32 %v2720_v55, %v2706_v25 }
 0x3ba   : > { %v1290_v59 = vmul.f32 %v2722_v57, %v2704_v23 }
 0x3bc   : > { %v1292_v60 = vpack.c.bf16 %v1291_v58, %v1290_v59 }
 0x3bd   : > { %2534 = vmatmul.mubr.msk.bf16.vlgmr.msra.gmra.mrb[16].mxu0 %vm825_vm7, %v1164_v54 }
 0x3be   : > { %2544 = vmatpush3.bf16.msra.mxu0 %v1294_v56  ;;  %2545 = vmatprep.mubr.msk.bf16.mxu0 %vm2779_vm6, %v2778_v5 }
 0x3c5   : > { %2546 = vmatmul.mubr.msk.bf16.vlgmr.msra.gmra.mrb[20].mxu0 %vm825_vm7, %v1292_v60 }
 0x47c   : > { %v940_v61 = vpop.f32.mrb[8].mxu0 }
 0x47d   : > { %947 = vst.msk [vmem:[#allocation3] sm:$0xff] %vm825_vm7, %v940_v61  ;;  %v2511_v62 = vpop.f32.mrb[9].mxu0 }
 0x47e   : > { %v943_v63 = vpop.f32.mrb[10].mxu0 }
 0x47f   : > { %948 = vst.msk [vmem:[#allocation3 + $0x8] sm:$0xff] %vm825_vm7, %v943_v63  ;;  %v2512_v1 = vpop.f32.mrb[11].mxu0 }
 0x488   : > { %v1067_v2 = vpop.f32.mrb[12].mxu0 }
 0x489   : > { %1076 = vrot.lane.b32.xlu0 %v1067_v2, %s2786_s27  ;;  %v2523_v10 = vpop.f32.mrb[13].mxu0 }
 0x48a   : > { %v1070_v11 = vpop.f32.mrb[14].mxu0 }
 0x48b   : > { %1078 = vrot.lane.b32.xlu1 %v1070_v11, %s2786_s27  ;;  %v2524_v12 = vpop.f32.mrb[15].mxu0  ;;  %v2673_v11 = vld [vmem:[%s2945_s29 + $0x10] sm:$0xff]  }
 0x48c   : > { %2557 = vmatprep.subr.bf16.mxu0 %v2673_v11  ;;  %v2674_v12 = vld [vmem:[%s2945_s29 + $0x18] sm:$0xff]  }
 0x48d   : > { %2558 = vmatpush3.bf16.msra.mxu0 %v2673_v11  ;;  %v2680_v11 = vld [vmem:[%s2960_s25 + $0x28] sm:$0xff]  }
 0x48e   : > { %2559 = vmatprep.subr.bf16.mxu0 %v2674_v12 }
 0x490   : > { %v1205_v3 = vpop.f32.mrb[16].mxu0 }
 0x491   : > { %1213 = vst.msk [vmem:[#allocation3 + $0x10] sm:$0xff] %vm825_vm7, %v1205_v3  ;;  %v2535_v14 = vpop.f32.mrb[17].mxu0  ;;  %2560 = vmatpush3.bf16.msra.mxu0 %v2674_v12  ;;  %v2681_v12 = vld [vmem:[%s2960_s25 + $0x30] sm:$0xff]  }
 0x492   : > { %v1208_v15 = vpop.f32.mrb[18].mxu0  ;;  %2565 = vmatprep.subr.bf16.mxu0 %v2675_v0 }
 0x493   : > { %1214 = vst.msk [vmem:[#allocation3 + $0x18] sm:$0xff] %vm825_vm7, %v1208_v15  ;;  %v2536_v16 = vpop.f32.mrb[19].mxu0 }
 0x498   : > { %v1333_v17 = vpop.f32.mrb[20].mxu0 }
 0x499   : > { %1342 = vrot.lane.b32.xlu0 %v1333_v17, %s2786_s27  ;;  %v2547_v18 = vpop.f32.mrb[21].mxu0 }
 0x49a   : > { %v1336_v19 = vpop.f32.mrb[22].mxu0 }
 0x49b   : > { %1344 = vrot.lane.b32.xlu1 %v1336_v19, %s2786_s27  ;;  %v2548_v20 = vpop.f32.mrb[23].mxu0 }
 0x4fb   : > { %v1077_v21 = vpop.permute.xlu0 %1076 }
 0x4fc   : > { %1083 = vst.msk [vmem:[#allocation3] sm:$0xff] %vm1082_vm10, %v1077_v21 }
 0x4fd   : > { %v1079_v22 = vpop.permute.xlu1 %1078 }
 0x4fe   : > { %1084 = vst.msk [vmem:[#allocation3 + $0x8] sm:$0xff] %vm1082_vm10, %v1079_v22 }
 0x503   : > { %v1350_v23 = vld [vmem:[#allocation3] sm:$0xff] }
 0x505   : > { %v1351_v24 = vld [vmem:[#allocation3 + $0x8] sm:$0xff] }
 0x506   : > { %v1354_v25 = vpack.c.bf16 %v1351_v24, %v1350_v23 }
 0x508   : > { %2553 = vmatprep.mubr.msk.bf16.mxu1 %vm761_vm5, %v1354_v25  ;;  %v2396_v25 = vld [vmem:[%s3283_s20] ss:$0 sm:$0xff] }
 0x50b   : > { %v1343_v29 = vpop.permute.xlu0 %1342 }
 0x50c   : > { %1348 = vst.msk [vmem:[#allocation3 + $0x10] sm:$0xff] %vm1082_vm10, %v1343_v29 }
 0x50d   : > { %v1345_v31 = vpop.permute.xlu1 %1344 }
 0x50e   : > { %1349 = vst.msk [vmem:[#allocation3 + $0x18] sm:$0xff] %vm1082_vm10, %v1345_v31 }
 0x513   : > { %v1352_v32 = vld [vmem:[#allocation3 + $0x10] sm:$0xff] }
 0x515   : > { %v1353_v4 = vld [vmem:[#allocation3 + $0x18] sm:$0xff] }
 0x516   : > { %v1355_v33 = vpack.c.bf16 %v1353_v4, %v1352_v32  ;;  %v2397_v32 = vld [vmem:[%s3284_s19] ss:$0 sm:$0xff] }
 0x518   : > { %2554 = vmatmul.mubr.msk.bf16.vlgmr.msra.gmra.mrb[12].mxu1 %vm761_vm5, %v1355_v33 }
 0x5eb   : > { %v2555_v35 = vpop.f32.mrb[12].mxu1 }
 0x5ec   : > { %v1419_v36 = vpop.f32.mrb[13].mxu1  ;;  %v1428_v37 = vadd.f32 %v2555_v35, %v2391_v34 }
 0x5ed   : > { %v1420_v38 = vadd.f32 %v2391_v34, %v1419_v36  ;;  %v2556_v39 = vpop.f32.mrb[14].mxu1 }
 0x5ee   : > { %v1422_v40 = vpop.f32.mrb[15].mxu1  ;;  %v1431_v43 = vadd.f32 %v2556_v39, %v2391_v34  ;;  %v1436_v46 = vadd.f32 %v1428_v37, %v3000_v28 }
 0x5ef   : > { %v1423_v41 = vadd.f32 %v2391_v34, %v1422_v40  ;;  %v1434_v42 = vadd.f32 %v1420_v38, %v2996_v26 }
 0x5f0   : > { %v1446_v48 = vsel %vm761_vm5, %v1436_v46, 0.0  ;;  %v1437_v49 = vadd.f32 %v1431_v43, %v3004_v30 }
 0x5f1   : > { %v1440_v44 = vsel %vm761_vm5, %v1434_v42, 0.0  ;;  %v1435_v45 = vadd.f32 %v1423_v41, %v2998_v27 }
 0x5f2   : > { %1441 = vadd.xlane.f32.xlu0 %v1440_v44  ;;  %v1449_v50 = vsel %vm761_vm5, %v1437_v49, 0.0 }
 0x5f3   : > { %v1443_v47 = vsel %vm761_vm5, %v1435_v45, 0.0 }
 0x5f4   : > { %1444 = vadd.xlane.f32.xlu1 %v1443_v47 }
 0x5f6   : > { %1447 = vadd.xlane.f32.xlu0 %v1446_v48 }
 0x5fa   : > { %1450 = vadd.xlane.f32.xlu0 %v1449_v50 }
 0x67f   : > { %v1442_v26 = vpop.xlane.xlu0 %1441 }
 0x680   : > { %v1453_v51 = vmul.f32 0.03125, %v1442_v26 }
 0x681   : > { %v1445_v52 = vpop.xlane.xlu1 %1444 }
 0x682   : > { %v1457_v53 = vsub.f32 %v1434_v42, %v1453_v51  ;;  %v1454_v54 = vmul.f32 0.03125, %v1445_v52 }
 0x683   : > { %v1448_v27 = vpop.xlane.xlu0 %1447 }
 0x684   : > { %v1458_v55 = vsub.f32 %v1435_v45, %v1454_v54  ;;  %v1455_v28 = vmul.f32 0.03125, %v1448_v27  ;;  %v1461_v56 = vmul.f32 %v1457_v53, %v1457_v53 }
 0x686   : > { %v1459_v57 = vsub.f32 %v1436_v46, %v1455_v28  ;;  %v1465_v58 = vsel %vm761_vm5, %v1461_v56, 0.0  ;;  %v1462_v59 = vmul.f32 %v1458_v55, %v1458_v55  ;;  %v2677_v56 = vld [vmem:[%s2945_s29 + $0x20] sm:$0xff]  }
 0x687   : > { %1466 = vadd.xlane.f32.xlu1 %v1465_v58  ;;  %v1451_v60 = vpop.xlane.xlu0 %1450 }
 0x688   : > { %v1456_v30 = vmul.f32 0.03125, %v1451_v60  ;;  %v1468_v61 = vsel %vm761_vm5, %v1462_v59, 0.0  ;;  %v1463_v62 = vmul.f32 %v1459_v57, %v1459_v57 }
 0x689   : > { %1469 = vadd.xlane.f32.xlu0 %v1468_v61  ;;  %v2678_v61 = vld [vmem:[%s2945_s29 + $0x28] sm:$0xff]  }
 0x68a   : > { %v1460_v63 = vsub.f32 %v1437_v49, %v1456_v30  ;;  %v1471_v1 = vsel %vm761_vm5, %v1463_v62, 0.0 }
 0x68b   : > { %1472 = vadd.xlane.f32.xlu1 %v1471_v1 }
 0x68c   : > { %v1464_v2 = vmul.f32 %v1460_v63, %v1460_v63 }
 0x68e   : > { %v1474_v10 = vsel %vm761_vm5, %v1464_v2, 0.0 }
 0x68f   : > { %1475 = vadd.xlane.f32.xlu0 %v1474_v10  ;;  %v2679_v10 = vld [vmem:[%s2960_s25 + $0x20] sm:$0xff]  }
 0x690   : > { %2581 = vmatprep.subr.bf16.mxu1 %v2679_v10 }
 0x691   : > { %2582 = vmatpush3.bf16.msra.mxu1 %v2679_v10 }
 0x692   : > { %2583 = vmatprep.subr.bf16.mxu1 %v2680_v11 }
 0x695   : > { %2584 = vmatpush3.bf16.msra.mxu1 %v2680_v11 }
 0x696   : > { %2585 = vmatprep.subr.bf16.mxu1 %v2681_v12 }
 0x699   : > { %2586 = vmatpush3.bf16.msra.mxu1 %v2681_v12 }
 0x714   : > { %v1467_v13 = vpop.xlane.xlu1 %1466 }
 0x715   : > { %v1477_v3 = vmul.f32 0.03125, %v1467_v13  ;;  %v2683_v13 = vld [vmem:[%s2960_s25] sm:$0xff]  }
 0x716   : > { %v1470_v14 = vpop.xlane.xlu0 %1469 }
 0x717   : > { %v1481_v15 = vadd.f32 1e-05, %v1477_v3  ;;  %v1478_v16 = vmul.f32 0.03125, %v1470_v14  ;;  %v2410_v3 = vld [vmem:[%s3285_s26] ss:$0 sm:$0xff] }
 0x718   : > { %v1473_v17 = vpop.xlane.xlu1 %1472 }
 0x719   : > { %2723 = vrsqrt.f32 %v1481_v15  ;;  %v1482_v18 = vadd.f32 1e-05, %v1478_v16  ;;  %v1479_v19 = vmul.f32 0.03125, %v1473_v17 }
 0x71b   : > { %2725 = vrsqrt.f32 %v1482_v18  ;;  %v1483_v20 = vadd.f32 1e-05, %v1479_v19 }
 0x71c   : > { %v1476_v21 = vpop.xlane.xlu0 %1475 }
 0x71d   : > { %2727 = vrsqrt.f32 %v1483_v20  ;;  %v1480_v22 = vmul.f32 0.03125, %v1476_v21 }
 0x71f   : > { %v1484_v23 = vadd.f32 1e-05, %v1480_v22 }
 0x721   : > { %2729 = vrsqrt.f32 %v1484_v23 }
 0x723   : > { %v2724_v24 = vpop.eup %2723 }
 0x724   : > { %v1489_v29 = vmul.f32 %v2724_v24, %v1457_v53 }
 0x725   : > { %v2726_v31 = vpop.eup %2725 }
 0x726   : > { %v1499_v4 = vmul.f32 %v2396_v25, %v1489_v29  ;;  %v1490_v33 = vmul.f32 %v2726_v31, %v1458_v55  ;;  %v2676_v55 = vld [vmem:[%s2945_s29 + $0x8] sm:$0xff]  }
 0x727   : > { %v2728_v34 = vpop.eup %2727 }
 0x728   : > { %v1509_v35 = vadd.f32 %v2397_v32, %v1499_v4  ;;  %v1500_v36 = vmul.f32 %v2396_v25, %v1490_v33  ;;  %v1491_v37 = vmul.f32 %v2728_v34, %v1459_v57 }
 0x72a   : > { %v3130_v38 = vmul.f32 %v2937_v6, %v1509_v35  ;;  %v1510_v39 = vadd.f32 %v2397_v32, %v1500_v36  ;;  %v1501_v40 = vmul.f32 %v2396_v25, %v1491_v37  ;;  %v2684_v36 = vld [vmem:[%s2960_s25 + $0x8] sm:$0xff]  }
 0x72b   : > { %v2730_v41 = vpop.eup %2729 }
 0x72c   : > { %1523 = vst.msk [vmem:[#allocation4 + $0x1] sm:$0xff] %vm761_vm5, %v3130_v38  ;;  %v3135_v42 = vmul.f32 %v2940_v7, %v1510_v39  ;;  %v1511_v43 = vadd.f32 %v2397_v32, %v1501_v40  ;;  %v1492_v44 = vmul.f32 %v2730_v41, %v1460_v63  ;;  %v2685_v39 = vld [vmem:[%s2960_s25 + $0x10] sm:$0xff]   ;;  %v2686_v40 = vld [vmem:[%s2960_s25 + $0x18] sm:$0xff]   ;;  %v2687_v41 = vld [vmem:[%s2960_s25 + $0x40] sm:$0xff]  }
 0x72e   : > { %1524 = vst.msk [vmem:[#allocation4 + $0x9] sm:$0xff] %vm761_vm5, %v3135_v42  ;;  %v3140_v45 = vmul.f32 %v2952_v8, %v1511_v43  ;;  %v1502_v46 = vmul.f32 %v2396_v25, %v1492_v44 }
 0x730   : > { %1525 = vst.msk [vmem:[#allocation4 + $0x19] sm:$0xff] %vm761_vm5, %v3140_v45  ;;  %v1512_v47 = vadd.f32 %v2397_v32, %v1502_v46 }
 0x732   : > { %v3145_v48 = vmul.f32 %v2955_v9, %v1512_v47 }
 0x733   : > { %v1537_v49 = vld [vmem:[#allocation4 + $0x1] sm:$0xff] }
 0x734   : > { %1526 = vst.msk [vmem:[#allocation4 + $0x21] sm:$0xff] %vm761_vm5, %v3145_v48  ;;  %v1527_v27 = vld [vmem:[#allocation4] sm:$0xff] }
 0x735   : > { %v1538_v50 = vld [vmem:[#allocation4 + $0x9] sm:$0xff] }
 0x736   : > { %v1541_v26 = vpack.c.bf16 %v1538_v50, %v1537_v49  ;;  %v1528_v51 = vld [vmem:[#allocation4 + $0x8] sm:$0xff] }
 0x737   : > { %v1539_v52 = vld [vmem:[#allocation4 + $0x19] sm:$0xff]  ;;  %v1531_v28 = vpack.c.bf16 %v1528_v51, %v1527_v27  ;;  %v1681_v58 = vld [vmem:[#allocation4 + $0x2] sm:$0xff]  ;;  %v1682_v59 = vld [vmem:[#allocation4 + $0xa] sm:$0xff] }
 0x738   : > { %2561 = vmatprep.mubr.msk.bf16.mxu0 %vm761_vm5, %v1541_v26  ;;  %v1529_v60 = vld [vmem:[#allocation4 + $0x18] sm:$0xff]  ;;  %v1685_v62 = vpack.c.bf16 %v1682_v59, %v1681_v58  ;;  %v2688_v50 = vld [vmem:[%s2960_s25 + $0x48] sm:$0xff]   ;;  %v2689_v51 = vld [vmem:[%s2960_s25 + $0x50] sm:$0xff]  }
 0x73b   : > { %v1540_v53 = vld [vmem:[#allocation4 + $0x21] sm:$0xff] }
 0x73c   : > { %v1542_v54 = vpack.c.bf16 %v1540_v53, %v1539_v52  ;;  %v1530_v57 = vld [vmem:[#allocation4 + $0x20] sm:$0xff]  ;;  %v2690_v52 = vld [vmem:[%s2960_s25 + $0x58] sm:$0xff]  }
 0x73d   : > { %v1532_v30 = vpack.c.bf16 %v1530_v57, %v1529_v60  ;;  %v1683_v63 = vld [vmem:[#allocation4 + $0x1a] sm:$0xff]  ;;  %v1684_v1 = vld [vmem:[#allocation4 + $0x22] sm:$0xff] }
 0x73e   : > { %2562 = vmatmul.mubr.msk.bf16.vlgmr.msra.gmra.mrb[24].mxu0 %vm761_vm5, %v1542_v54  ;;  %v1686_v2 = vpack.c.bf16 %v1684_v1, %v1683_v63 }
 0x73f   : > { %2569 = vmatprep.mubr.msk.bf16.mxu0 %vm761_vm5, %v1531_v28  ;;  %2566 = vmatpush3.bf16.msra.mxu0 %v2675_v0  ;;  %v2682_v0 = vld [vmem:[%s2960_s25 + $0x38] sm:$0xff]  }
 0x740   : > { %2567 = vmatprep.subr.bf16.mxu0 %v2676_v55  ;;  %2587 = vmatprep.subr.bf16.mxu1 %v2682_v0 }
 0x741   : > { %2588 = vmatpush3.bf16.msra.mxu1 %v2682_v0 }
 0x742   : > { %2593 = vmatprep.subr.bf16.mxu1 %v2683_v13 }
 0x743   : > { %2568 = vmatpush3.bf16.msra.mxu0 %v2676_v55  ;;  %v2429_v55 = vld [vmem:[%s3286_s16] ss:$0 sm:$0xff] }
 0x744   : > { %2573 = vmatprep.subr.bf16.mxu0 %v2677_v56 }
 0x74a   : > { %2570 = vmatmul.mubr.msk.bf16.vlgmr.msra.gmra.mrb[24].mxu0 %vm761_vm5, %v1532_v30 }
 0x74b   : > { %2577 = vmatprep.mubr.msk.bf16.mxu0 %vm761_vm5, %v1685_v62  ;;  %2574 = vmatpush3.bf16.msra.mxu0 %v2677_v56 }
 0x74c   : > { %2575 = vmatprep.subr.bf16.mxu0 %v2678_v61 }
 0x74f   : > { %2576 = vmatpush3.bf16.msra.mxu0 %v2678_v61 }
 0x756   : > { %2578 = vmatmul.mubr.msk.bf16.vlgmr.msra.gmra.mrb[24].mxu0 %vm761_vm5, %v1686_v2 }
 0x829   : > { %v2579_v14 = vpop.f32.mrb[24].mxu0 }
 0x82a   : > { %v1770_v15 = vadd.f32 %v2579_v14, %v2410_v3  ;;  %v1743_v16 = vpop.f32.mrb[25].mxu0 }
 0x82b   : > { %v1768_v5 = vadd.f32 %v2410_v3, %v1743_v16  ;;  %v2580_v17 = vpop.f32.mrb[26].mxu0 }
 0x82c   : > { %v1774_v18 = vmax.f32 %v1770_v15, 0.0  ;;  %v1771_v19 = vadd.f32 %v2580_v17, %v2410_v3  ;;  %v1746_v20 = vpop.f32.mrb[27].mxu0 }
 0x82d   : > { %v1772_v21 = vmax.f32 %v1768_v5, 0.0  ;;  %v1769_v22 = vadd.f32 %v2410_v3, %v1746_v20 }
 0x82e   : > { %1785 = vst.msk [vmem:[#allocation5 + $0x19] sm:$0xff] %vm1782_vm13, %v1774_v18  ;;  %v1775_v23 = vmax.f32 %v1771_v19, 0.0 }
 0x82f   : > { %1783 = vst.msk [vmem:[#allocation5 + $0x1] sm:$0xff] %vm1782_vm13, %v1772_v21  ;;  %v1773_v24 = vmax.f32 %v1769_v22, 0.0 }
 0x830   : > { %1786 = vst.msk [vmem:[#allocation5 + $0x21] sm:$0xff] %vm1782_vm13, %v1775_v23 }
 0x831   : > { %1784 = vst.msk [vmem:[#allocation5 + $0x9] sm:$0xff] %vm1782_vm13, %v1773_v24 }
 0x835   : > { %v1803_v33 = vld [vmem:[#allocation5 + $0x19] sm:$0xff] }
 0x836   : > { %v1801_v29 = vld [vmem:[#allocation5 + $0x1] sm:$0xff]  ;;  %v1789_v47 = vld [vmem:[#allocation5 + $0x18] sm:$0xff] }
 0x837   : > { %v1804_v25 = vld [vmem:[#allocation5 + $0x21] sm:$0xff] }
 0x838   : > { %v1802_v31 = vld [vmem:[#allocation5 + $0x9] sm:$0xff]  ;;  %v1806_v34 = vpack.c.bf16 %v1804_v25, %v1803_v33  ;;  %v1787_v35 = vld [vmem:[#allocation5] sm:$0xff] }
 0x839   : > { %v1788_v32 = vld [vmem:[#allocation5 + $0x8] sm:$0xff]  ;;  %v1805_v4 = vpack.c.bf16 %v1802_v31, %v1801_v29  ;;  %v1790_v43 = vld [vmem:[#allocation5 + $0x20] sm:$0xff] }
 0x83a   : > { %v1791_v37 = vpack.c.bf16 %v1788_v32, %v1787_v35  ;;  %v1973_v44 = vld [vmem:[#allocation5 + $0x2] sm:$0xff]  ;;  %v1974_v46 = vld [vmem:[#allocation5 + $0xa] sm:$0xff]  ;;  %v1792_v49 = vpack.c.bf16 %v1790_v43, %v1789_v47  ;;  %v1975_v53 = vld [vmem:[#allocation5 + $0x1a] sm:$0xff] }
 0x83b   : > { %2589 = vmatprep.mubr.msk.bf16.mxu1 %vm1782_vm13, %v1805_v4  ;;  %v1977_v26 = vpack.c.bf16 %v1974_v46, %v1973_v44  ;;  %v1976_v54 = vld [vmem:[#allocation5 + $0x22] sm:$0xff]  ;;  %v2430_v46 = vld [vmem:[%s676_s17] ss:$0 sm:$0xff] }
 0x83c   : > { %2590 = vmatmul.mubr.msk.bf16.vlgmr.msra.gmra.mrb[16].mxu1 %vm1782_vm13, %v1806_v34  ;;  %v1978_v27 = vpack.c.bf16 %v1976_v54, %v1975_v53 }
 0x83d   : > { %2594 = vmatpush3.bf16.msra.mxu1 %v2683_v13  ;;  %2601 = vmatprep.mubr.msk.bf16.mxu1 %vm1782_vm13, %v1791_v37 }
 0x83e   : > { %2595 = vmatprep.subr.bf16.mxu1 %v2684_v36 }
 0x841   : > { %2596 = vmatpush3.bf16.msra.mxu1 %v2684_v36 }
 0x842   : > { %2597 = vmatprep.subr.bf16.mxu1 %v2685_v39 }
 0x845   : > { %2598 = vmatpush3.bf16.msra.mxu1 %v2685_v39 }
 0x846   : > { %2599 = vmatprep.subr.bf16.mxu1 %v2686_v40 }
 0x849   : > { %2600 = vmatpush3.bf16.msra.mxu1 %v2686_v40 }
 0x84a   : > { %2605 = vmatprep.subr.bf16.mxu1 %v2687_v41 }
 0x84c   : > { %2602 = vmatmul.mubr.msk.bf16.vlgmr.msra.gmra.mrb[16].mxu1 %vm1782_vm13, %v1792_v49 }
 0x84d   : > { %2606 = vmatpush3.bf16.msra.mxu1 %v2687_v41  ;;  %2613 = vmatprep.mubr.msk.bf16.mxu1 %vm1782_vm13, %v1977_v26 }
 0x84e   : > { %2607 = vmatprep.subr.bf16.mxu1 %v2688_v50 }
 0x851   : > { %2608 = vmatpush3.bf16.msra.mxu1 %v2688_v50  ;;  %v2431_v50 = vld [vmem:[%s679_s21] ss:$0 sm:$0xff]  ;;  %s3287_s21 = sld [smem:[#allocation15_spill]] (!%p2432_p11) }
 0x852   : > { %2609 = vmatprep.subr.bf16.mxu1 %v2689_v51 }
 0x855   : > { %2610 = vmatpush3.bf16.msra.mxu1 %v2689_v51 }
 0x856   : > { %2611 = vmatprep.subr.bf16.mxu1 %v2690_v52 }
 0x859   : > { %2612 = vmatpush3.bf16.msra.mxu1 %v2690_v52 }
 0x85c   : > { %2614 = vmatmul.mubr.msk.bf16.vlgmr.msra.gmra.mrb[16].mxu1 %vm1782_vm13, %v1978_v27 }
 0x92f   : > { %v2615_v28 = vpop.f32.mrb[16].mxu1 }
 0x930   : > { %v2051_v56 = vpop.f32.mrb[17].mxu1  ;;  %v2078_v57 = vadd.f32 %v2615_v28, %v2429_v55 }
 0x931   : > { %v2076_v58 = vadd.f32 %v2429_v55, %v2051_v56  ;;  %v2616_v59 = vpop.f32.mrb[18].mxu1 }
 0x932   : > { %v2054_v60 = vpop.f32.mrb[19].mxu1  ;;  %v2079_v30 = vadd.f32 %v2616_v59, %v2429_v55  ;;  %v2082_v2 = vadd.f32 %v2078_v57, %v3140_v45 }
 0x933   : > { %v2077_v61 = vadd.f32 %v2429_v55, %v2054_v60  ;;  %v2080_v62 = vadd.f32 %v2076_v58, %v3130_v38 }
 0x934   : > { %v2083_v11 = vadd.f32 %v2079_v30, %v3145_v48  ;;  %v2092_v12 = vsel %vm761_vm5, %v2082_v2, 0.0 }
 0x935   : > { %v2086_v63 = vsel %vm761_vm5, %v2080_v62, 0.0  ;;  %v2081_v1 = vadd.f32 %v2077_v61, %v3135_v42 }
 0x936   : > { %2087 = vadd.xlane.f32.xlu1 %v2086_v63  ;;  %v2095_v0 = vsel %vm761_vm5, %v2083_v11, 0.0 }
 0x937   : > { %v2089_v10 = vsel %vm761_vm5, %v2081_v1, 0.0 }
 0x938   : > { %2090 = vadd.xlane.f32.xlu0 %v2089_v10 }
 0x93a   : > { %2093 = vadd.xlane.f32.xlu1 %v2092_v12 }
 0x93c   : > { %2096 = vadd.xlane.f32.xlu0 %v2095_v0 }
 0x9c3   : > { %v2088_v13 = vpop.xlane.xlu1 %2087 }
 0x9c4   : > { %v2098_v38 = vmul.f32 0.03125, %v2088_v13 }
 0x9c5   : > { %v2091_v3 = vpop.xlane.xlu0 %2090 }
 0x9c6   : > { %v2102_v14 = vsub.f32 %v2080_v62, %v2098_v38  ;;  %v2099_v15 = vmul.f32 0.03125, %v2091_v3 }
 0x9c7   : > { %v2094_v42 = vpop.xlane.xlu1 %2093 }
 0x9c8   : > { %v2103_v16 = vsub.f32 %v2081_v1, %v2099_v15  ;;  %v2100_v45 = vmul.f32 0.03125, %v2094_v42  ;;  %v2106_v5 = vmul.f32 %v2102_v14, %v2102_v14 }
 0x9c9   : > { %v2097_v17 = vpop.xlane.xlu0 %2096 }
 0x9ca   : > { %v2104_v18 = vsub.f32 %v2082_v2, %v2100_v45  ;;  %v2101_v19 = vmul.f32 0.03125, %v2097_v17  ;;  %v2110_v48 = vsel %vm761_vm5, %v2106_v5, 0.0  ;;  %v2107_v20 = vmul.f32 %v2103_v16, %v2103_v16 }
 0x9cb   : > { %2111 = vadd.xlane.f32.xlu1 %v2110_v48 }
 0x9cc   : > { %v2105_v21 = vsub.f32 %v2083_v11, %v2101_v19  ;;  %v2113_v22 = vsel %vm761_vm5, %v2107_v20, 0.0  ;;  %v2108_v23 = vmul.f32 %v2104_v18, %v2104_v18 }
 0x9cd   : > { %2114 = vadd.xlane.f32.xlu0 %v2113_v22 }
 0x9ce   : > { %v2116_v24 = vsel %vm761_vm5, %v2108_v23, 0.0  ;;  %v2109_v25 = vmul.f32 %v2105_v21, %v2105_v21 }
 0x9cf   : > { %2117 = vadd.xlane.f32.xlu1 %v2116_v24 }
 0x9d0   : > { %v2119_v29 = vsel %vm761_vm5, %v2109_v25, 0.0 }
 0x9d1   : > { %2120 = vadd.xlane.f32.xlu0 %v2119_v29 }
 0xa58   : > { %v2112_v31 = vpop.xlane.xlu1 %2111 }
 0xa59   : > { %v2122_v32 = vmul.f32 0.03125, %v2112_v31 }
 0xa5a   : > { %v2115_v4 = vpop.xlane.xlu0 %2114 }
 0xa5b   : > { %v2126_v33 = vadd.f32 1e-05, %v2122_v32  ;;  %v2123_v34 = vmul.f32 0.03125, %v2115_v4 }
 0xa5c   : > { %v2118_v35 = vpop.xlane.xlu1 %2117 }
 0xa5d   : > { %2731 = vrsqrt.f32 %v2126_v33  ;;  %v2127_v36 = vadd.f32 1e-05, %v2123_v34  ;;  %v2124_v37 = vmul.f32 0.03125, %v2118_v35 }
 0xa5e   : > { %v2121_v39 = vpop.xlane.xlu0 %2120 }
 0xa5f   : > { %2733 = vrsqrt.f32 %v2127_v36  ;;  %v2128_v40 = vadd.f32 1e-05, %v2124_v37  ;;  %v2125_v41 = vmul.f32 0.03125, %v2121_v39 }
 0xa61   : > { %2735 = vrsqrt.f32 %v2128_v40  ;;  %v2129_v43 = vadd.f32 1e-05, %v2125_v41 }
 0xa63   : > { %2737 = vrsqrt.f32 %v2129_v43 }
 0xa67   : > { %v2732_v44 = vpop.eup %2731 }
 0xa68   : > { %v2134_v47 = vmul.f32 %v2732_v44, %v2102_v14 }
 0xa69   : > { %v2734_v49 = vpop.eup %2733 }
 0xa6a   : > { %v2144_v26 = vmul.f32 %v2430_v46, %v2134_v47  ;;  %v2135_v51 = vmul.f32 %v2734_v49, %v2103_v16 }
 0xa6b   : > { %v2736_v52 = vpop.eup %2735 }
 0xa6c   : > { %v2154_v53 = vadd.f32 %v2431_v50, %v2144_v26  ;;  %v2145_v54 = vmul.f32 %v2430_v46, %v2135_v51  ;;  %v2136_v27 = vmul.f32 %v2736_v52, %v2104_v18 }
 0xa6d   : > { %v2738_v55 = vpop.eup %2737 }
 0xa6e   : > { %v2158_v28 = vmul.f32 %v2937_v6, %v2154_v53  ;;  %v2155_v56 = vadd.f32 %v2431_v50, %v2145_v54  ;;  %v2146_v57 = vmul.f32 %v2430_v46, %v2136_v27  ;;  %v2137_v58 = vmul.f32 %v2738_v55, %v2105_v21 }
 0xa70   : > { %2162 = vst.msk [vmem:[#allocation2] sm:$0xff] %vm761_vm5, %v2158_v28  ;;  %v2159_v59 = vmul.f32 %v2940_v7, %v2155_v56  ;;  %v2156_v60 = vadd.f32 %v2431_v50, %v2146_v57  ;;  %v2147_v30 = vmul.f32 %v2430_v46, %v2137_v58  ;;  %2169 = sbr.rel (%p2432_p11) target bundleno = 2679 (0xa77), region = 84  ;;  %2170 = vst.msk [vmem:[%s3287_s21] sm:$0xff] (!%p2432_p11), %vm761_vm5, %v2158_v28 }
 0xa72   : > { %2163 = vst.msk [vmem:[#allocation2 + $0x8] sm:$0xff] %vm761_vm5, %v2159_v59  ;;  %v2160_v61 = vmul.f32 %v2952_v8, %v2156_v60  ;;  %v2157_v62 = vadd.f32 %v2431_v50, %v2147_v30  ;;  %2171 = vst.msk [vmem:[%s3287_s21 + $0x8] sm:$0xff] (!%p2432_p11), %vm761_vm5, %v2159_v59 }
 0xa74   : > { %2164 = vst.msk [vmem:[#allocation2 + $0x10] sm:$0xff] %vm761_vm5, %v2160_v61  ;;  %v2161_v63 = vmul.f32 %v2955_v9, %v2157_v62  ;;  %2172 = vst.msk [vmem:[%s3287_s21 + $0x10] sm:$0xff] (!%p2432_p11), %vm761_vm5, %v2160_v61 }
 0xa76   : > { %2165 = vst.msk [vmem:[#allocation2 + $0x18] sm:$0xff] %vm761_vm5, %v2161_v63  ;;  %2173 = vst.msk [vmem:[%s3287_s21 + $0x18] sm:$0xff] (!%p2432_p11), %vm761_vm5, %v2161_v63 }
 0xa77 PF: > { %s3288_s23 = sld [smem:[#allocation10_spill]]  ;;  %s3290_s24 = sld [smem:[#allocation11_spill]] }
 0xa7d   : > { %s31_s25 = sadd.s32 1, %s3288_s23   ;;  %s3289_s23 = sld [smem:[#allocation9_spill]] }
 0xa7e   : > { %p28_p12 = scmp.ge.s32.totalorder %s31_s25, 4  }
 0xa80   :  { %30 = sbr.rel (!%p28_p12) target bundleno = 19 (0x13), region = 151 }

// kernel: forward.5
= control target key start
LH: loop header
LB: loop body
LE: loop exit
PB: predicated region body
PF: predicated region fallthrough
CT: control target
= control target key end

     0   :  { %s3012_s0 = inlined_call_operand.vmem [shape: s32[2], index: 0, kind: input, shape index: {}]   ;;  %s3013_s1 = inlined_call_operand.vmem [shape: f32[2,8,32], index: 1, kind: input, shape index: {}]   ;;  %s3014_s2 = inlined_call_operand.vmem [shape: f32[8,32], index: 2, kind: input, shape index: {}]   ;;  %s3015_s3 = inlined_call_operand.vmem [shape: f32[2,8,32], index: 3, kind: input, shape index: {}]   ;;  %s3016_s4 = inlined_call_operand.vmem [shape: bf16[2,32,96], index: 4, kind: input, shape index: {}]   ;;  %s3017_s5 = inlined_call_operand.vmem [shape: f32[2,1,96], index: 5, kind: input, shape index: {}]   ;;  %s3018_s6 = inlined_call_operand.vmem [shape: bf16[2,32,32], index: 6, kind: input, shape index: {}]   ;;  %s3019_s7 = inlined_call_operand.vmem [shape: f32[2,1,32], index: 7, kind: input, shape index: {}]   ;;  %s3020_s8 = inlined_call_operand.vmem [shape: f32[2,1,32], index: 8, kind: input, shape index: {}]   ;;  %s3021_s9 = inlined_call_operand.vmem [shape: f32[2,1,32], index: 9, kind: input, shape index: {}]   ;;  %s3022_s10 = inlined_call_operand.vmem [shape: bf16[2,96,64], index: 10, kind: input, shape index: {}]   ;;  %s3023_s11 = inlined_call_operand.vmem [shape: f32[2,1,64], index: 11, kind: input, shape index: {}]   ;;  %s3024_s12 = inlined_call_operand.vmem [shape: bf16[2,192,32], index: 12, kind: input, shape index: {}]   ;;  %s3025_s13 = inlined_call_operand.vmem [shape: f32[2,1,32], index: 13, kind: input, shape index: {}]   ;;  %s3026_s14 = inlined_call_operand.vmem [shape: f32[2,1,32], index: 14, kind: input, shape index: {}]   ;;  %s3027_s15 = inlined_call_operand.vmem [shape: f32[2,1,32], index: 15, kind: input, shape index: {}]   ;;  %s3028_s16 = inlined_call_operand.hbm [shape: f32[2,8,32], index: 16, kind: output, shape index: {}]  }
   0x1   :  { %3034 = sst [smem:[#allocation15_spill]] %s3012_s0 }
   0x2   :  { %3035 = sst [smem:[#allocation16_spill]] %s3013_s1  ;;  %s3042_s23 = sld [smem:[#allocation15_spill]] }
   0x3   :  { %3036 = sst [smem:[#allocation17_spill]] %s3014_s2 }
   0x4   :  { %3037 = sst [smem:[#allocation18_spill]] %s3015_s3 }
   0x5   :  { %3038 = sst [smem:[#allocation19_spill]] %s3016_s4 }
   0x6   :  { %3039 = sst [smem:[#allocation20_spill]] %s3018_s6 }
   0x7   :  { %3040 = sst [smem:[#allocation21_spill]] %s3022_s10 }
   0x8   :  { %3041 = sst [smem:[#allocation22_spill]] %s3028_s16  ;;  %s21_s3 = sshll.u32 %s3042_s23, 4  ;;  %s22_s3 = int_to_ptr.vmem [resolvable:$true] %s21_s3 }
   0x9   :  { %s2467_s24 = scalar_lea.vmem %s22_s3, 16  ;;  %p2472_p1 = scmp.lt.s32.totalorder %s22_s3, %s22_s3 }
   0xa   :  { %p2468_p0 = scmp.ne.s32.totalorder %s22_s3, %s2467_s24  ;;  %p2473_p2 = scmp.lt.s32.totalorder %s2467_s24, %s2467_s24 }
   0xc   :  { %p2474_p3 = por %p2473_p2, %p2472_p1 }
   0xe   :  { %p2475_p4 = pnand %p2474_p3, %p2468_p0 }
  0x10   :  { %2478 = shalt.err (!%p2475_p4)  }
  0x11   :  { %s2535_s25 = smov [#allocation7]  }
  0x12   :  { %24 = dma.vmem_to_smem %s22_s3, 16, %s2535_s25, [#allocation6] }
  0x13   :  { %2517 = dma.done.wait [#allocation6], 16 }
  0x14   :  { %2518 = vsyncadd [#allocation6], 4294967280 }
  0x15   :  { %26 = sfence }
  0x16   :  { %27 = vsyncpa [#allocation9], 0  ;;  %s2636_s26 = smov 0   ;;  %s2638_s27 = smov 0  }
  0x17   :  { %s2640_s28 = smov 0  }
  0x18 LB: > { %3043 = sst [smem:[#allocation12_spill]] %s2529_s27  ;;  %s42_s29 = sadd.s32 1, %s2529_s27  ;;  %s2533_s28 = sphi %s2640_s28, %s33_s28   ;;  %s2529_s27 = sphi %s2638_s27, %s3064_s27   ;;  %s2525_s26 = sphi %s2636_s26, %s3063_s26  }
  0x19   : > { %3044 = sst [smem:[#allocation13_spill]] %s2533_s28  ;;  %p43_p5 = scmp.ge.s32.totalorder %s42_s29, 2 }
  0x1a   : > { %p2142_p6 = scmp.ge.s32.totalorder %s2533_s28, 1  ;;  %p573_p7 = scmp.lt.s32.totalorder %s2533_s28, 3 }
  0x1b   : > { %s3066_s29 = smov (%p43_p5, %s42_s29), 0 }
  0x1c   : > { %3045 = sst [smem:[#allocation14_spill]] %s3066_s29  ;;  %p574_p8 = pnand %p2142_p6, %p573_p7 }
  0x1d   : > { %p677_p9 = scmp.lt.s32.totalorder (!%p574_p8), %s2525_s26, 1  ;;  %s2658_s30 = sld [smem:[#allocation7]] (!%p574_p8)  ;;  %v727_v0 = vlaneseq (!%p574_p8)  ;;  %v2536_v4 = vmov (!%p574_p8), 0.0  }
  0x1e   : > { %577 = sbr.rel (%p574_p8) target bundleno = 2706 (0xa92), region = 80  ;;  %s2660_s0 = sld [smem:[#allocation7 + $0x1]] (!%p574_p8) }
  0x1f   : > { %v728_v1 = vshrl.u32 (!%p574_p8), %v727_v0, 7  ;;  %s3046_s4 = sld [smem:[#allocation19_spill]] (!%p574_p8)  ;;  %s3047_s6 = sld [smem:[#allocation20_spill]] (!%p574_p8) }
  0x20   : > { %s3048_s10 = sld [smem:[#allocation21_spill]] (!%p574_p8)  ;;  %p2152_p10 = scmp.ne.s32.totalorder (!%p574_p8), %s2525_s26, 0 }
  0x23   : > { %v729_v2 = vstv (!%p574_p8), %s2658_s30 }
  0x24   : > { %v730_v3 = vstv (!%p574_p8), %s2660_s0  ;;  %vm731_vm0 = vcmp.lt.s32.totalorder (!%p574_p8), %v728_v1, %v729_v2 }
  0x25   : > { %s2663_s17 = scalar_select %p677_p9, %s2525_s26, 1  ;;  %vm732_vm1 = vcmp.lt.s32.totalorder %v728_v1, %v730_v3  ;;  %v2706_v5 = vsel %vm731_vm0, 1.0, %v2536_v4 }
  0x26   : > { %v2718_v6 = vsel %vm732_vm1, 1.0, %v2536_v4  ;;  %740 = sbr.rel (%p2152_p10) target bundleno = 55 (0x37), region = 84  ;;  %s3049_s22 = sld [smem:[#allocation16_spill]] (!%p2152_p10)  ;;  %vm748_vm2 = vcmask (!%p2152_p10), 261120  }
  0x27   : > { %s2204_s18 = sshll.u32 %s2663_s17, 4  ;;  %s2376_s21 = smul.u32 48, %s2663_s17 }
  0x28   : > { %s2674_s24 = scalar_lea.vmem %s3046_s4, %s2204_s18  ;;  %s2679_s29 = scalar_lea.vmem %s3047_s6, %s2204_s18 }
  0x29   : > { %s2377_s27 = smul.u32 96, %s2663_s17  ;;  %s2711_s25 = scalar_lea.vmem %s3048_s10, %s2376_s21 }
  0x2a   : > { %s717_s4 = scalar_lea.vmem %s3026_s14, %s2663_s17  ;;  %s720_s21 = scalar_lea.vmem %s3027_s15, %s2663_s17 }
  0x2b   : > { %s2723_s16 = scalar_lea.vmem %s3024_s12, %s2377_s27  ;;  %s3050_s3 = sld [smem:[#allocation17_spill]] (!%p2152_p10) }
  0x2c   : > { %v741_v7 = vld [vmem:[%s3049_s22] sm:$0xff] (!%p2152_p10)  ;;  %v742_v9 = vld [vmem:[%s3049_s22 + $0x8] sm:$0xff] (!%p2152_p10) }
  0x31   : > { %v743_v8 = vld [vmem:[%s3050_s3] sm:$0xff] }
  0x32   : > { %v744_v10 = vmul.f32 %v2706_v5, %v743_v8  ;;  %v745_v11 = vmul.f32 %v2718_v6, %v743_v8 }
  0x34   : > { %v746_v12 = vadd.f32 %v744_v10, %v741_v7  ;;  %v747_v13 = vadd.f32 %v745_v11, %v742_v9 }
  0x36   : > { %749 = vst.msk [vmem:[#allocation2] sm:$0xff] %vm748_vm2, %v746_v12  ;;  %750 = vst.msk [vmem:[#allocation2 + $0x8] sm:$0xff] %vm748_vm2, %v747_v13 }
  0x37 PF: > { %2252 = vmatprep.subr.bf16.mxu0 %v2536_v4  ;;  %v2421_v14 = vld [vmem:[%s2674_s24] sm:$0xff]   ;;  %2260 = vmatprep.subr.bf16.mxu1 %v2536_v4  ;;  %vm2537_vm3 = vmmov 0   ;;  %v2422_v15 = vld [vmem:[%s2674_s24 + $0x8] sm:$0xff]   ;;  %vm777_vm4 = vcmask 261120   ;;  %s3051_s28 = scalar_lea.vmem %s3017_s5, %s2663_s17  ;;  %s2538_s24 = smov 112   ;;  %vm830_vm5 = vcmask 130048  }
  0x38   : > { %2256 = vmatprep.mubr.msk.bf16.mxu0 %vm2537_vm3, %v2536_v4  ;;  %2262 = vmatprep.mubr.msk.bf16.mxu1 %vm2537_vm3, %v2536_v4  ;;  %v2153_v19 = vld [vmem:[%s3051_s28] ss:$0 sm:$0xff]  ;;  %s2539_s19 = smov 96   ;;  %s2540_s23 = smov 80   ;;  %v823_v38 = vand.u32 127, %v727_v0  ;;  %vm879_vm7 = vcmask 64512  }
  0x39   : > { %2253 = vmatpush3.bf16.msra.mxu0 %v2421_v14  ;;  %v2541_v40 = vmov -1e+09   ;;  %s2542_s30 = smov 64   ;;  %s2543_s0 = smov 48   ;;  %vm897_vm9 = vcmask 1043456   ;;  %vm1058_vm10 = vcmask 261248  }
  0x3a   : > { %2254 = vmatprep.subr.bf16.mxu0 %v2536_v4  ;;  %vm824_vm6 = vcmp.lt.s32.totalorder %v823_v38, %v729_v2  ;;  %vm1060_vm8 = vcmp.lt.s32.totalorder %v823_v38, %v730_v3  ;;  %s2544_s1 = smov 16   ;;  %s3052_s20 = scalar_lea.vmem %s3019_s7, %s2663_s17  ;;  %vm1413_vm11 = vcmask 253952   ;;  %vm1622_vm12 = vcmask 516096  }
  0x3b   : > { %v825_v41 = vsel %vm824_vm6, 0.0, %v2541_v40  ;;  %v1061_v56 = vsel %vm1060_vm8, 0.0, %v2541_v40  ;;  %1414 = vst.msk [vmem:[#allocation4] sm:$0x1] %vm1413_vm11, %v2536_v4  ;;  %1415 = vst.msk [vmem:[#allocation4 + $0x10] sm:$0x1] %vm1413_vm11, %v2536_v4  ;;  %s3053_s18 = scalar_lea.vmem %s3020_s8, %s2663_s17  ;;  %s3054_s28 = scalar_lea.vmem %s3021_s9, %s2663_s17 }
  0x3c   : > { %1416 = vst.msk [vmem:[#allocation4 + $0x9] sm:$0x1] %vm1413_vm11, %v2536_v4  ;;  %1417 = vst.msk [vmem:[#allocation4 + $0x19] sm:$0x1] %vm1413_vm11, %v2536_v4  ;;  %vm1627_vm13 = vcmask 523264   ;;  %p2199_p11 = scmp.ne.s32.totalorder %s2525_s26, 1 }
  0x3d   : > { %v2753_v16 = vld [vmem:[#allocation2] sm:$0xff]  ;;  %v2755_v17 = vld [vmem:[#allocation2 + $0x8] sm:$0xff]  ;;  %2255 = vmatpush3.bf16.msra.mxu0 %v2422_v15  ;;  %1623 = vst.msk [vmem:[#allocation5] sm:$0x1] %vm1622_vm12, %v2536_v4  ;;  %1624 = vst.msk [vmem:[#allocation5 + $0x10] sm:$0x1] %vm1622_vm12, %v2536_v4 }
  0x3e   : > { %v753_v18 = vpack.c.bf16 %v2755_v17, %v2753_v16  ;;  %2266 = vmatprep.subr.bf16.mxu0 %v2536_v4  ;;  %1625 = vst.msk [vmem:[#allocation5 + $0x9] sm:$0x1] %vm1622_vm12, %v2536_v4  ;;  %1626 = vst.msk [vmem:[#allocation5 + $0x19] sm:$0x1] %vm1622_vm12, %v2536_v4 }
  0x40   : > { %2257 = vmatmul.mubr.msk.bf16.vlgmr.msra.gmra.mrb[0].mxu0 %vm777_vm4, %v753_v18 }
  0x41   : > { %2268 = vmatprep.mubr.msk.bf16.mxu0 %vm2537_vm3, %v2536_v4 }
 0x113   : > { %v815_v20 = vpop.f32.mrb[0].mxu0 }
 0x114   : > { %v816_v21 = vadd.f32 %v2153_v19, %v815_v20  ;;  %v2258_v22 = vpop.f32.mrb[1].mxu0 }
 0x115   : > { %v818_v23 = vpop.f32.mrb[2].mxu0 }
 0x116   : > { %v2769_v24 = vpack.c.bf16 %v816_v21, %v816_v21  ;;  %v819_v25 = vadd.f32 %v2153_v19, %v818_v23  ;;  %v2259_v26 = vpop.f32.mrb[3].mxu0 }
 0x118   : > { %942 = vrot.lane.b32.xlu1 %v2769_v24, %s2538_s24  ;;  %828 = vrot.lane.b32.xlu0 %v2769_v24, %s2539_s19  ;;  %v2773_v27 = vpack.c.bf16 %v819_v25, %v819_v25 }
 0x11c   : > { %944 = vrot.lane.b32.xlu0 %v2769_v24, %s2540_s23  ;;  %1064 = vrot.lane.b32.xlu1 %v2773_v27, %s2539_s19  ;;  %s3055_s19 = scalar_lea.vmem %s3023_s11, %s2663_s17 }
 0x120   : > { %1178 = vrot.lane.b32.xlu0 %v2773_v27, %s2540_s23  ;;  %1176 = vrot.lane.b32.xlu1 %v2773_v27, %s2538_s24 }
 0x18a   : > { %v829_v28 = vpop.permute.xlu0 %828  ;;  %v943_v31 = vpop.permute.xlu1 %942 }
 0x18b   : > { %v835_v29 = vsel %vm830_vm5, %v829_v28, 0 }
 0x18c   : > { %2261 = vmatpush3.bf16.xpose.msra.mxu1 %v835_v29 }
 0x18d   : > { %2272 = vmatprep.subr.bf16.mxu1 %v2536_v4 }
 0x18e   : > { %v945_v30 = vpop.permute.xlu0 %944  ;;  %v1065_v33 = vpop.permute.xlu1 %1064 }
 0x18f   : > { %v950_v32 = vsel %vm830_vm5, %v945_v30, 0  ;;  %v1070_v34 = vsel %vm830_vm5, %v1065_v33, 0 }
 0x192   : > { %v1179_v35 = vpop.permute.xlu0 %1178  ;;  %v1177_v37 = vpop.permute.xlu1 %1176 }
 0x193   : > { %2263 = vmatmul.mubr.msk.bf16.vlgmr.msra.gmra.mrb[0].mxu1 %vm830_vm5, %v2769_v24  ;;  %v1184_v36 = vsel %vm830_vm5, %v1179_v35, 0 }
 0x194   : > { %2273 = vmatpush3.bf16.xpose.msra.mxu1 %v950_v32  ;;  %2274 = vmatprep.mubr.msk.bf16.mxu1 %vm2537_vm3, %v2536_v4 }
 0x195   : > { %2284 = vmatprep.subr.bf16.mxu1 %v2536_v4 }
 0x19b   : > { %2275 = vmatmul.mubr.msk.bf16.vlgmr.msra.gmra.mrb[4].mxu1 %vm830_vm5, %v943_v31 }
 0x19c   : > { %2285 = vmatpush3.bf16.xpose.msra.mxu1 %v1070_v34  ;;  %2286 = vmatprep.mubr.msk.bf16.mxu1 %vm2537_vm3, %v2536_v4 }
 0x19d   : > { %2296 = vmatprep.subr.bf16.mxu1 %v2536_v4 }
 0x1a3   : > { %2287 = vmatmul.mubr.msk.bf16.vlgmr.msra.gmra.mrb[8].mxu1 %vm830_vm5, %v2773_v27 }
 0x1a4   : > { %2297 = vmatpush3.bf16.xpose.msra.mxu1 %v1184_v36  ;;  %2298 = vmatprep.mubr.msk.bf16.mxu1 %vm2537_vm3, %v2536_v4 }
 0x1a5   : > { %2308 = vmatprep.subr.bf16.mxu1 %v2536_v4 }
 0x1ab   : > { %2299 = vmatmul.mubr.msk.bf16.vlgmr.msra.gmra.mrb[12].mxu1 %vm830_vm5, %v1177_v37 }
 0x1ac   : > { %2312 = vmatprep.mubr.msk.bf16.mxu1 %vm2537_vm3, %v2536_v4 }
 0x266   : > { %v871_v39 = vpop.f32.mrb[0].mxu1 }
 0x267   : > { %v877_v42 = vmul.f32 0.25, %v871_v39  ;;  %v2264_v43 = vpop.f32.mrb[1].mxu1 }
 0x268   : > { %v874_v44 = vpop.f32.mrb[2].mxu1 }
 0x269   : > { %v2265_v45 = vpop.f32.mrb[3].mxu1  ;;  %v878_v46 = vadd.f32 %v877_v42, %v825_v41 }
 0x26b   : > { %v880_v47 = vsel %vm879_vm7, %v878_v46, -inf }
 0x26c   : > { %881 = vmax.xlane.f32.xlu0 %v880_v47 }
 0x26e   : > { %v986_v48 = vpop.f32.mrb[4].mxu1 }
 0x26f   : > { %v992_v49 = vmul.f32 0.25, %v986_v48  ;;  %v2276_v50 = vpop.f32.mrb[5].mxu1 }
 0x270   : > { %v989_v51 = vpop.f32.mrb[6].mxu1 }
 0x271   : > { %v2277_v52 = vpop.f32.mrb[7].mxu1  ;;  %v993_v53 = vadd.f32 %v992_v49, %v825_v41 }
 0x273   : > { %v994_v54 = vsel %vm879_vm7, %v993_v53, -inf }
 0x274   : > { %995 = vmax.xlane.f32.xlu1 %v994_v54 }
 0x276   : > { %v1106_v55 = vpop.f32.mrb[8].mxu1 }
 0x277   : > { %v1112_v57 = vmul.f32 0.25, %v1106_v55  ;;  %v2288_v58 = vpop.f32.mrb[9].mxu1 }
 0x278   : > { %v1109_v59 = vpop.f32.mrb[10].mxu1 }
 0x279   : > { %v2289_v60 = vpop.f32.mrb[11].mxu1  ;;  %v1113_v61 = vadd.f32 %v1112_v57, %v1061_v56 }
 0x27b   : > { %v1114_v62 = vsel %vm879_vm7, %v1113_v61, -inf }
 0x27c   : > { %1115 = vmax.xlane.f32.xlu0 %v1114_v62 }
 0x27e   : > { %v1220_v63 = vpop.f32.mrb[12].mxu1 }
 0x27f   : > { %v1226_v0 = vmul.f32 0.25, %v1220_v63  ;;  %v2300_v1 = vpop.f32.mrb[13].mxu1  ;;  %v2423_v63 = vld [vmem:[%s2679_s29] sm:$0xff]  }
 0x280   : > { %v1223_v2 = vpop.f32.mrb[14].mxu1  ;;  %2309 = vmatpush3.bf16.msra.mxu1 %v2423_v63 }
 0x281   : > { %v2301_v7 = vpop.f32.mrb[15].mxu1  ;;  %v1227_v8 = vadd.f32 %v1226_v0, %v1061_v56  ;;  %v2424_v0 = vld [vmem:[%s2679_s29 + $0x8] sm:$0xff]   ;;  %2310 = vmatprep.subr.bf16.mxu1 %v2536_v4 }
 0x283   : > { %v1228_v9 = vsel %vm879_vm7, %v1227_v8, -inf }
 0x284   : > { %1229 = vmax.xlane.f32.xlu0 %v1228_v9  ;;  %2311 = vmatpush3.bf16.msra.mxu1 %v2424_v0 }
 0x285   : > { %2324 = vmatprep.subr.bf16.mxu1 %v2536_v4 }
 0x2f9   : > { %v882_v3 = vpop.xlane.xlu0 %881 }
 0x2fa   : > { %v883_v10 = vsub.f32 %v878_v46, %v882_v3 }
 0x2fc   : > { %v884_v11 = vmul.f32 1.442695, %v883_v10 }
 0x2fe   : > { %2443 = vpow2.f32 %v884_v11 }
 0x301   : > { %v996_v12 = vpop.xlane.xlu1 %995 }
 0x302   : > { %v997_v13 = vsub.f32 %v993_v53, %v996_v12 }
 0x304   : > { %v998_v14 = vmul.f32 1.442695, %v997_v13 }
 0x306   : > { %2445 = vpow2.f32 %v998_v14 }
 0x308   : > { %v2444_v15 = vpop.eup %2443 }
 0x309   : > { %v886_v18 = vsel %vm879_vm7, %v2444_v15, 0.0  ;;  %v1116_v19 = vpop.xlane.xlu0 %1115 }
 0x30a   : > { %887 = vadd.xlane.f32.xlu1 %v886_v18  ;;  %v1117_v29 = vsub.f32 %v1113_v61, %v1116_v19  ;;  %v2165_v19 = vld [vmem:[%s3052_s20] ss:$0 sm:$0xff] }
 0x30c   : > { %v1118_v30 = vmul.f32 1.442695, %v1117_v29 }
 0x310   : > { %v2446_v20 = vpop.eup %2445 }
 0x311   : > { %v1230_v21 = vpop.xlane.xlu0 %1229  ;;  %v1000_v22 = vsel %vm879_vm7, %v2446_v20, 0.0 }
 0x312   : > { %v1231_v23 = vsub.f32 %v1227_v8, %v1230_v21  ;;  %1001 = vadd.xlane.f32.xlu0 %v1000_v22 }
 0x314   : > { %v1232_v25 = vmul.f32 1.442695, %v1231_v23 }
 0x316   : > { %2447 = vpow2.f32 %v1232_v25 }
 0x317   : > { %2449 = vpow2.f32 %v1118_v30 }
 0x31b   : > { %892 = vrot.lane.b32.xlu1 %v2769_v24, %s2542_s30 }
 0x320   : > { %v2448_v26 = vpop.eup %2447 }
 0x321   : > { %v1234_v28 = vsel %vm879_vm7, %v2448_v26, 0.0  ;;  %v2450_v31 = vpop.eup %2449 }
 0x322   : > { %1235 = vadd.xlane.f32.xlu0 %v1234_v28  ;;  %v1120_v32 = vsel %vm879_vm7, %v2450_v31, 0.0 }
 0x338   : > { %1006 = vrot.lane.b32.xlu0 %v2769_v24, %s2543_s0 }
 0x33f   : > { %1121 = vadd.xlane.f32.xlu1 %v1120_v32 }
 0x350   : > { %1126 = vrot.lane.b32.xlu1 %v2773_v27, %s2542_s30  ;;  %s3056_s30 = scalar_lea.vmem %s3025_s13, %s2663_s17  ;;  %s3057_s17 = sld [smem:[#allocation18_spill]] (!%p2199_p11) }
 0x354   : > { %1240 = vrot.lane.b32.xlu1 %v2773_v27, %s2543_s0 }
 0x397   : > { %v888_v33 = vpop.xlane.xlu1 %887 }
 0x398   : > { %2451 = vrcp.f32 %v888_v33 }
 0x39b   : > { %v893_v34 = vpop.permute.xlu1 %892 }
 0x39c   : > { %v899_v35 = vsel %vm897_vm9, %v893_v34, 0 }
 0x39d   : > { %2267 = vmatpush3.bf16.msra.mxu0 %v899_v35 }
 0x39e   : > { %2278 = vmatprep.subr.bf16.mxu0 %v2536_v4 }
 0x39f   : > { %v1002_v37 = vpop.xlane.xlu0 %1001 }
 0x3a0   : > { %2453 = vrcp.f32 %v1002_v37 }
 0x3a2   : > { %v2452_v36 = vpop.eup %2451 }
 0x3a3   : > { %v890_v24 = vmul.f32 %v2452_v36, %v2444_v15 }
 0x3a5   : > { %v891_v38 = vpack.c.bf16 %v890_v24, %v890_v24 }
 0x3a7   : > { %2269 = vmatmul.mubr.msk.bf16.vlgmr.msra.gmra.mrb[4].mxu0 %vm879_vm7, %v891_v38 }
 0x3a8   : > { %2280 = vmatprep.mubr.msk.bf16.mxu0 %vm2537_vm3, %v2536_v4 }
 0x3aa   : > { %v2454_v27 = vpop.eup %2453 }
 0x3ab   : > { %v1004_v40 = vmul.f32 %v2454_v27, %v2446_v20  ;;  %v2425_v27 = vld [vmem:[%s2711_s25 + $0x10] sm:$0xff]  }
 0x3ad   : > { %v1005_v43 = vpack.c.bf16 %v1004_v40, %v1004_v40  ;;  %v2427_v40 = vld [vmem:[%s2711_s25 + $0x18] sm:$0xff]  }
 0x3af   : > { %v1236_v39 = vpop.xlane.xlu0 %1235 }
 0x3b3   : > { %v1007_v41 = vpop.permute.xlu0 %1006 }
 0x3b4   : > { %v1012_v42 = vsel %vm897_vm9, %v1007_v41, 0  ;;  %v2428_v41 = vld [vmem:[%s2711_s25 + $0x8] sm:$0xff]  }
 0x3b5   : > { %2279 = vmatpush3.bf16.msra.mxu0 %v1012_v42 }
 0x3b6   : > { %2290 = vmatprep.subr.bf16.mxu0 %v2536_v4 }
 0x3b8   : > { %2281 = vmatmul.mubr.msk.bf16.vlgmr.msra.gmra.mrb[8].mxu0 %vm879_vm7, %v1005_v43 }
 0x3b9   : > { %2292 = vmatprep.mubr.msk.bf16.mxu0 %vm2537_vm3, %v2536_v4 }
 0x3cc   : > { %v1122_v44 = vpop.xlane.xlu1 %1121 }
 0x3cd   : > { %2455 = vrcp.f32 %v1122_v44 }
 0x3ce   : > { %2457 = vrcp.f32 %v1236_v39  ;;  %v2426_v39 = vld [vmem:[%s2711_s25] sm:$0xff]  }
 0x3d0   : > { %v1127_v45 = vpop.permute.xlu1 %1126 }
 0x3d1   : > { %v1132_v46 = vsel %vm897_vm9, %v1127_v45, 0 }
 0x3d2   : > { %2291 = vmatpush3.bf16.msra.mxu0 %v1132_v46 }
 0x3d3   : > { %2302 = vmatprep.subr.bf16.mxu0 %v2536_v4 }
 0x3d4   : > { %v1241_v49 = vpop.permute.xlu1 %1240 }
 0x3d5   : > { %v1246_v52 = vsel %vm897_vm9, %v1241_v49, 0  ;;  %v2169_v49 = vld [vmem:[%s3053_s18] ss:$0 sm:$0xff] }
 0x3d7   : > { %v2456_v47 = vpop.eup %2455 }
 0x3d8   : > { %v1124_v48 = vmul.f32 %v2456_v47, %v2450_v31  ;;  %v2458_v51 = vpop.eup %2457 }
 0x3d9   : > { %v1238_v53 = vmul.f32 %v2458_v51, %v2448_v26  ;;  %v2170_v51 = vld [vmem:[%s3054_s28] ss:$0 sm:$0xff] }
 0x3da   : > { %v1125_v50 = vpack.c.bf16 %v1124_v48, %v1124_v48 }
 0x3db   : > { %v1239_v54 = vpack.c.bf16 %v1238_v53, %v1238_v53 }
 0x3dc   : > { %2293 = vmatmul.mubr.msk.bf16.vlgmr.msra.gmra.mrb[12].mxu0 %vm879_vm7, %v1125_v50 }
 0x3dd   : > { %2303 = vmatpush3.bf16.msra.mxu0 %v1246_v52  ;;  %2304 = vmatprep.mubr.msk.bf16.mxu0 %vm2537_vm3, %v2536_v4 }
 0x3de   : > { %2316 = vmatprep.subr.bf16.mxu0 %v2536_v4 }
 0x3e4   : > { %2305 = vmatmul.mubr.msk.bf16.vlgmr.msra.gmra.mrb[16].mxu0 %vm879_vm7, %v1239_v54 }
 0x3e5   : > { %2320 = vmatprep.mubr.msk.bf16.mxu0 %vm2537_vm3, %v2536_v4  ;;  %2317 = vmatpush3.bf16.msra.mxu0 %v2425_v27 }
 0x3e6   : > { %2318 = vmatprep.subr.bf16.mxu0 %v2536_v4 }
 0x3e9   : > { %2319 = vmatpush3.bf16.msra.mxu0 %v2427_v40  ;;  %v2439_v40 = vld [vmem:[%s2723_s16 + $0x40] sm:$0xff]  }
 0x3ea   : > { %2332 = vmatprep.subr.bf16.mxu0 %v2536_v4 }
 0x47a   : > { %v935_v55 = vpop.f32.mrb[4].mxu0 }
 0x47b   : > { %941 = vst.msk [vmem:[#allocation3] sm:$0xff] %vm830_vm5, %v935_v55  ;;  %v2270_v56 = vpop.f32.mrb[5].mxu0 }
 0x47c   : > { %v938_v57 = vpop.f32.mrb[6].mxu0 }
 0x47d   : > { %v2271_v58 = vpop.f32.mrb[7].mxu0 }
 0x48b   : > { %v1048_v59 = vpop.f32.mrb[8].mxu0 }
 0x48c   : > { %1055 = vrot.lane.b32.xlu0 %v1048_v59, %s2544_s1  ;;  %v2282_v60 = vpop.f32.mrb[9].mxu0 }
 0x48d   : > { %v1051_v61 = vpop.f32.mrb[10].mxu0 }
 0x48e   : > { %v2283_v62 = vpop.f32.mrb[11].mxu0  ;;  %v2429_v61 = vld [vmem:[%s2711_s25 + $0x20] sm:$0xff]  }
 0x4af   : > { %v1168_v1 = vpop.f32.mrb[12].mxu0 }
 0x4b0   : > { %1175 = vst.msk [vmem:[#allocation3 + $0x8] sm:$0xff] %vm830_vm5, %v1168_v1  ;;  %v2294_v2 = vpop.f32.mrb[13].mxu0 }
 0x4b1   : > { %v1171_v7 = vpop.f32.mrb[14].mxu0 }
 0x4b2   : > { %v2295_v8 = vpop.f32.mrb[15].mxu0  ;;  %v2430_v7 = vld [vmem:[%s2711_s25 + $0x28] sm:$0xff]  }
 0x4b7   : > { %v1282_v9 = vpop.f32.mrb[16].mxu0 }
 0x4b8   : > { %1289 = vrot.lane.b32.xlu1 %v1282_v9, %s2544_s1  ;;  %v2306_v3 = vpop.f32.mrb[17].mxu0 }
 0x4b9   : > { %v1285_v10 = vpop.f32.mrb[18].mxu0 }
 0x4ba   : > { %v2307_v11 = vpop.f32.mrb[19].mxu0  ;;  %v2431_v10 = vld [vmem:[%s2723_s16 + $0x20] sm:$0xff]  }
 0x4bb   : > { %v2432_v11 = vld [vmem:[%s2723_s16] sm:$0xff]  }
 0x4fe   : > { %v1056_v12 = vpop.permute.xlu0 %1055 }
 0x4ff   : > { %1059 = vst.msk [vmem:[#allocation3] sm:$0xff] %vm1058_vm10, %v1056_v12  ;;  %v2433_v12 = vld [vmem:[%s2723_s16 + $0x28] sm:$0xff]  }
 0x506   : > { %v1293_v14 = vld [vmem:[#allocation3] sm:$0xff] }
 0x52a   : > { %v1290_v13 = vpop.permute.xlu1 %1289 }
 0x52b   : > { %1292 = vst.msk [vmem:[#allocation3 + $0x8] sm:$0xff] %vm1058_vm10, %v1290_v13  ;;  %v2434_v13 = vld [vmem:[%s2723_s16 + $0x8] sm:$0xff]  }
 0x532   : > { %v1294_v15 = vld [vmem:[#allocation3 + $0x8] sm:$0xff] }
 0x533   : > { %v1295_v18 = vpack.c.bf16 %v1294_v15, %v1293_v14  ;;  %v2435_v14 = vld [vmem:[%s2723_s16 + $0x30] sm:$0xff]  }
 0x534   : > { %v2436_v15 = vld [vmem:[%s2723_s16 + $0x10] sm:$0xff]  }
 0x535   : > { %2313 = vmatmul.mubr.msk.bf16.vlgmr.msra.gmra.mrb[16].mxu1 %vm777_vm4, %v1295_v18  ;;  %v2437_v18 = vld [vmem:[%s2723_s16 + $0x38] sm:$0xff]  }
 0x536   : > { %2328 = vmatprep.mubr.msk.bf16.mxu1 %vm2537_vm3, %v2536_v4  ;;  %2325 = vmatpush3.bf16.msra.mxu1 %v2426_v39 }
 0x537   : > { %2326 = vmatprep.subr.bf16.mxu1 %v2536_v4 }
 0x53a   : > { %2327 = vmatpush3.bf16.msra.mxu1 %v2428_v41 }
 0x53b   : > { %2340 = vmatprep.subr.bf16.mxu1 %v2536_v4 }
 0x608   : > { %v1356_v20 = vpop.f32.mrb[16].mxu1 }
 0x609   : > { %v1357_v21 = vadd.f32 %v2165_v19, %v1356_v20  ;;  %v2314_v22 = vpop.f32.mrb[17].mxu1 }
 0x60a   : > { %v1359_v23 = vpop.f32.mrb[18].mxu1 }
 0x60b   : > { %v1360_v25 = vadd.f32 %v2165_v19, %v1359_v23  ;;  %v2315_v26 = vpop.f32.mrb[19].mxu1  ;;  %v1363_v28 = vadd.f32 %v1357_v21, %v2753_v16  ;;  %v2438_v19 = vld [vmem:[%s2723_s16 + $0x18] sm:$0xff]  }
 0x60d   : > { %v1367_v29 = vsel %vm777_vm4, %v1363_v28, 0.0  ;;  %v1364_v30 = vadd.f32 %v1360_v25, %v2755_v17 }
 0x60e   : > { %1368 = vadd.xlane.f32.xlu0 %v1367_v29 }
 0x60f   : > { %v1370_v31 = vsel %vm777_vm4, %v1364_v30, 0.0 }
 0x610   : > { %1371 = vadd.xlane.f32.xlu1 %v1370_v31 }
 0x69b   : > { %v1369_v32 = vpop.xlane.xlu0 %1368 }
 0x69c   : > { %v1374_v33 = vmul.f32 0.03125, %v1369_v32  ;;  %v2180_v32 = vld [vmem:[%s3055_s19] ss:$0 sm:$0xff] }
 0x69d   : > { %v1372_v34 = vpop.xlane.xlu1 %1371 }
 0x69e   : > { %v1376_v35 = vsub.f32 %v1363_v28, %v1374_v33  ;;  %v1375_v36 = vmul.f32 0.03125, %v1372_v34 }
 0x6a0   : > { %v1377_v37 = vsub.f32 %v1364_v30, %v1375_v36  ;;  %v1378_v24 = vmul.f32 %v1376_v35, %v1376_v35 }
 0x6a2   : > { %v1380_v16 = vsel %vm777_vm4, %v1378_v24, 0.0  ;;  %v1379_v38 = vmul.f32 %v1377_v37, %v1377_v37 }
 0x6a3   : > { %1381 = vadd.xlane.f32.xlu0 %v1380_v16 }
 0x6a4   : > { %v1383_v17 = vsel %vm777_vm4, %v1379_v38, 0.0 }
 0x6a7   : > { %1384 = vadd.xlane.f32.xlu0 %v1383_v17 }
 0x730   : > { %v1382_v42 = vpop.xlane.xlu0 %1381 }
 0x731   : > { %v1386_v43 = vmul.f32 0.03125, %v1382_v42 }
 0x733   : > { %v1388_v44 = vadd.f32 1e-05, %v1386_v43 }
 0x734   : > { %v1385_v45 = vpop.xlane.xlu0 %1384 }
 0x735   : > { %2459 = vrsqrt.f32 %v1388_v44  ;;  %v1387_v46 = vmul.f32 0.03125, %v1385_v45 }
 0x737   : > { %v1389_v47 = vadd.f32 1e-05, %v1387_v46  ;;  %v2440_v46 = vld [vmem:[%s2723_s16 + $0x48] sm:$0xff]  }
 0x739   : > { %2461 = vrsqrt.f32 %v1389_v47  ;;  %v2441_v47 = vld [vmem:[%s2723_s16 + $0x50] sm:$0xff]  }
 0x73f   : > { %v2460_v48 = vpop.eup %2459 }
 0x740   : > { %v1392_v50 = vmul.f32 %v2460_v48, %v1376_v35  ;;  %v2442_v48 = vld [vmem:[%s2723_s16 + $0x58] sm:$0xff]  }
 0x742   : > { %v1400_v52 = vmul.f32 %v2169_v49, %v1392_v50 }
 0x743   : > { %v2462_v53 = vpop.eup %2461 }
 0x744   : > { %v1408_v54 = vadd.f32 %v2170_v51, %v1400_v52  ;;  %v1393_v55 = vmul.f32 %v2462_v53, %v1377_v37 }
 0x746   : > { %v2881_v56 = vmul.f32 %v2706_v5, %v1408_v54  ;;  %v1401_v57 = vmul.f32 %v2169_v49, %v1393_v55 }
 0x748   : > { %1418 = vst.msk [vmem:[#allocation4 + $0x1] sm:$0xff] %vm777_vm4, %v2881_v56  ;;  %v1409_v58 = vadd.f32 %v2170_v51, %v1401_v57 }
 0x74a   : > { %v2886_v59 = vmul.f32 %v2718_v6, %v1409_v58 }
 0x74c   : > { %1419 = vst.msk [vmem:[#allocation4 + $0x11] sm:$0xff] %vm777_vm4, %v2886_v59 }
 0x74f   : > { %v1427_v60 = vld [vmem:[#allocation4 + $0x1] sm:$0xff] }
 0x750   : > { %v1420_v63 = vld [vmem:[#allocation4] sm:$0xff] }
 0x751   : > { %v1546_v9 = vld [vmem:[#allocation4 + $0x2] sm:$0xff] }
 0x753   : > { %v1428_v62 = vld [vmem:[#allocation4 + $0x11] sm:$0xff] }
 0x754   : > { %v1421_v0 = vld [vmem:[#allocation4 + $0x10] sm:$0xff]  ;;  %v1429_v1 = vpack.c.bf16 %v1428_v62, %v1427_v60 }
 0x755   : > { %v1422_v2 = vpack.c.bf16 %v1421_v0, %v1420_v63  ;;  %v1547_v8 = vld [vmem:[#allocation4 + $0x12] sm:$0xff] }
 0x756   : > { %2321 = vmatmul.mubr.msk.bf16.vlgmr.msra.gmra.mrb[20].mxu0 %vm777_vm4, %v1429_v1  ;;  %v1548_v3 = vpack.c.bf16 %v1547_v8, %v1546_v9 }
 0x757   : > { %2329 = vmatmul.mubr.msk.bf16.vlgmr.msra.gmra.mrb[20].mxu1 %vm777_vm4, %v1422_v2  ;;  %2333 = vmatpush3.bf16.msra.mxu0 %v2429_v61 }
 0x758   : > { %2336 = vmatprep.mubr.msk.bf16.mxu0 %vm2537_vm3, %v2536_v4  ;;  %2334 = vmatprep.subr.bf16.mxu0 %v2536_v4 }
 0x759   : > { %2348 = vmatprep.mubr.msk.bf16.mxu1 %vm2537_vm3, %v2536_v4  ;;  %2341 = vmatpush3.bf16.msra.mxu1 %v2431_v10 }
 0x75a   : > { %2342 = vmatprep.subr.bf16.mxu1 %v2536_v4 }
 0x75b   : > { %2335 = vmatpush3.bf16.msra.mxu0 %v2430_v7 }
 0x75c   : > { %2352 = vmatprep.subr.bf16.mxu0 %v2536_v4 }
 0x75d   : > { %2343 = vmatpush3.bf16.msra.mxu1 %v2433_v12 }
 0x75e   : > { %2337 = vmatmul.mubr.msk.bf16.vlgmr.msra.gmra.mrb[24].mxu0 %vm777_vm4, %v1548_v3  ;;  %2344 = vmatprep.subr.bf16.mxu1 %v2536_v4 }
 0x75f   : > { %2360 = vmatprep.mubr.msk.bf16.mxu0 %vm2537_vm3, %v2536_v4  ;;  %2353 = vmatpush3.bf16.msra.mxu0 %v2432_v11 }
 0x760   : > { %2354 = vmatprep.subr.bf16.mxu0 %v2536_v4 }
 0x761   : > { %2345 = vmatpush3.bf16.msra.mxu1 %v2435_v14 }
 0x762   : > { %2346 = vmatprep.subr.bf16.mxu1 %v2536_v4 }
 0x763   : > { %2355 = vmatpush3.bf16.msra.mxu0 %v2434_v13 }
 0x764   : > { %2356 = vmatprep.subr.bf16.mxu0 %v2536_v4 }
 0x765   : > { %2347 = vmatpush3.bf16.msra.mxu1 %v2437_v18 }
 0x766   : > { %2364 = vmatprep.subr.bf16.mxu1 %v2536_v4 }
 0x767   : > { %2357 = vmatpush3.bf16.msra.mxu0 %v2436_v15 }
 0x768   : > { %2358 = vmatprep.subr.bf16.mxu0 %v2536_v4 }
 0x76b   : > { %2359 = vmatpush3.bf16.msra.mxu0 %v2438_v19 }
 0x829   : > { %v1483_v20 = vpop.f32.mrb[20].mxu0 }
 0x82a   : > { %v1539_v21 = vpop.f32.mrb[20].mxu1  ;;  %v2322_v23 = vpop.f32.mrb[21].mxu0 }
 0x82b   : > { %v1540_v22 = vadd.f32 %v1539_v21, %v1483_v20  ;;  %v2330_v25 = vpop.f32.mrb[21].mxu1  ;;  %v1486_v26 = vpop.f32.mrb[22].mxu0 }
 0x82c   : > { %v1542_v28 = vpop.f32.mrb[22].mxu1  ;;  %v2323_v30 = vpop.f32.mrb[23].mxu0 }
 0x82d   : > { %v1543_v29 = vadd.f32 %v1542_v28, %v1486_v26  ;;  %v2331_v31 = vpop.f32.mrb[23].mxu1 }
 0x831   : > { %v1602_v33 = vpop.f32.mrb[24].mxu0 }
 0x832   : > { %v1609_v34 = vadd.f32 %v1602_v33, %v1540_v22  ;;  %v2338_v35 = vpop.f32.mrb[25].mxu0 }
 0x833   : > { %v1605_v36 = vpop.f32.mrb[26].mxu0 }
 0x834   : > { %v1617_v37 = vadd.f32 %v2180_v32, %v1609_v34  ;;  %v1610_v24 = vadd.f32 %v1605_v36, %v1543_v29  ;;  %v2339_v16 = vpop.f32.mrb[27].mxu0  ;;  %v2197_v34 = vld [vmem:[%s717_s4] ss:$0 sm:$0xff] }
 0x836   : > { %v1619_v38 = vmax.f32 %v1617_v37, 0.0  ;;  %v1618_v17 = vadd.f32 %v2180_v32, %v1610_v24  ;;  %v2198_v37 = vld [vmem:[%s720_s21] ss:$0 sm:$0xff] }
 0x838   : > { %1628 = vst.msk [vmem:[#allocation5 + $0x1] sm:$0xff] %vm1627_vm13, %v1619_v38  ;;  %v1620_v27 = vmax.f32 %v1618_v17, 0.0 }
 0x83a   : > { %1629 = vst.msk [vmem:[#allocation5 + $0x11] sm:$0xff] %vm1627_vm13, %v1620_v27 }
 0x83f   : > { %v1641_v39 = vld [vmem:[#allocation5 + $0x1] sm:$0xff] }
 0x840   : > { %v1630_v42 = vld [vmem:[#allocation5] sm:$0xff] }
 0x841   : > { %v1642_v41 = vld [vmem:[#allocation5 + $0x11] sm:$0xff]  ;;  %v1788_v50 = vld [vmem:[#allocation5 + $0x2] sm:$0xff] }
 0x842   : > { %v1631_v43 = vld [vmem:[#allocation5 + $0x10] sm:$0xff]  ;;  %v1643_v44 = vpack.c.bf16 %v1642_v41, %v1641_v39  ;;  %v1931_v41 = vld [vmem:[%s3057_s17] sm:$0xff] (!%p2199_p11) }
 0x843   : > { %v1632_v45 = vpack.c.bf16 %v1631_v43, %v1630_v42  ;;  %v1789_v49 = vld [vmem:[#allocation5 + $0x12] sm:$0xff]  ;;  %v1932_v42 = vld [vmem:[%s3057_s17 + $0x8] sm:$0xff] (!%p2199_p11) }
 0x844   : > { %2349 = vmatmul.mubr.msk.bf16.vlgmr.msra.gmra.mrb[24].mxu1 %vm1627_vm13, %v1643_v44  ;;  %v1790_v51 = vpack.c.bf16 %v1789_v49, %v1788_v50 }
 0x845   : > { %2361 = vmatmul.mubr.msk.bf16.vlgmr.msra.gmra.mrb[28].mxu0 %vm1627_vm13, %v1632_v45  ;;  %2365 = vmatpush3.bf16.msra.mxu1 %v2439_v40 }
 0x846   : > { %2372 = vmatprep.mubr.msk.bf16.mxu1 %vm2537_vm3, %v2536_v4  ;;  %2366 = vmatprep.subr.bf16.mxu1 %v2536_v4 }
 0x849   : > { %2367 = vmatpush3.bf16.msra.mxu1 %v2440_v46 }
 0x84a   : > { %2368 = vmatprep.subr.bf16.mxu1 %v2536_v4 }
 0x84d   : > { %2369 = vmatpush3.bf16.msra.mxu1 %v2441_v47 }
 0x84e   : > { %2370 = vmatprep.subr.bf16.mxu1 %v2536_v4  ;;  %v2196_v4 = vld [vmem:[%s3056_s30] ss:$0 sm:$0xff] }
 0x851   : > { %2371 = vmatpush3.bf16.msra.mxu1 %v2442_v48 }
 0x854   : > { %2373 = vmatmul.mubr.msk.bf16.vlgmr.msra.gmra.mrb[28].mxu1 %vm1627_vm13, %v1790_v51 }
 0x917   : > { %v1713_v52 = vpop.f32.mrb[24].mxu1 }
 0x918   : > { %v1781_v53 = vpop.f32.mrb[28].mxu0  ;;  %v2350_v55 = vpop.f32.mrb[25].mxu1 }
 0x919   : > { %v1782_v54 = vadd.f32 %v1781_v53, %v1713_v52  ;;  %v2362_v57 = vpop.f32.mrb[29].mxu0  ;;  %v1716_v58 = vpop.f32.mrb[26].mxu1 }
 0x91a   : > { %v1784_v60 = vpop.f32.mrb[30].mxu0  ;;  %v2351_v62 = vpop.f32.mrb[27].mxu1 }
 0x91b   : > { %v1785_v61 = vadd.f32 %v1784_v60, %v1716_v58  ;;  %v2363_v63 = vpop.f32.mrb[31].mxu0 }
 0x927   : > { %v1860_v0 = vpop.f32.mrb[28].mxu1 }
 0x928   : > { %v1867_v1 = vadd.f32 %v1860_v0, %v1782_v54  ;;  %v2374_v2 = vpop.f32.mrb[29].mxu1 }
 0x929   : > { %v1863_v7 = vpop.f32.mrb[30].mxu1 }
 0x92a   : > { %v1875_v8 = vadd.f32 %v2196_v4, %v1867_v1  ;;  %v1868_v9 = vadd.f32 %v1863_v7, %v1785_v61  ;;  %v2375_v3 = vpop.f32.mrb[31].mxu1 }
 0x92c   : > { %v1876_v10 = vadd.f32 %v2196_v4, %v1868_v9  ;;  %v1877_v11 = vadd.f32 %v1875_v8, %v2881_v56 }
 0x92e   : > { %v1881_v12 = vsel %vm777_vm4, %v1877_v11, 0.0  ;;  %v1878_v13 = vadd.f32 %v1876_v10, %v2886_v59 }
 0x92f   : > { %1882 = vadd.xlane.f32.xlu1 %v1881_v12 }
 0x930   : > { %v1884_v14 = vsel %vm777_vm4, %v1878_v13, 0.0 }
 0x931   : > { %1885 = vadd.xlane.f32.xlu0 %v1884_v14 }
 0x9bc   : > { %v1883_v15 = vpop.xlane.xlu1 %1882 }
 0x9bd   : > { %v1887_v18 = vmul.f32 0.03125, %v1883_v15 }
 0x9be   : > { %v1886_v19 = vpop.xlane.xlu0 %1885 }
 0x9bf   : > { %v1889_v20 = vsub.f32 %v1877_v11, %v1887_v18  ;;  %v1888_v21 = vmul.f32 0.03125, %v1886_v19 }
 0x9c1   : > { %v1890_v22 = vsub.f32 %v1878_v13, %v1888_v21  ;;  %v1891_v23 = vmul.f32 %v1889_v20, %v1889_v20 }
 0x9c3   : > { %v1893_v25 = vsel %vm777_vm4, %v1891_v23, 0.0  ;;  %v1892_v26 = vmul.f32 %v1890_v22, %v1890_v22 }
 0x9c4   : > { %1894 = vadd.xlane.f32.xlu1 %v1893_v25 }
 0x9c5   : > { %v1896_v56 = vsel %vm777_vm4, %v1892_v26, 0.0 }
 0x9c6   : > { %1897 = vadd.xlane.f32.xlu0 %v1896_v56 }
 0xa51   : > { %v1895_v59 = vpop.xlane.xlu1 %1894 }
 0xa52   : > { %v1899_v28 = vmul.f32 0.03125, %v1895_v59 }
 0xa53   : > { %v1898_v29 = vpop.xlane.xlu0 %1897 }
 0xa54   : > { %v1901_v30 = vadd.f32 1e-05, %v1899_v28  ;;  %v1900_v31 = vmul.f32 0.03125, %v1898_v29 }
 0xa56   : > { %2463 = vrsqrt.f32 %v1901_v30  ;;  %v1902_v32 = vadd.f32 1e-05, %v1900_v31 }
 0xa58   : > { %2465 = vrsqrt.f32 %v1902_v32 }
 0xa60   : > { %v2464_v33 = vpop.eup %2463 }
 0xa61   : > { %v1905_v35 = vmul.f32 %v2464_v33, %v1889_v20 }
 0xa62   : > { %v2466_v36 = vpop.eup %2465 }
 0xa63   : > { %v1913_v24 = vmul.f32 %v2197_v34, %v1905_v35  ;;  %v1906_v16 = vmul.f32 %v2466_v36, %v1890_v22 }
 0xa65   : > { %v1921_v38 = vadd.f32 %v2198_v37, %v1913_v24  ;;  %v1914_v17 = vmul.f32 %v2197_v34, %v1906_v16  ;;  %1930 = sbr.rel (%p2199_p11) target bundleno = 2670 (0xa6e), region = 88 }
 0xa67   : > { %v1923_v27 = vmul.f32 %v2706_v5, %v1921_v38  ;;  %v1922_v39 = vadd.f32 %v2198_v37, %v1914_v17 }
 0xa69   : > { %1925 = vst.msk [vmem:[#allocation2] sm:$0xff] %vm777_vm4, %v1923_v27  ;;  %v1924_v40 = vmul.f32 %v2718_v6, %v1922_v39  ;;  %v1933_v43 = vadd.f32 (!%p2199_p11), %v1931_v41, %v1923_v27 }
 0xa6b   : > { %1926 = vst.msk [vmem:[#allocation2 + $0x8] sm:$0xff] %vm777_vm4, %v1924_v40  ;;  %v1934_v5 = vadd.f32 (!%p2199_p11), %v1932_v42, %v1924_v40  ;;  %1935 = vst.msk [vmem:[#allocation8] sm:$0xff] (!%p2199_p11), %vm777_vm4, %v1933_v43 }
 0xa6d   : > { %1936 = vst.msk [vmem:[#allocation8 + $0x8] sm:$0xff] %vm777_vm4, %v1934_v5 }
 0xa6e PF: > { %s3058_s27 = sld [smem:[#allocation13_spill]]  ;;  %s2545_s6 = smov [#allocation8]  }
 0xa6f   : > { %s1946_s10 = sshll.u32 %s2545_s6, 4  ;;  %s1947_s10 = int_to_ptr.vmem [resolvable:$true] %s1946_s10 }
 0xa70   : > { %s2479_s28 = scalar_lea.vmem %s1947_s10, 256  ;;  %p2486_p2 = scmp.lt.s32.totalorder %s1947_s10, %s1947_s10 }
 0xa71   : > { %p2480_p13 = scmp.ne.s32.totalorder %s1947_s10, %s2479_s28  ;;  %p2487_p3 = scmp.lt.s32.totalorder %s2479_s28, %s2479_s28 }
 0xa73   : > { %p2488_p4 = por %p2487_p3, %p2486_p2 }
 0xa74   : > { %s3059_s18 = sadd.s32 4294967295, %s3058_s27  }
 0xa75   : > { %p2977_p12 = scmp.eq.s32.totalorder %s3059_s18, 1 }
 0xa77   : > { %p2481_p0 = pnand %p2480_p13, %p2977_p12 }
 0xa79   : > { %p2482_p1 = pneg %p2481_p0 }
 0xa7b   : > { %p2489_p5 = pnand %p2488_p4, %p2482_p1 }
 0xa7d   : > { %2492 = shalt.err (!%p2489_p5)
}
 0xa7e   : > { %s3061_s19 = sld [smem:[#allocation22_spill]] }
 0xa84   : > { %s2493_s16 = scalar_lea.hbm %s3061_s19, 256 }
 0xa85   : > { %p2494_p6 = scmp.ne.s32.totalorder %s3061_s19, %s2493_s16  ;;  %p2499_p9 = scmp.lt.u32.totalorder %s2493_s16, %s3061_s19 }
 0xa87   : > { %p2495_p7 = pnand %p2494_p6, %p2977_p12 }
 0xa89   : > { %p2496_p8 = pneg %p2495_p7 }
 0xa8b   : > { %p2501_p10 = pnand %p2499_p9, %p2496_p8 }
 0xa8d   : > { %2504 = shalt.err (!%p2501_p10)
}
 0xa8e   : > { %s2546_s29 = smov 128   ;;  %s2547_s2 = smov 8  }
 0xa8f   : > { %2379 = dma.vmem_to_hbm [thread:$0]  (%p2977_p12), %s1947_s10, 256, %s3061_s19, [#allocation9], %s2546_s29, %s2546_s29, %s2547_s2  }
 0xa90   : > { %2520 = dma.done.wait (%p2977_p12), [#allocation9], 256  }
 0xa91   : > { %2522 = vsyncadd (%p2977_p12), [#allocation9], 4294967040 }
 0xa92 PF: > { %s3062_s21 = sld [smem:[#allocation13_spill]]  ;;  %s3063_s26 = sld [smem:[#allocation12_spill]] }
 0xa93   : > { %s3064_s27 = sld [smem:[#allocation14_spill]] }
 0xa98   : > { %s33_s28 = sadd.s32 1, %s3062_s21  }
 0xa99   : > { %p30_p11 = scmp.ge.s32.totalorder %s33_s28, 4  }
 0xa9b   :  { %32 = sbr.rel (!%p30_p11) target bundleno = 24 (0x18), region = 156 }
 0xaa2   :  { %1962 = vsyncpa [#allocation9], 1 }
 0xaa3   :  { %1964 = vsyncpa [#allocation9 + $0x1], 1 }

</bundles_post_ra>
